<compile_context>
chip_gen: v7x
topology: tpu7x:2x2x1
jax: 0.10.0
libtpu: 0.0.40
codegen_flags: <defaults>
</compile_context>

<pallas_src>
import functools

import jax
import jax.numpy as jnp
from jax import lax
from jax.experimental import pallas as pl
from jax.experimental.pallas import tpu as pltpu

_GUARD = 16  # zero guard rows appended to the flattened padded input


def _relu_conv_bn_kernel(x_ref, w_ref, gamma_ref, beta_ref, o_ref, *, N, H, W):
    """One (Cout-block, kh) grid step of fused ReLU->3x3 conv->BatchNorm.

    x_ref:     (N*Hp*Wp + 16, Cin)  zero-padded, post-ReLU input, bf16
    w_ref:     (3*Cin, Cb)          taps for this kh, rows = kw*Cin + cin, bf16
    gamma_ref: (1, Cb)              BN scale, f32
    beta_ref:  (1, Cb)              BN shift, f32
    o_ref:     (N*H*Wp, Cb)         f32 accumulator / final output (lane-dense;
                                    the 2 pad columns per row are dropped by the
                                    wrapper and masked out of the BN stats)
    """
    Cin = x_ref.shape[1]
    Hp, Wp = H + 2, W + 2
    M = H * Wp                       # output rows per image (incl. 2 pad cols/row)
    M_ext = M + _GUARD               # slab length (multiple of 16 when M is)

    kh = pl.program_id(1)
    last_kh = pl.num_programs(1) - 1

    @pl.when(kh == 0)
    def _init():
        o_ref[...] = jnp.zeros_like(o_ref)

    parts_all = []
    for n in range(N):                                   # static, N is tiny
        start = n * Hp * Wp + kh * Wp                    # multiple of Wp
        if Wp % 16 == 0:
            start = pl.multiple_of(start, 16)
        elif Wp % 8 == 0:
            start = pl.multiple_of(start, 8)
        slab = x_ref[pl.ds(start, M_ext), :]             # (M_ext, Cin) bf16, aligned
        taps = []
        for kw in range(3):                              # static
            tap = w_ref[kw * Cin:(kw + 1) * Cin, :]      # (Cin, Cb) bf16, aligned
            taps.append(jnp.dot(slab, tap, preferred_element_type=jnp.float32))
        # Fold the kw shift into the partial sums:
        #   conv[r] += p0[r] + p1[r+1] + p2[r+2]
        # Rows past M only read the zero guard rows / feed masked pad columns.
        part_n = taps[0][0:M, :] + taps[1][1:1 + M, :] + taps[2][2:2 + M, :]
        parts_all.append(part_n)
    contrib = parts_all[0] if N == 1 else jnp.concatenate(parts_all, axis=0)
    o_ref[...] += contrib

    @pl.when(kh == last_kh)
    def _finalize():
        conv = o_ref[...]                                # (N*M, Cb) f32
        rows = N * M
        col = lax.broadcasted_iota(jnp.int32, (rows, 1), 0) % Wp
        valid = col < W                                  # mask the 2 pad columns
        inv_cnt = 1.0 / float(N * H * W)
        masked = jnp.where(valid, conv, 0.0)
        mean = jnp.sum(masked, axis=0, keepdims=True) * inv_cnt
        var = jnp.sum(masked * masked, axis=0, keepdims=True) * inv_cnt - mean * mean
        inv = lax.rsqrt(var + 1e-5)
        o_ref[...] = ((conv - mean) * inv * gamma_ref[...]
                      + beta_ref[...]).astype(o_ref.dtype)


def _pick_block_cout(cout):
    """Cb=128 on v7x (2 TensorCores -> 2 parallel Cout blocks), else 256."""
    kind = ""
    try:
        kind = jax.devices()[0].device_kind.lower()
    except Exception:
        pass
    cb = 128 if ("v7" in kind or "7x" in kind) else 256
    cb = min(cb, cout)
    while cb > 1 and cout % cb != 0:
        cb //= 2
    return max(cb, 1)


def relu_conv_bn(x_nchw, w_oihw, gamma, beta, *, block_cout=None):
    """x_nchw: (N, Cin, H, W); w_oihw: (Cout, Cin, 3, 3); gamma/beta: (Cout,)."""
    N, Cin, H, W = x_nchw.shape
    Cout = w_oihw.shape[0]
    assert w_oihw.shape == (Cout, Cin, 3, 3)
    Hp, Wp = H + 2, W + 2
    Cb = _pick_block_cout(Cout) if block_cout is None else block_cout
    assert Cout % Cb == 0

    # Glue: NCHW -> NHWC with ReLU fused into the copy, zero pad H/W by 1,
    # flatten spatial, append zero guard rows, cast to bf16 for the MXU.
    x_nhwc = jnp.maximum(jnp.transpose(x_nchw, (0, 2, 3, 1)), 0.0).astype(jnp.bfloat16)
    x_pad = jnp.pad(x_nhwc, ((0, 0), (1, 1), (1, 1), (0, 0)))
    x_flat = jnp.pad(x_pad.reshape(N * Hp * Wp, Cin), ((0, _GUARD), (0, 0)))
    # Weights: OIHW -> (kh, kw, cin, cout) -> (9*Cin, Cout), row = (kh*3+kw)*Cin+cin.
    w_flat = (jnp.transpose(w_oihw, (2, 3, 1, 0))
              .astype(jnp.bfloat16).reshape(9 * Cin, Cout))
    gamma2 = gamma.reshape(1, Cout).astype(jnp.float32)
    beta2 = beta.reshape(1, Cout).astype(jnp.float32)

    M = H * Wp
    assert x_flat.shape[0] == N * Hp * Wp + _GUARD
    assert (2 * Wp + M + _GUARD) <= Hp * Wp + _GUARD  # kh-slab slices stay in bounds

    kernel = functools.partial(_relu_conv_bn_kernel, N=N, H=H, W=W)

    out_flat = pl.pallas_call(
        kernel,
        out_shape=jax.ShapeDtypeStruct((N * M, Cout), jnp.float32),
        grid=(Cout // Cb, 3),
        in_specs=[
            # resident, post-ReLU, padded input (constant index -> loaded once)
            pl.BlockSpec((N * Hp * Wp + _GUARD, Cin), lambda j, kh: (0, 0)),
            # weight slab for this kh / Cout block (double-buffered across grid)
            pl.BlockSpec((3 * Cin, Cb), lambda j, kh: (kh, j)),
            pl.BlockSpec((1, Cb), lambda j, kh: (0, j)),   # gamma
            pl.BlockSpec((1, Cb), lambda j, kh: (0, j)),   # beta
        ],
        # flat, lane-dense output; constant along kh -> acts as the accumulator
        out_specs=pl.BlockSpec((N * M, Cb), lambda j, kh: (0, j)),
        compiler_params=pltpu.CompilerParams(
            dimension_semantics=("parallel", "arbitrary")),
    )(x_flat, w_flat, gamma2, beta2)

    # Glue: drop the 2 pad columns, NHWC -> NCHW.
    out = out_flat.reshape(N, H, Wp, Cout)[:, :, :W, :]
    return jnp.transpose(out, (0, 3, 1, 2)).astype(x_nchw.dtype)


def _reference(x_nchw, w_oihw, gamma, beta, *, matmul_dtype=jnp.float32):
    """Pure-JAX reference (same semantics as the PyTorch module forward)."""
    x = jnp.maximum(x_nchw, 0.0).astype(matmul_dtype)
    w = w_oihw.astype(matmul_dtype)
    y = lax.conv_general_dilated(
        x, w, window_strides=(1, 1), padding=((1, 1), (1, 1)),
        dimension_numbers=("NCHW", "OIHW", "NCHW"),
        preferred_element_type=jnp.float32)
    mean = jnp.mean(y, axis=(0, 2, 3), keepdims=True)
    var = jnp.mean((y - mean) ** 2, axis=(0, 2, 3), keepdims=True)   # biased
    inv = lax.rsqrt(var + 1e-5)
    g = gamma.reshape(1, -1, 1, 1)
    b = beta.reshape(1, -1, 1, 1)
    return (y - mean) * inv * g + b


if __name__ == "__main__":
    # Shapes matching the module: x ~ [1, 256, 14, 14], conv 256->256 3x3.
    N, C, H, W = 1, 256, 14, 14
    key = jax.random.PRNGKey(0)
    kx, kw = jax.random.split(key)

    x = jax.random.normal(kx, (N, C, H, W), dtype=jnp.float32)
    fan_in = C * 3 * 3
    w = jax.random.normal(kw, (C, C, 3, 3), dtype=jnp.float32) * (1.0 / fan_in) ** 0.5
    gamma = jnp.ones((C,), dtype=jnp.float32)   # BatchNorm2d default weight
    beta = jnp.zeros((C,), dtype=jnp.float32)   # BatchNorm2d default bias

    out = jax.block_until_ready(relu_conv_bn(x, w, gamma, beta))
    assert out.shape == (N, C, H, W), out.shape

    # Tight check against a reference using the same bf16 operand rounding
    # (isolates kernel logic from the intentional bf16 cast).
    ref_bf16 = _reference(x, w, gamma, beta, matmul_dtype=jnp.bfloat16)
    assert jnp.allclose(out, ref_bf16, atol=2e-3, rtol=2e-3), (
        float(jnp.max(jnp.abs(out - ref_bf16))))

    # Loose sanity check against the full-f32 reference (bf16 rounding of a
    # 2304-term contraction costs a few 1e-3 absolute).
    ref_f32 = _reference(x, w, gamma, beta, matmul_dtype=jnp.float32)
    assert jnp.allclose(out, ref_f32, atol=8e-2, rtol=8e-2), (
        float(jnp.max(jnp.abs(out - ref_f32))))

    print("KERNEL_OK")
</pallas_src>

<mosaic_0001>
module attributes {stable_mosaic.version = 11 : i64} {
  func.func @_relu_conv_bn_kernel(%arg0: i32, %arg1: i32, %arg2: memref<272x256xbf16, #tpu.memory_space<vmem>>, %arg3: memref<768x256xbf16, #tpu.memory_space<vmem>>, %arg4: memref<1x256xf32, #tpu.memory_space<vmem>>, %arg5: memref<1x256xf32, #tpu.memory_space<vmem>>, %arg6: memref<224x256xf32, #tpu.memory_space<vmem>>) attributes {dimension_semantics = [#tpu.dimension_semantics<parallel>, #tpu.dimension_semantics<arbitrary>], iteration_bounds = array<i64: 1, 3>, scalar_prefetch = 0 : i64, scratch_operands = 0 : i64, tpu.core_type = #tpu.core_type<tc>, window_params = [{pipeline_mode = #tpu.pipeline_mode<synchronous>, transform_indices = @transform_0, window_bounds = array<i64: 272, 256>}, {transform_indices = @transform_1, window_bounds = array<i64: 768, 256>}, {transform_indices = @transform_2, window_bounds = array<i64: 1, 256>}, {transform_indices = @transform_3, window_bounds = array<i64: 1, 256>}, {transform_indices = @transform_4, window_bounds = array<i64: 224, 256>}]} {
    %c0_i32 = arith.constant 0 : i32
    %0 = arith.cmpi eq, %arg1, %c0_i32 : i32
    %1 = arith.extui %0 : i1 to i32
    %c0_i32_0 = arith.constant 0 : i32
    %2 = arith.cmpi ne, %1, %c0_i32_0 : i32
    scf.if %2 {
      %cst_13 = arith.constant 0.000000e+00 : f32
      %25 = vector.broadcast %cst_13 : f32 to vector<224x256xf32>
      %c0_14 = arith.constant 0 : index
      %c0_15 = arith.constant 0 : index
      %26 = vector.load %arg6[%c0_14, %c0_15] : memref<224x256xf32, #tpu.memory_space<vmem>>, vector<224x256xf32>
      tpu.vector_store %arg6[%c0_14, %c0_15], %25 {strides = array<i32>} : memref<224x256xf32, #tpu.memory_space<vmem>>, vector<224x256xf32>,
    } else {
    }
    %c16_i32 = arith.constant 16 : i32
    %3 = arith.muli %arg1, %c16_i32 : i32
    %c0_i32_1 = arith.constant 0 : i32
    %4 = arith.addi %c0_i32_1, %3 : i32
    %5 = tpu.assume_multiple %4, 16 : i32
    %6 = arith.index_cast %5 : i32 to index
    %c0 = arith.constant 0 : index
    %7 = vector.load %arg2[%6, %c0] : memref<272x256xbf16, #tpu.memory_space<vmem>>, vector<240x256xbf16>
    %c0_2 = arith.constant 0 : index
    %c0_3 = arith.constant 0 : index
    %8 = vector.load %arg3[%c0_2, %c0_3] : memref<768x256xbf16, #tpu.memory_space<vmem>>, vector<256x256xbf16>
    %cst = arith.constant dense<0.000000e+00> : vector<240x256xf32>
    %9 = tpu.matmul %7, %8, %cst {dimension_numbers = #tpu.dot_dimension_numbers<[1], [0], [0], [1], [0, 0, 1, 1], [], []>} : vector<240x256xbf16>, vector<256x256xbf16>, vector<240x256xf32> -> vector<240x256xf32>
    %c256 = arith.constant 256 : index
    %c0_4 = arith.constant 0 : index
    %10 = vector.load %arg3[%c256, %c0_4] : memref<768x256xbf16, #tpu.memory_space<vmem>>, vector<256x256xbf16>
    %cst_5 = arith.constant dense<0.000000e+00> : vector<240x256xf32>
    %11 = tpu.matmul %7, %10, %cst_5 {dimension_numbers = #tpu.dot_dimension_numbers<[1], [0], [0], [1], [0, 0, 1, 1], [], []>} : vector<240x256xbf16>, vector<256x256xbf16>, vector<240x256xf32> -> vector<240x256xf32>
    %c512 = arith.constant 512 : index
    %c0_6 = arith.constant 0 : index
    %12 = vector.load %arg3[%c512, %c0_6] : memref<768x256xbf16, #tpu.memory_space<vmem>>, vector<256x256xbf16>
    %cst_7 = arith.constant dense<0.000000e+00> : vector<240x256xf32>
    %13 = tpu.matmul %7, %12, %cst_7 {dimension_numbers = #tpu.dot_dimension_numbers<[1], [0], [0], [1], [0, 0, 1, 1], [], []>} : vector<240x256xbf16>, vector<256x256xbf16>, vector<240x256xf32> -> vector<240x256xf32>
    %14 = vector.extract_strided_slice %9 {offsets = [0, 0], sizes = [224, 256], strides = [1, 1]} : vector<240x256xf32> to vector<224x256xf32>
    %15 = vector.extract_strided_slice %11 {offsets = [1, 0], sizes = [224, 256], strides = [1, 1]} : vector<240x256xf32> to vector<224x256xf32>
    %16 = arith.addf %14, %15 : vector<224x256xf32>
    %17 = vector.extract_strided_slice %13 {offsets = [2, 0], sizes = [224, 256], strides = [1, 1]} : vector<240x256xf32> to vector<224x256xf32>
    %18 = arith.addf %16, %17 : vector<224x256xf32>
    %c0_8 = arith.constant 0 : index
    %c0_9 = arith.constant 0 : index
    %19 = vector.load %arg6[%c0_8, %c0_9] : memref<224x256xf32, #tpu.memory_space<vmem>>, vector<224x256xf32>
    %20 = arith.addf %19, %18 : vector<224x256xf32>
    %c0_10 = arith.constant 0 : index
    %c0_11 = arith.constant 0 : index
    %21 = vector.load %arg6[%c0_10, %c0_11] : memref<224x256xf32, #tpu.memory_space<vmem>>, vector<224x256xf32>
    tpu.vector_store %arg6[%c0_10, %c0_11], %20 {strides = array<i32>} : memref<224x256xf32, #tpu.memory_space<vmem>>, vector<224x256xf32>,
    %c2_i32 = arith.constant 2 : i32
    %22 = arith.cmpi eq, %arg1, %c2_i32 : i32
    %23 = arith.extui %22 : i1 to i32
    %c0_i32_12 = arith.constant 0 : i32
    %24 = arith.cmpi ne, %23, %c0_i32_12 : i32
    scf.if %24 {
      %c0_13 = arith.constant 0 : index
      %c0_14 = arith.constant 0 : index
      %25 = vector.load %arg6[%c0_13, %c0_14] : memref<224x256xf32, #tpu.memory_space<vmem>>, vector<224x256xf32>
      %26 = tpu.iota {dimensions = array<i32: 0>} : vector<224x1xi32>
      %c16_i32_15 = arith.constant 16 : i32
      %c0_i32_16 = arith.constant 0 : i32
      %27 = arith.cmpi eq, %c16_i32_15, %c0_i32_16 : i32
      %c1_i32 = arith.constant 1 : i32
      %28 = arith.select %27, %c1_i32, %c16_i32_15 : i32
      %29 = vector.broadcast %28 : i32 to vector<224x1xi32>
      %30 = arith.remsi %26, %29 : vector<224x1xi32>
      %c0_i32_17 = arith.constant 0 : i32
      %31 = vector.broadcast %c0_i32_17 : i32 to vector<224x1xi32>
      %32 = arith.cmpi ne, %30, %31 : vector<224x1xi32>
      %c0_i32_18 = arith.constant 0 : i32
      %33 = vector.broadcast %c0_i32_18 : i32 to vector<224x1xi32>
      %34 = arith.cmpi slt, %30, %33 : vector<224x1xi32>
      %c0_i32_19 = arith.constant 0 : i32
      %35 = arith.cmpi slt, %28, %c0_i32_19 : i32
      %36 = vector.broadcast %35 : i1 to vector<224x1xi1>
      %37 = vector.broadcast %36 : vector<224x1xi1> to vector<224x1xi1>
      %38 = arith.xori %34, %37 : vector<224x1xi1>
      %39 = arith.andi %38, %32 : vector<224x1xi1>
      %40 = vector.broadcast %28 : i32 to vector<224x1xi32>
      %41 = arith.addi %30, %40 : vector<224x1xi32>
      %42 = arith.select %39, %41, %30 : vector<224x1xi1>, vector<224x1xi32>
      %c14_i32 = arith.constant 14 : i32
      %43 = vector.broadcast %c14_i32 : i32 to vector<224x1xi32>
      %44 = arith.cmpi slt, %42, %43 : vector<224x1xi32>
      %cst_20 = arith.constant 0.000000e+00 : f32
      %45 = vector.shape_cast %44 : vector<224x1xi1> to vector<224x1xi1>
      %46 = vector.broadcast %45 : vector<224x1xi1> to vector<224x256xi1>
      %47 = vector.broadcast %cst_20 : f32 to vector<224x256xf32>
      %48 = arith.select %46, %25, %47 : vector<224x256xi1>, vector<224x256xf32>
      %cst_21 = arith.constant dense<0.000000e+00> : vector<256xf32>
      %49 = vector.multi_reduction <add>, %48, %cst_21 [0] : vector<224x256xf32> to vector<256xf32>
      %50 = vector.shape_cast %49 : vector<256xf32> to vector<1x256xf32>
      %cst_22 = arith.constant 0.00510204071 : f32
      %51 = vector.broadcast %cst_22 : f32 to vector<1x256xf32>
      %52 = arith.mulf %50, %51 : vector<1x256xf32>
      %53 = arith.mulf %48, %48 : vector<224x256xf32>
      %cst_23 = arith.constant dense<0.000000e+00> : vector<256xf32>
      %54 = vector.multi_reduction <add>, %53, %cst_23 [0] : vector<224x256xf32> to vector<256xf32>
      %55 = vector.shape_cast %54 : vector<256xf32> to vector<1x256xf32>
      %cst_24 = arith.constant 0.00510204071 : f32
      %56 = vector.broadcast %cst_24 : f32 to vector<1x256xf32>
      %57 = arith.mulf %55, %56 : vector<1x256xf32>
      %58 = arith.mulf %52, %52 : vector<1x256xf32>
      %59 = arith.subf %57, %58 : vector<1x256xf32>
      %cst_25 = arith.constant 9.99999974E-6 : f32
      %60 = vector.broadcast %cst_25 : f32 to vector<1x256xf32>
      %61 = arith.addf %59, %60 : vector<1x256xf32>
      %62 = math.rsqrt %61 : vector<1x256xf32>
      %63 = vector.broadcast %52 : vector<1x256xf32> to vector<224x256xf32>
      %64 = arith.subf %25, %63 : vector<224x256xf32>
      %65 = vector.broadcast %62 : vector<1x256xf32> to vector<224x256xf32>
      %66 = arith.mulf %64, %65 : vector<224x256xf32>
      %c0_26 = arith.constant 0 : index
      %c0_27 = arith.constant 0 : index
      %67 = vector.load %arg4[%c0_26, %c0_27] : memref<1x256xf32, #tpu.memory_space<vmem>>, vector<1x256xf32>
      %68 = vector.broadcast %67 : vector<1x256xf32> to vector<224x256xf32>
      %69 = arith.mulf %66, %68 : vector<224x256xf32>
      %c0_28 = arith.constant 0 : index
      %c0_29 = arith.constant 0 : index
      %70 = vector.load %arg5[%c0_28, %c0_29] : memref<1x256xf32, #tpu.memory_space<vmem>>, vector<1x256xf32>
      %71 = vector.broadcast %70 : vector<1x256xf32> to vector<224x256xf32>
      %72 = arith.addf %69, %71 : vector<224x256xf32>
      %c0_30 = arith.constant 0 : index
      %c0_31 = arith.constant 0 : index
      %73 = vector.load %arg6[%c0_30, %c0_31] : memref<224x256xf32, #tpu.memory_space<vmem>>, vector<224x256xf32>
      tpu.vector_store %arg6[%c0_30, %c0_31], %72 {strides = array<i32>} : memref<224x256xf32, #tpu.memory_space<vmem>>, vector<224x256xf32>,
    } else {
    }
    return
  }
  func.func @transform_0(%arg0: i32, %arg1: i32) -> (i32, i32) {
    %c0_i32 = arith.constant 0 : i32
    %c0_i32_0 = arith.constant 0 : i32
    %c0_i32_1 = arith.constant 0 : i32
    return %c0_i32, %c0_i32_0 : i32, i32
  }
  func.func @transform_1(%arg0: i32, %arg1: i32) -> (i32, i32) {
    %c0_i32 = arith.constant 0 : i32
    return %arg1, %arg0 : i32, i32
  }
  func.func @transform_2(%arg0: i32, %arg1: i32) -> (i32, i32) {
    %c0_i32 = arith.constant 0 : i32
    %c0_i32_0 = arith.constant 0 : i32
    return %c0_i32, %arg0 : i32, i32
  }
  func.func @transform_3(%arg0: i32, %arg1: i32) -> (i32, i32) {
    %c0_i32 = arith.constant 0 : i32
    %c0_i32_0 = arith.constant 0 : i32
    return %c0_i32, %arg0 : i32, i32
  }
  func.func @transform_4(%arg0: i32, %arg1: i32) -> (i32, i32) {
    %c0_i32 = arith.constant 0 : i32
    %c0_i32_0 = arith.constant 0 : i32
    return %c0_i32, %arg0 : i32, i32
  }
}

</mosaic_0001>

<bundles_post_ra>
// kernel: tpu_custom_call.1
= control target key start
LH: loop header
LB: loop body
LE: loop exit
PB: predicated region body
PF: predicated region fallthrough
CT: control target
= control target key end

     0   :  { %9 = vsyncpa [#allocation3], 0  ;;  %s5911_s0 = inlined_call_operand.hbm [shape: bf16[272,256], index: 0, kind: input, shape index: {}]   ;;  %s5912_s1 = inlined_call_operand.hbm [shape: bf16[2304,256], index: 1, kind: input, shape index: {}]   ;;  %s5913_s2 = inlined_call_operand.hbm [shape: f32[1,256], index: 2, kind: input, shape index: {}]   ;;  %s5914_s3 = inlined_call_operand.hbm [shape: f32[1,256], index: 3, kind: input, shape index: {}]   ;;  %s5915_s4 = inlined_call_operand.hbm [shape: f32[224,256], index: 4, kind: output, shape index: {}]  }
   0x1   :  { %10 = vsyncpa [#allocation6], 0 }
   0x2   :  { %12 = vsyncpa [#allocation6 + $0x1], 0 }
   0x3   :  { %13 = vsyncpa [#allocation9], 0 }
   0x4   :  { %14 = vsyncpa [#allocation4], 0  ;;  %s4289_s15 = smov 0   ;;  %s4291_s16 = smov 0  }
   0x5   :  { %s4293_s17 = smov 0   ;;  %s4295_s18 = smov 0  }
   0x6   :  { %s4297_s19 = smov 0   ;;  %s4299_s20 = smov 0  }
   0x7 LB: > { %s4318_s21 = sadd.s32 4294967295, %s4252_s20   ;;  %p69_p0 = scmp.ne.s32.totalorder %s4240_s17, %s4236_s16  ;;  %s4252_s20 = sphi %s4299_s20, %s20_s20   ;;  %s4248_s19 = sphi %s4297_s19, %s6163_s19   ;;  %s4244_s18 = sphi %s4295_s18, %s6162_s18   ;;  %s4240_s17 = sphi %s4293_s17, %s6161_s17   ;;  %s4236_s16 = sphi %s4291_s16, %s6160_s16   ;;  %s4232_s15 = sphi %s4289_s15, %s6159_s15  }
   0x8   : > { %p70_p1 = scmp.eq.s32.totalorder %s4252_s20, 0  ;;  %p75_p2 = scmp.ne.s32.totalorder %s4236_s16, %s4232_s15 }
   0x9   : > { %p5916_p3 = scmp.eq.s32.totalorder %s4318_s21, 0  ;;  %p3571_p5 = scmp.ge.s32.totalorder %s4252_s20, 1 }
   0xa   : > { %p71_p4 = por %p70_p1, %p69_p0  ;;  %p164_p7 = scmp.lt.s32.totalorder %s4252_s20, 4 }
   0xb   : > { %p4328_p6 = por %p5916_p3, %p75_p2  ;;  %s4254_s24 = smov [#allocation7]  }
   0xc   : > { %p4333_p8 = pnand %p3571_p5, %p164_p7  ;;  %s193_s25 = sshll.u32 %s4254_s24, 4  ;;  %s194_s25 = int_to_ptr.vmem [resolvable:$true] %s193_s25 }
   0xd   : > { %s5967_s22 = scalar_select %p4328_p6, 1, 0 }
   0xe   : > { %s5968_s23 = scalar_select %p4333_p8, 1, 0 }
   0xf   : > { %p3773_p9 = pneg %p4333_p8  ;;  %p3790_p10 = scmp.lt.s32.totalorder %s4252_s20, 3 }
  0x10   : > { %s4255_s28 = smov [#allocation2]   ;;  %s4046_s6 = scalar_lea.hbm %s5913_s2, 32 }
  0x11   : > { %p4342_p11 = pnand %p3773_p9, %p5916_p3  ;;  %p4346_p12 = pnand %p3790_p10, %p71_p4 }
  0x12   : > { %s176_s29 = sshll.u32 %s4255_s28, 4  ;;  %p4047_p13 = scmp.ne.s32.totalorder %s5913_s2, %s4046_s6  ;;  %s177_s29 = int_to_ptr.vmem [resolvable:$true] %s176_s29 }
  0x13   : > { %s5970_s27 = scalar_select %p4346_p12, 1, 0 }
  0x14   : > { %p4358_p0 = pneg %p4342_p11  ;;  %p4053_p4 = scmp.lt.u32.totalorder %s4046_s6, %s5913_s2 }
  0x16   : > { %p4049_p1 = pnand %p4358_p0, %p4047_p13 }
  0x18   : > { %p4050_p2 = pneg %p4049_p1 }
  0x1a   : > { %p4055_p5 = pnand %p4053_p4, %p4050_p2 }
  0x1c   : > { %4058 = shalt.err (!%p4055_p5)
}
  0x1d   : > { %s4059_s12 = scalar_lea.vmem %s194_s25, 32  ;;  %p4067_p3 = scmp.lt.s32.totalorder %s194_s25, %s194_s25 }
  0x1e   : > { %p4060_p7 = scmp.ne.s32.totalorder %s194_s25, %s4059_s12  ;;  %p4068_p6 = scmp.lt.s32.totalorder %s4059_s12, %s4059_s12 }
  0x20   : > { %p4062_p9 = pnand %p4060_p7, %p4358_p0  ;;  %p4069_p8 = por %p4068_p6, %p4067_p3 }
  0x22   : > { %p4063_p10 = pneg %p4062_p9 }
  0x24   : > { %p4070_p12 = pnand %p4069_p8, %p4063_p10 }
  0x26   : > { %4073 = shalt.err (!%p4070_p12)
}
  0x27   : > { %3779 = dma.hbm_to_vmem [thread:$0]  (!%p4342_p11), %s5913_s2, 32, %s194_s25, [#allocation6]  }
  0x28   : > { %s4074_s28 = scalar_lea.hbm %s5911_s0, 4352 }
  0x29   : > { %p4075_p13 = scmp.ne.s32.totalorder %s5911_s0, %s4074_s28  ;;  %p4081_p8 = scmp.lt.u32.totalorder %s4074_s28, %s5911_s0 }
  0x2b   : > { %p4077_p3 = pnand %p4075_p13, %p4358_p0 }
  0x2d   : > { %p4078_p6 = pneg %p4077_p3 }
  0x2f   : > { %p4083_p12 = pnand %p4081_p8, %p4078_p6 }
  0x31   : > { %4086 = shalt.err (!%p4083_p12)
}
  0x32   : > { %s4087_s8 = scalar_lea.vmem %s177_s29, 4352  ;;  %p4095_p5 = scmp.lt.s32.totalorder %s177_s29, %s177_s29 }
  0x33   : > { %p4088_p1 = scmp.ne.s32.totalorder %s177_s29, %s4087_s8  ;;  %p4096_p7 = scmp.lt.s32.totalorder %s4087_s8, %s4087_s8 }
  0x35   : > { %p4090_p2 = pnand %p4088_p1, %p4358_p0  ;;  %p4097_p9 = por %p4096_p7, %p4095_p5 }
  0x37   : > { %p4091_p4 = pneg %p4090_p2 }
  0x39   : > { %p4098_p10 = pnand %p4097_p9, %p4091_p4 }
  0x3b   : > { %4101 = shalt.err (!%p4098_p10)
}
  0x3c   : > { %s4256_s25 = smov 128   ;;  %s4257_s10 = smov 8  }
  0x3d   : > { %3776 = dma.hbm_to_vmem [thread:$0]  (!%p4342_p11), %s5911_s0, 4352, %s177_s29, [#allocation3], %s4256_s25, %s4256_s25, %s4257_s10  }
  0x3e   : > { %s4258_s13 = smov [#allocation8]   ;;  %s4102_s28 = scalar_lea.hbm %s5914_s3, 32 }
  0x3f   : > { %s207_s14 = sshll.u32 %s4258_s13, 4  ;;  %p4103_p13 = scmp.ne.s32.totalorder %s5914_s3, %s4102_s28  ;;  %s208_s14 = int_to_ptr.vmem [resolvable:$true] %s207_s14 }
  0x40   : > { %p4109_p8 = scmp.lt.u32.totalorder %s4102_s28, %s5914_s3 }
  0x41   : > { %p4105_p3 = pnand %p4103_p13, %p4358_p0 }
  0x43   : > { %p4106_p6 = pneg %p4105_p3 }
  0x45   : > { %p4111_p12 = pnand %p4109_p8, %p4106_p6 }
  0x47   : > { %4114 = shalt.err (!%p4111_p12)
}
  0x48   : > { %s4115_s29 = scalar_lea.vmem %s208_s14, 32  ;;  %p4123_p5 = scmp.lt.s32.totalorder %s208_s14, %s208_s14 }
  0x49   : > { %p4116_p1 = scmp.ne.s32.totalorder %s208_s14, %s4115_s29  ;;  %p4124_p7 = scmp.lt.s32.totalorder %s4115_s29, %s4115_s29 }
  0x4b   : > { %p4118_p2 = pnand %p4116_p1, %p4358_p0  ;;  %p4125_p9 = por %p4124_p7, %p4123_p5 }
  0x4d   : > { %p4119_p4 = pneg %p4118_p2 }
  0x4f   : > { %p4126_p10 = pnand %p4125_p9, %p4119_p4 }
  0x51   : > { %4129 = shalt.err (!%p4126_p10)
}
  0x52   : > { %3782 = dma.hbm_to_vmem [thread:$0]  (!%p4342_p11), %s5914_s3, 32, %s208_s14, [#allocation9]  }
  0x53   : > { %s29_s9 = sadd.s32 1, %s4248_s19  ;;  %s218_s12 = sand.u32 1, %s4252_s20  }
  0x54   : > { %p30_p0 = scmp.ge.s32.totalorder %s29_s9, 3  ;;  %s220_s13 = sand.u32 1, %s4240_s17  }
  0x55   : > { %s3720_s15 = smul.u32 12288, %s4248_s19  ;;  %s62_s26 = sadd.s32 1, %s4240_s17 }
  0x56   : > { %s6165_s9 = smov (%p30_p0, %s29_s9), 0  ;;  %s3753_s24 = smul.u32 768, %s220_s13 }
  0x57   : > { %s57_s28 = ssub.s32 %s4248_s19, %s6165_s9  ;;  %s4425_s6 = scalar_lea.hbm %s5912_s1, %s3720_s15 }
  0x58   : > { %p60_p13 = scmp.eq.s32.totalorder %s57_s28, 0  ;;  %s222_s14 = scalar_lea.vmem [#allocation5], %s3753_s24 }
  0x59   : > { %s232_s7 = sshll.u32 %s222_s14, 4  ;;  %s4432_s8 = scalar_lea.sflag [#allocation6], %s218_s12  ;;  %s4430_s7 = int_to_ptr.vmem [resolvable:$true] %s232_s7 }
  0x5a   : > { %s4428_s29 = scalar_select %p60_p13, %s4240_s17, %s62_s26  }
  0x5b   : > { %s4130_s11 = scalar_lea.hbm %s4425_s6, 12288  ;;  %p5972_p3 = scmp.ne.s32.totalorder %s5970_s27, 0 }
  0x5c   : > { %p4131_p11 = scmp.ne.s32.totalorder %s4425_s6, %s4130_s11  ;;  %s4135_s28 = scalar_lea.hbm %s5912_s1, 36864 }
  0x5d   : > { %p4132_p6 = pneg %p5972_p3  ;;  %p4136_p1 = scmp.lt.u32.totalorder %s4425_s6, %s5912_s1 }
  0x5e   : > { %p4137_p2 = scmp.lt.u32.totalorder %s4135_s28, %s4130_s11  ;;  %p4139_p5 = scmp.lt.u32.totalorder %s4130_s11, %s4425_s6 }
  0x5f   : > { %p4133_p8 = pnand %p4132_p6, %p4131_p11 }
  0x60   : > { %p4138_p4 = por %p4137_p2, %p4136_p1 }
  0x61   : > { %p4134_p12 = pneg %p4133_p8 }
  0x62   : > { %p4140_p7 = por %p4139_p5, %p4138_p4 }
  0x64   : > { %p4141_p9 = pnand %p4140_p7, %p4134_p12 }
  0x66   : > { %4144 = shalt.err (!%p4141_p9)
}
  0x67   : > { %s4145_s12 = scalar_lea.vmem %s4430_s7, 12288  ;;  %s4259_s26 = smov [#allocation5]  }
  0x68   : > { %p4146_p10 = scmp.ne.s32.totalorder %s4430_s7, %s4145_s12  ;;  %s4150_s5 = sshll.u32 %s4259_s26, 4  ;;  %s4151_s5 = int_to_ptr.vmem [resolvable:$false] %s4150_s5 }
  0x69   : > { %s4152_s14 = scalar_lea.vmem %s4151_s5, 24576  ;;  %p4153_p11 = scmp.lt.s32.totalorder %s4430_s7, %s4151_s5 }
  0x6a   : > { %p4148_p0 = pnand %p4146_p10, %p4132_p6  ;;  %p4154_p8 = scmp.lt.s32.totalorder %s4152_s14, %s4145_s12 }
  0x6c   : > { %p4149_p13 = pneg %p4148_p0  ;;  %p4155_p1 = por %p4154_p8, %p4153_p11 }
  0x6e   : > { %p4156_p2 = pnand %p4155_p1, %p4149_p13 }
  0x70   : > { %4159 = shalt.err (!%p4156_p2)
}
  0x71   : > { %3786 = dma.hbm_to_vmem [thread:$0]  (!%p5972_p3), %s4425_s6, 12288, %s4430_s7, %s4432_s8, %s4256_s25, %s4256_s25, %s4257_s10  }
  0x72   : > { %p5973_p6 = scmp.ne.s32.totalorder %s5968_s23, 0 }
  0x74   : > { %244 = sbr.rel (%p5973_p6) target bundleno = 818 (0x332), region = 36 }
  0x7b   : > { %p5974_p12 = scmp.eq.s32.totalorder %s4318_s21, 0 }
  0x7d   : > { %4211 = dma.done.wait (%p5974_p12), [#allocation3], 4352   ;;  %p5975_p4 = pmov %p5974_p12 }
  0x7e   : > { %s250_s27 = sand.u32 1, %s4318_s21   ;;  %s252_s11 = sand.u32 1, %s4236_s16  }
  0x7f   : > { %4213 = vsyncadd (%p5975_p4), [#allocation3], 4294962944  ;;  %s3754_s13 = smul.u32 768, %s252_s11  ;;  %s251_s15 = scalar_lea.sflag [#allocation6], %s250_s27 }
  0x80   : > { %p5976_p5 = scmp.ne.s32.totalorder %s5967_s22, 0 }
  0x81   : > { %s4471_s28 = scalar_lea.vmem [#allocation5], %s3754_s13 }
  0x82   : > { %4215 = dma.done.wait (%p5976_p5), %s251_s15, 12288  }
  0x83   : > { %4217 = vsyncadd (%p5976_p5), %s251_s15, 4294955008  ;;  %p5977_p3 = pmov %p5975_p4 }
  0x85   : > { %4219 = dma.done.wait (%p5977_p3), [#allocation6], 32   ;;  %p5978_p7 = pmov %p5977_p3 }
  0x86   : > { %p5979_p9 = pmov %p5977_p3 }
  0x87   : > { %4221 = vsyncadd (%p5978_p7), [#allocation6], 4294967264 }
  0x88   : > { %4223 = dma.done.wait (%p5979_p9), [#allocation9], 32   ;;  %p5980_p10 = pmov %p5977_p3 }
  0x89   : > { %p3582_p0 = scmp.ne.s32.totalorder %s4244_s18, 0 }
  0x8a   : > { %4225 = vsyncadd (%p5980_p10), [#allocation9], 4294967264  ;;  %v4260_v0 = vmov (!%p3582_p0), 0.0  }
  0x8b   : > { %290 = sbr.rel (%p3582_p0) target bundleno = 167 (0xa7), region = 56  ;;  %291 = vst [vmem:[#allocation10] sm:$0xff] (!%p3582_p0), %v4260_v0  ;;  %292 = vst [vmem:[#allocation10 + $0x8] sm:$0xff] (!%p3582_p0), %v4260_v0 }
  0x8c   : > { %293 = vst [vmem:[#allocation10 + $0x10] sm:$0xff] (!%p3582_p0), %v4260_v0  ;;  %294 = vst [vmem:[#allocation10 + $0x18] sm:$0xff] (!%p3582_p0), %v4260_v0 }
  0x8d   : > { %295 = vst [vmem:[#allocation10 + $0x20] sm:$0xff] (!%p3582_p0), %v4260_v0  ;;  %296 = vst [vmem:[#allocation10 + $0x28] sm:$0xff] (!%p3582_p0), %v4260_v0 }
  0x8e   : > { %297 = vst [vmem:[#allocation10 + $0x30] sm:$0xff] (!%p3582_p0), %v4260_v0  ;;  %298 = vst [vmem:[#allocation10 + $0x38] sm:$0xff] (!%p3582_p0), %v4260_v0 }
  0x8f   : > { %299 = vst [vmem:[#allocation10 + $0x40] sm:$0xff] (!%p3582_p0), %v4260_v0  ;;  %300 = vst [vmem:[#allocation10 + $0x48] sm:$0xff] (!%p3582_p0), %v4260_v0 }
  0x90   : > { %301 = vst [vmem:[#allocation10 + $0x50] sm:$0xff] (!%p3582_p0), %v4260_v0  ;;  %302 = vst [vmem:[#allocation10 + $0x58] sm:$0xff] (!%p3582_p0), %v4260_v0 }
  0x91   : > { %303 = vst [vmem:[#allocation10 + $0x60] sm:$0xff] (!%p3582_p0), %v4260_v0  ;;  %304 = vst [vmem:[#allocation10 + $0x68] sm:$0xff] (!%p3582_p0), %v4260_v0 }
  0x92   : > { %305 = vst [vmem:[#allocation10 + $0x70] sm:$0xff] %v4260_v0  ;;  %306 = vst [vmem:[#allocation10 + $0x78] sm:$0xff] %v4260_v0 }
  0x93   : > { %307 = vst [vmem:[#allocation10 + $0x80] sm:$0xff] %v4260_v0  ;;  %308 = vst [vmem:[#allocation10 + $0x88] sm:$0xff] %v4260_v0 }
  0x94   : > { %309 = vst [vmem:[#allocation10 + $0x90] sm:$0xff] %v4260_v0  ;;  %310 = vst [vmem:[#allocation10 + $0x98] sm:$0xff] %v4260_v0 }
  0x95   : > { %311 = vst [vmem:[#allocation10 + $0xa0] sm:$0xff] %v4260_v0  ;;  %312 = vst [vmem:[#allocation10 + $0xa8] sm:$0xff] %v4260_v0 }
  0x96   : > { %313 = vst [vmem:[#allocation10 + $0xb0] sm:$0xff] %v4260_v0  ;;  %314 = vst [vmem:[#allocation10 + $0xb8] sm:$0xff] %v4260_v0 }
  0x97   : > { %315 = vst [vmem:[#allocation10 + $0xc0] sm:$0xff] %v4260_v0  ;;  %316 = vst [vmem:[#allocation10 + $0xc8] sm:$0xff] %v4260_v0 }
  0x98   : > { %317 = vst [vmem:[#allocation10 + $0xd0] sm:$0xff] %v4260_v0  ;;  %318 = vst [vmem:[#allocation10 + $0xd8] sm:$0xff] %v4260_v0 }
  0x99   : > { %319 = vst [vmem:[#allocation10 + $0xe0] sm:$0xff] %v4260_v0  ;;  %320 = vst [vmem:[#allocation10 + $0xe8] sm:$0xff] %v4260_v0 }
  0x9a   : > { %321 = vst [vmem:[#allocation10 + $0xf0] sm:$0xff] %v4260_v0  ;;  %322 = vst [vmem:[#allocation10 + $0xf8] sm:$0xff] %v4260_v0 }
  0x9b   : > { %323 = vst [vmem:[#allocation10 + $0x100] sm:$0xff] %v4260_v0  ;;  %324 = vst [vmem:[#allocation10 + $0x108] sm:$0xff] %v4260_v0 }
  0x9c   : > { %325 = vst [vmem:[#allocation10 + $0x110] sm:$0xff] %v4260_v0  ;;  %326 = vst [vmem:[#allocation10 + $0x118] sm:$0xff] %v4260_v0 }
  0x9d   : > { %327 = vst [vmem:[#allocation10 + $0x120] sm:$0xff] %v4260_v0  ;;  %328 = vst [vmem:[#allocation10 + $0x128] sm:$0xff] %v4260_v0 }
  0x9e   : > { %329 = vst [vmem:[#allocation10 + $0x130] sm:$0xff] %v4260_v0  ;;  %330 = vst [vmem:[#allocation10 + $0x138] sm:$0xff] %v4260_v0 }
  0x9f   : > { %331 = vst [vmem:[#allocation10 + $0x140] sm:$0xff] %v4260_v0  ;;  %332 = vst [vmem:[#allocation10 + $0x148] sm:$0xff] %v4260_v0 }
  0xa0   : > { %333 = vst [vmem:[#allocation10 + $0x150] sm:$0xff] %v4260_v0  ;;  %334 = vst [vmem:[#allocation10 + $0x158] sm:$0xff] %v4260_v0 }
  0xa1   : > { %335 = vst [vmem:[#allocation10 + $0x160] sm:$0xff] %v4260_v0  ;;  %336 = vst [vmem:[#allocation10 + $0x168] sm:$0xff] %v4260_v0 }
  0xa2   : > { %337 = vst [vmem:[#allocation10 + $0x170] sm:$0xff] %v4260_v0  ;;  %338 = vst [vmem:[#allocation10 + $0x178] sm:$0xff] %v4260_v0 }
  0xa3   : > { %339 = vst [vmem:[#allocation10 + $0x180] sm:$0xff] %v4260_v0  ;;  %340 = vst [vmem:[#allocation10 + $0x188] sm:$0xff] %v4260_v0 }
  0xa4   : > { %341 = vst [vmem:[#allocation10 + $0x190] sm:$0xff] %v4260_v0  ;;  %342 = vst [vmem:[#allocation10 + $0x198] sm:$0xff] %v4260_v0 }
  0xa5   : > { %343 = vst [vmem:[#allocation10 + $0x1a0] sm:$0xff] %v4260_v0  ;;  %344 = vst [vmem:[#allocation10 + $0x1a8] sm:$0xff] %v4260_v0 }
  0xa6   : > { %345 = vst [vmem:[#allocation10 + $0x1b0] sm:$0xff] %v4260_v0  ;;  %346 = vst [vmem:[#allocation10 + $0x1b8] sm:$0xff] %v4260_v0 }
  0xa7 PF: > { %v3853_v1 = vld [vmem:[%s4471_s28 + $0x4] ss:$8 sps:$4 sm:$0xff]   ;;  %v3855_v2 = vld [vmem:[%s4471_s28] ss:$8 sps:$4 sm:$0xff]   ;;  %v3856_v3 = vld [vmem:[%s4471_s28 + $0x14] ss:$8 sps:$4 sm:$0xff]  }
  0xa8   : > { %725 = vmatprep.subr.bf16.mxu0 %v3853_v1  ;;  %3721 = vmatprep.subr.bf16.mxu1 %v3853_v1  ;;  %v3858_v4 = vld [vmem:[%s4471_s28 + $0x10] ss:$8 sps:$4 sm:$0xff]   ;;  %v3859_v5 = vld [vmem:[%s4471_s28 + $0x24] ss:$8 sps:$4 sm:$0xff]   ;;  %v3861_v6 = vld [vmem:[%s4471_s28 + $0x20] ss:$8 sps:$4 sm:$0xff]  }
  0xa9   : > { %726 = vmatpush1.bf16.msra.mxu0 %v3855_v2  ;;  %3737 = vmatpush1.bf16.msra.mxu1 %v3855_v2  ;;  %v3862_v7 = vld [vmem:[%s4471_s28 + $0x34] ss:$8 sps:$4 sm:$0xff]   ;;  %v3864_v8 = vld [vmem:[%s4471_s28 + $0x30] ss:$8 sps:$4 sm:$0xff]   ;;  %v3865_v9 = vld [vmem:[%s4471_s28 + $0x44] ss:$8 sps:$4 sm:$0xff]  }
  0xaa   : > { %727 = vmatprep.subr.bf16.mxu0 %v3856_v3  ;;  %3722 = vmatprep.subr.bf16.mxu1 %v3856_v3  ;;  %v3867_v10 = vld [vmem:[%s4471_s28 + $0x40] ss:$8 sps:$4 sm:$0xff]   ;;  %v3868_v11 = vld [vmem:[%s4471_s28 + $0x54] ss:$8 sps:$4 sm:$0xff]   ;;  %s3583_s22 = sshll.u32 %s4244_s18, 4  ;;  %vm1708_vm0 = vcmask 1046528  }
  0xab   : > { %v3870_v12 = vld [vmem:[%s4471_s28 + $0x50] ss:$8 sps:$4 sm:$0xff]   ;;  %v3871_v13 = vld [vmem:[%s4471_s28 + $0x64] ss:$8 sps:$4 sm:$0xff]   ;;  %s4500_s23 = scalar_lea.vmem [#allocation2], %s3583_s22  ;;  %vm1993_vm1 = vcmask 1045504  }
  0xac   : > { %v4503_v14 = vld [vmem:[%s4500_s23 + $0x4] ss:$8 sps:$4 sm:$0xff]   ;;  %v3873_v15 = vld [vmem:[%s4471_s28 + $0x60] ss:$8 sps:$4 sm:$0xff]   ;;  %v3876_v18 = vld [vmem:[%s4471_s28 + $0x70] ss:$8 sps:$4 sm:$0xff]  }
  0xad   : > { %728 = vmatpush1.bf16.msra.mxu0 %v3858_v4  ;;  %3738 = vmatpush1.bf16.msra.mxu1 %v3858_v4  ;;  %v4507_v16 = vld [vmem:[%s4500_s23 + $0x84] ss:$8 sps:$4 sm:$0xff]   ;;  %v3877_v19 = vld [vmem:[%s4471_s28 + $0x84] ss:$8 sps:$4 sm:$0xff]   ;;  %v3879_v20 = vld [vmem:[%s4471_s28 + $0x80] ss:$8 sps:$4 sm:$0xff]  }
  0xae   : > { %729 = vmatprep.subr.bf16.mxu0 %v3859_v5  ;;  %3723 = vmatprep.subr.bf16.mxu1 %v3859_v5  ;;  %v3874_v17 = vld [vmem:[%s4471_s28 + $0x74] ss:$8 sps:$4 sm:$0xff]   ;;  %v3882_v22 = vld [vmem:[%s4471_s28 + $0x90] ss:$8 sps:$4 sm:$0xff]   ;;  %v3883_v23 = vld [vmem:[%s4471_s28 + $0xa4] ss:$8 sps:$4 sm:$0xff]  }
  0xaf   : > { %757 = vmatprep.mubr.bf16.mxu0 %v4503_v14  ;;  %837 = vmatprep.mubr.bf16.mxu1 %v4507_v16  ;;  %v3880_v21 = vld [vmem:[%s4471_s28 + $0x94] ss:$8 sps:$4 sm:$0xff]   ;;  %v3885_v24 = vld [vmem:[%s4471_s28 + $0xa0] ss:$8 sps:$4 sm:$0xff]   ;;  %v3888_v26 = vld [vmem:[%s4471_s28 + $0xb0] ss:$8 sps:$4 sm:$0xff]  }
  0xb0   : > { %v3886_v25 = vld [vmem:[%s4471_s28 + $0xb4] ss:$8 sps:$4 sm:$0xff]   ;;  %v3889_v27 = vld [vmem:[%s4471_s28 + $0xc4] ss:$8 sps:$4 sm:$0xff]   ;;  %v3891_v28 = vld [vmem:[%s4471_s28 + $0xc0] ss:$8 sps:$4 sm:$0xff]  }
  0xb1   : > { %730 = vmatpush1.bf16.msra.mxu0 %v3861_v6  ;;  %3739 = vmatpush1.bf16.msra.mxu1 %v3861_v6  ;;  %v3892_v29 = vld [vmem:[%s4471_s28 + $0xd4] ss:$8 sps:$4 sm:$0xff]   ;;  %v3894_v30 = vld [vmem:[%s4471_s28 + $0xd0] ss:$8 sps:$4 sm:$0xff]   ;;  %v3895_v31 = vld [vmem:[%s4471_s28 + $0xe4] ss:$8 sps:$4 sm:$0xff]  }
  0xb2   : > { %731 = vmatprep.subr.bf16.mxu0 %v3862_v7  ;;  %3724 = vmatprep.subr.bf16.mxu1 %v3862_v7  ;;  %v3897_v32 = vld [vmem:[%s4471_s28 + $0xe0] ss:$8 sps:$4 sm:$0xff]   ;;  %v3898_v33 = vld [vmem:[%s4471_s28 + $0xf4] ss:$8 sps:$4 sm:$0xff]   ;;  %v3900_v34 = vld [vmem:[%s4471_s28 + $0xf0] ss:$8 sps:$4 sm:$0xff]  }
  0xb3   : > { %v4530_v35 = vld [vmem:[%s4500_s23] ss:$8 sps:$4 sm:$0xff]   ;;  %v3909_v36 = vld [vmem:[%s4471_s28 + $0x104] ss:$8 sps:$4 sm:$0xff]   ;;  %v3907_v39 = vld [vmem:[%s4471_s28 + $0x100] ss:$8 sps:$4 sm:$0xff]  }
  0xb4   : > { %v3912_v37 = vld [vmem:[%s4471_s28 + $0x204] ss:$8 sps:$4 sm:$0xff]   ;;  %v4535_v38 = vld [vmem:[%s4500_s23 + $0x80] ss:$8 sps:$4 sm:$0xff]   ;;  %v3910_v40 = vld [vmem:[%s4471_s28 + $0x200] ss:$8 sps:$4 sm:$0xff]  }
  0xb5   : > { %732 = vmatpush1.bf16.msra.mxu0 %v3864_v8  ;;  %3740 = vmatpush1.bf16.msra.mxu1 %v3864_v8  ;;  %v3915_v41 = vld [vmem:[%s4471_s28 + $0x114] ss:$8 sps:$4 sm:$0xff]   ;;  %v4542_v43 = vld [vmem:[%s4500_s23 + $0x14] ss:$8 sps:$4 sm:$0xff]   ;;  %v3913_v45 = vld [vmem:[%s4471_s28 + $0x110] ss:$8 sps:$4 sm:$0xff]  }
  0xb6   : > { %733 = vmatprep.subr.bf16.mxu0 %v3865_v9  ;;  %3725 = vmatprep.subr.bf16.mxu1 %v3865_v9  ;;  %v3918_v42 = vld [vmem:[%s4471_s28 + $0x214] ss:$8 sps:$4 sm:$0xff]   ;;  %v4545_v44 = vld [vmem:[%s4500_s23 + $0x94] ss:$8 sps:$4 sm:$0xff]   ;;  %v3916_v46 = vld [vmem:[%s4471_s28 + $0x210] ss:$8 sps:$4 sm:$0xff]  }
  0xb7   : > { %v4552_v47 = vld [vmem:[%s4500_s23 + $0x10] ss:$8 sps:$4 sm:$0xff]   ;;  %v3924_v48 = vld [vmem:[%s4471_s28 + $0x124] ss:$8 sps:$4 sm:$0xff]   ;;  %v3932_v53 = vld [vmem:[%s4471_s28 + $0x134] ss:$8 sps:$4 sm:$0xff]  }
  0xb8   : > { %v3927_v49 = vld [vmem:[%s4471_s28 + $0x224] ss:$8 sps:$4 sm:$0xff]   ;;  %v3922_v50 = vld [vmem:[%s4471_s28 + $0x120] ss:$8 sps:$4 sm:$0xff]   ;;  %v3935_v54 = vld [vmem:[%s4471_s28 + $0x234] ss:$8 sps:$4 sm:$0xff]  }
  0xb9   : > { %734 = vmatpush1.bf16.msra.mxu0 %v3867_v10  ;;  %3741 = vmatpush1.bf16.msra.mxu1 %v3867_v10  ;;  %v3925_v51 = vld [vmem:[%s4471_s28 + $0x220] ss:$8 sps:$4 sm:$0xff]   ;;  %v4566_v55 = vld [vmem:[%s4500_s23 + $0x24] ss:$8 sps:$4 sm:$0xff]   ;;  %v3930_v57 = vld [vmem:[%s4471_s28 + $0x130] ss:$8 sps:$4 sm:$0xff]  }
  0xba   : > { %735 = vmatprep.subr.bf16.mxu0 %v3868_v11  ;;  %3726 = vmatprep.subr.bf16.mxu1 %v3868_v11  ;;  %v4561_v52 = vld [vmem:[%s4500_s23 + $0x90] ss:$8 sps:$4 sm:$0xff]   ;;  %v4569_v56 = vld [vmem:[%s4500_s23 + $0xa4] ss:$8 sps:$4 sm:$0xff]   ;;  %v3933_v58 = vld [vmem:[%s4471_s28 + $0x230] ss:$8 sps:$4 sm:$0xff]  }
  0xbb   : > { %v4576_v59 = vld [vmem:[%s4500_s23 + $0x20] ss:$8 sps:$4 sm:$0xff]   ;;  %v3942_v60 = vld [vmem:[%s4471_s28 + $0x144] ss:$8 sps:$4 sm:$0xff]   ;;  %v3940_v62 = vld [vmem:[%s4471_s28 + $0x140] ss:$8 sps:$4 sm:$0xff]  }
  0xbc   : > { %v3945_v61 = vld [vmem:[%s4471_s28 + $0x244] ss:$8 sps:$4 sm:$0xff]   ;;  %v3943_v63 = vld [vmem:[%s4471_s28 + $0x240] ss:$8 sps:$4 sm:$0xff]   ;;  %v4585_v0 = vld [vmem:[%s4500_s23 + $0xa0] ss:$8 sps:$4 sm:$0xff]  }
  0xbd   : > { %736 = vmatpush1.bf16.msra.mxu0 %v3870_v12  ;;  %3742 = vmatpush1.bf16.msra.mxu1 %v3870_v12  ;;  %v3950_v1 = vld [vmem:[%s4471_s28 + $0x154] ss:$8 sps:$4 sm:$0xff]   ;;  %v4590_v3 = vld [vmem:[%s4500_s23 + $0x34] ss:$8 sps:$4 sm:$0xff]   ;;  %v3948_v5 = vld [vmem:[%s4471_s28 + $0x150] ss:$8 sps:$4 sm:$0xff]  }
  0xbe   : > { %737 = vmatprep.subr.bf16.mxu0 %v3871_v13  ;;  %3727 = vmatprep.subr.bf16.mxu1 %v3871_v13  ;;  %v3953_v2 = vld [vmem:[%s4471_s28 + $0x254] ss:$8 sps:$4 sm:$0xff]   ;;  %v4593_v4 = vld [vmem:[%s4500_s23 + $0xb4] ss:$8 sps:$4 sm:$0xff]   ;;  %v3951_v6 = vld [vmem:[%s4471_s28 + $0x250] ss:$8 sps:$4 sm:$0xff]  }
  0xbf   : > { %v3960_v7 = vld [vmem:[%s4471_s28 + $0x164] ss:$8 sps:$4 sm:$0xff]   ;;  %v4604_v9 = vld [vmem:[%s4500_s23 + $0x30] ss:$8 sps:$4 sm:$0xff]   ;;  %v3968_v13 = vld [vmem:[%s4471_s28 + $0x174] ss:$8 sps:$4 sm:$0xff]  }
  0xc0   : > { %v3963_v8 = vld [vmem:[%s4471_s28 + $0x264] ss:$8 sps:$4 sm:$0xff]   ;;  %v4607_v10 = vld [vmem:[%s4500_s23 + $0xb0] ss:$8 sps:$4 sm:$0xff]   ;;  %p3712_p13 = scmp.ne.s32.totalorder %s4244_s18, 2 }
  0xc1   : > { %738 = vmatpush1.bf16.msra.mxu0 %v3873_v15  ;;  %3743 = vmatpush1.bf16.msra.mxu1 %v3873_v15  ;;  %v3958_v11 = vld [vmem:[%s4471_s28 + $0x160] ss:$8 sps:$4 sm:$0xff]   ;;  %v3971_v15 = vld [vmem:[%s4471_s28 + $0x274] ss:$8 sps:$4 sm:$0xff]  }
  0xc2   : > { %739 = vmatprep.subr.bf16.mxu0 %v3874_v17  ;;  %3728 = vmatprep.subr.bf16.mxu1 %v3874_v17  ;;  %v3961_v12 = vld [vmem:[%s4471_s28 + $0x260] ss:$8 sps:$4 sm:$0xff]   ;;  %v4614_v17 = vld [vmem:[%s4500_s23 + $0x44] ss:$8 sps:$4 sm:$0xff]  }
  0xc5   : > { %740 = vmatpush1.bf16.msra.mxu0 %v3876_v18  ;;  %3744 = vmatpush1.bf16.msra.mxu1 %v3876_v18  ;;  %v4617_v18 = vld [vmem:[%s4500_s23 + $0xc4] ss:$8 sps:$4 sm:$0xff]  }
  0xc6   : > { %741 = vmatprep.subr.bf16.mxu0 %v3877_v19  ;;  %3729 = vmatprep.subr.bf16.mxu1 %v3877_v19  ;;  %v3966_v19 = vld [vmem:[%s4471_s28 + $0x170] ss:$8 sps:$4 sm:$0xff]  }
  0xc9   : > { %742 = vmatpush1.bf16.msra.mxu0 %v3879_v20  ;;  %3745 = vmatpush1.bf16.msra.mxu1 %v3879_v20  ;;  %v3969_v20 = vld [vmem:[%s4471_s28 + $0x270] ss:$8 sps:$4 sm:$0xff]  }
  0xca   : > { %743 = vmatprep.subr.bf16.mxu0 %v3880_v21  ;;  %3730 = vmatprep.subr.bf16.mxu1 %v3880_v21  ;;  %v3978_v21 = vld [vmem:[%s4471_s28 + $0x184] ss:$8 sps:$4 sm:$0xff]  }
  0xcd   : > { %744 = vmatpush1.bf16.msra.mxu0 %v3882_v22  ;;  %3746 = vmatpush1.bf16.msra.mxu1 %v3882_v22  ;;  %v3981_v22 = vld [vmem:[%s4471_s28 + $0x284] ss:$8 sps:$4 sm:$0xff]  }
  0xce   : > { %745 = vmatprep.subr.bf16.mxu0 %v3883_v23  ;;  %3731 = vmatprep.subr.bf16.mxu1 %v3883_v23  ;;  %v4628_v23 = vld [vmem:[%s4500_s23 + $0x40] ss:$8 sps:$4 sm:$0xff]  }
  0xd1   : > { %746 = vmatpush1.bf16.msra.mxu0 %v3885_v24  ;;  %3747 = vmatpush1.bf16.msra.mxu1 %v3885_v24  ;;  %v4631_v24 = vld [vmem:[%s4500_s23 + $0xc0] ss:$8 sps:$4 sm:$0xff]  }
  0xd2   : > { %747 = vmatprep.subr.bf16.mxu0 %v3886_v25  ;;  %3732 = vmatprep.subr.bf16.mxu1 %v3886_v25  ;;  %v3976_v25 = vld [vmem:[%s4471_s28 + $0x180] ss:$8 sps:$4 sm:$0xff]  }
  0xd5   : > { %748 = vmatpush1.bf16.msra.mxu0 %v3888_v26  ;;  %3748 = vmatpush1.bf16.msra.mxu1 %v3888_v26  ;;  %v3979_v26 = vld [vmem:[%s4471_s28 + $0x280] ss:$8 sps:$4 sm:$0xff]  }
  0xd6   : > { %749 = vmatprep.subr.bf16.mxu0 %v3889_v27  ;;  %3733 = vmatprep.subr.bf16.mxu1 %v3889_v27  ;;  %v3986_v27 = vld [vmem:[%s4471_s28 + $0x194] ss:$8 sps:$4 sm:$0xff]  }
  0xd9   : > { %750 = vmatpush1.bf16.msra.mxu0 %v3891_v28  ;;  %3749 = vmatpush1.bf16.msra.mxu1 %v3891_v28  ;;  %v3989_v28 = vld [vmem:[%s4471_s28 + $0x294] ss:$8 sps:$4 sm:$0xff]  }
  0xda   : > { %751 = vmatprep.subr.bf16.mxu0 %v3892_v29  ;;  %3734 = vmatprep.subr.bf16.mxu1 %v3892_v29  ;;  %v4638_v29 = vld [vmem:[%s4500_s23 + $0x54] ss:$8 sps:$4 sm:$0xff]  }
  0xdd   : > { %752 = vmatpush1.bf16.msra.mxu0 %v3894_v30  ;;  %3750 = vmatpush1.bf16.msra.mxu1 %v3894_v30  ;;  %v4641_v30 = vld [vmem:[%s4500_s23 + $0xd4] ss:$8 sps:$4 sm:$0xff]  }
  0xde   : > { %753 = vmatprep.subr.bf16.mxu0 %v3895_v31  ;;  %3735 = vmatprep.subr.bf16.mxu1 %v3895_v31  ;;  %v3984_v31 = vld [vmem:[%s4471_s28 + $0x190] ss:$8 sps:$4 sm:$0xff]  }
  0xe1   : > { %754 = vmatpush1.bf16.msra.mxu0 %v3897_v32  ;;  %3751 = vmatpush1.bf16.msra.mxu1 %v3897_v32  ;;  %v3987_v32 = vld [vmem:[%s4471_s28 + $0x290] ss:$8 sps:$4 sm:$0xff]  }
  0xe2   : > { %755 = vmatprep.subr.bf16.mxu0 %v3898_v33  ;;  %3736 = vmatprep.subr.bf16.mxu1 %v3898_v33  ;;  %v3996_v33 = vld [vmem:[%s4471_s28 + $0x1a4] ss:$8 sps:$4 sm:$0xff]  }
  0xe5   : > { %756 = vmatpush1.bf16.msra.mxu0 %v3900_v34  ;;  %3752 = vmatpush1.bf16.msra.mxu1 %v3900_v34  ;;  %v3999_v34 = vld [vmem:[%s4471_s28 + $0x2a4] ss:$8 sps:$4 sm:$0xff]  }
  0xe6   : > { %1096 = vmatprep.subr.bf16.mxu1 %v3909_v36  ;;  %1469 = vmatprep.subr.bf16.mxu0 %v3912_v37  ;;  %v4652_v36 = vld [vmem:[%s4500_s23 + $0x50] ss:$8 sps:$4 sm:$0xff]  }
  0xe7   : > { %v4655_v37 = vld [vmem:[%s4500_s23 + $0xd0] ss:$8 sps:$4 sm:$0xff]  }
  0xe8   : > { %758 = vmatmul.mubr.bf16.vlgmr.msra.gmra.mrb[0].mxu0 %v4530_v35  ;;  %838 = vmatmul.mubr.bf16.vlgmr.msra.gmra.mrb[0].mxu1 %v4535_v38 }
  0xe9   : > { %1097 = vmatpush1.bf16.msra.mxu1 %v3907_v39  ;;  %1470 = vmatpush1.bf16.msra.mxu0 %v3910_v40  ;;  %v3994_v39 = vld [vmem:[%s4471_s28 + $0x1a0] ss:$8 sps:$4 sm:$0xff]  }
  0xea   : > { %1098 = vmatprep.subr.bf16.mxu1 %v3915_v41  ;;  %1471 = vmatprep.subr.bf16.mxu0 %v3918_v42  ;;  %v3997_v40 = vld [vmem:[%s4471_s28 + $0x2a0] ss:$8 sps:$4 sm:$0xff]   ;;  %v4004_v41 = vld [vmem:[%s4471_s28 + $0x1b4] ss:$8 sps:$4 sm:$0xff]  }
  0xeb   : > { %767 = vmatprep.mubr.bf16.mxu0 %v4542_v43  ;;  %847 = vmatprep.mubr.bf16.mxu1 %v4545_v44  ;;  %v4007_v42 = vld [vmem:[%s4471_s28 + $0x2b4] ss:$8 sps:$4 sm:$0xff]  }
  0xed   : > { %1099 = vmatpush1.bf16.msra.mxu1 %v3913_v45  ;;  %1472 = vmatpush1.bf16.msra.mxu0 %v3916_v46  ;;  %v4662_v45 = vld [vmem:[%s4500_s23 + $0x64] ss:$8 sps:$4 sm:$0xff]  }
  0xee   : > { %1100 = vmatprep.subr.bf16.mxu1 %v3924_v48  ;;  %1473 = vmatprep.subr.bf16.mxu0 %v3927_v49  ;;  %v4665_v46 = vld [vmem:[%s4500_s23 + $0xe4] ss:$8 sps:$4 sm:$0xff]   ;;  %v4002_v48 = vld [vmem:[%s4471_s28 + $0x1b0] ss:$8 sps:$4 sm:$0xff]  }
  0xef   : > { %v4005_v49 = vld [vmem:[%s4471_s28 + $0x2b0] ss:$8 sps:$4 sm:$0xff]  }
  0xf0   : > { %768 = vmatmul.mubr.bf16.gmra.mrb[4].mxu0 %v4552_v47  ;;  %848 = vmatmul.mubr.bf16.gmra.mrb[4].mxu1 %v4561_v52 }
  0xf1   : > { %1101 = vmatpush1.bf16.msra.mxu1 %v3922_v50  ;;  %1474 = vmatpush1.bf16.msra.mxu0 %v3925_v51  ;;  %v4014_v50 = vld [vmem:[%s4471_s28 + $0x1c4] ss:$8 sps:$4 sm:$0xff]  }
  0xf2   : > { %1102 = vmatprep.subr.bf16.mxu1 %v3932_v53  ;;  %1475 = vmatprep.subr.bf16.mxu0 %v3935_v54  ;;  %v4017_v51 = vld [vmem:[%s4471_s28 + $0x2c4] ss:$8 sps:$4 sm:$0xff]   ;;  %v4676_v53 = vld [vmem:[%s4500_s23 + $0x60] ss:$8 sps:$4 sm:$0xff]  }
  0xf3   : > { %777 = vmatprep.mubr.bf16.mxu0 %v4566_v55  ;;  %857 = vmatprep.mubr.bf16.mxu1 %v4569_v56  ;;  %v4679_v54 = vld [vmem:[%s4500_s23 + $0xe0] ss:$8 sps:$4 sm:$0xff]  }
  0xf5   : > { %1103 = vmatpush1.bf16.msra.mxu1 %v3930_v57  ;;  %1476 = vmatpush1.bf16.msra.mxu0 %v3933_v58  ;;  %v4012_v57 = vld [vmem:[%s4471_s28 + $0x1c0] ss:$8 sps:$4 sm:$0xff]  }
  0xf6   : > { %1104 = vmatprep.subr.bf16.mxu1 %v3942_v60  ;;  %1477 = vmatprep.subr.bf16.mxu0 %v3945_v61  ;;  %v4015_v58 = vld [vmem:[%s4471_s28 + $0x2c0] ss:$8 sps:$4 sm:$0xff]   ;;  %v4022_v60 = vld [vmem:[%s4471_s28 + $0x1d4] ss:$8 sps:$4 sm:$0xff]  }
  0xf7   : > { %v4025_v61 = vld [vmem:[%s4471_s28 + $0x2d4] ss:$8 sps:$4 sm:$0xff]  }
  0xf8   : > { %778 = vmatmul.mubr.bf16.gmra.mrb[8].mxu0 %v4576_v59  ;;  %858 = vmatmul.mubr.bf16.gmra.mrb[8].mxu1 %v4585_v0 }
  0xf9   : > { %1105 = vmatpush1.bf16.msra.mxu1 %v3940_v62  ;;  %1478 = vmatpush1.bf16.msra.mxu0 %v3943_v63  ;;  %v4027_v62 = vld [vmem:[%s4500_s23 + $0x74] ss:$8 sps:$4 sm:$0xff]   ;;  %v4020_v63 = vld [vmem:[%s4471_s28 + $0x1d0] ss:$8 sps:$4 sm:$0xff]  }
  0xfa   : > { %1106 = vmatprep.subr.bf16.mxu1 %v3950_v1  ;;  %1479 = vmatprep.subr.bf16.mxu0 %v3953_v2  ;;  %v4023_v1 = vld [vmem:[%s4471_s28 + $0x2d0] ss:$8 sps:$4 sm:$0xff]   ;;  %v4032_v2 = vld [vmem:[%s4471_s28 + $0x1e4] ss:$8 sps:$4 sm:$0xff]  }
  0xfb   : > { %787 = vmatprep.mubr.bf16.mxu0 %v4590_v3  ;;  %867 = vmatprep.mubr.bf16.mxu1 %v4593_v4 }
  0xfd   : > { %1107 = vmatpush1.bf16.msra.mxu1 %v3948_v5  ;;  %1480 = vmatpush1.bf16.msra.mxu0 %v3951_v6  ;;  %v4035_v5 = vld [vmem:[%s4471_s28 + $0x2e4] ss:$8 sps:$4 sm:$0xff]   ;;  %v4029_v6 = vld [vmem:[%s4500_s23 + $0x70] ss:$8 sps:$4 sm:$0xff]  }
  0xfe   : > { %1108 = vmatprep.subr.bf16.mxu1 %v3960_v7  ;;  %1481 = vmatprep.subr.bf16.mxu0 %v3963_v8  ;;  %v4030_v7 = vld [vmem:[%s4471_s28 + $0x1e0] ss:$8 sps:$4 sm:$0xff]  }
  0xff   : > { %v4033_v8 = vld [vmem:[%s4471_s28 + $0x2e0] ss:$8 sps:$4 sm:$0xff]  }
 0x100   : > { %788 = vmatmul.mubr.bf16.gmra.mrb[12].mxu0 %v4604_v9  ;;  %868 = vmatmul.mubr.bf16.gmra.mrb[12].mxu1 %v4607_v10 }
 0x101   : > { %1109 = vmatpush1.bf16.msra.mxu1 %v3958_v11  ;;  %1482 = vmatpush1.bf16.msra.mxu0 %v3961_v12  ;;  %v4038_v11 = vld [vmem:[%s4471_s28 + $0x1f4] ss:$8 sps:$4 sm:$0xff]  }
 0x102   : > { %1110 = vmatprep.subr.bf16.mxu1 %v3968_v13  ;;  %1483 = vmatprep.subr.bf16.mxu0 %v3971_v15  ;;  %v4041_v12 = vld [vmem:[%s4471_s28 + $0x2f4] ss:$8 sps:$4 sm:$0xff]   ;;  %v4036_v13 = vld [vmem:[%s4471_s28 + $0x1f0] ss:$8 sps:$4 sm:$0xff]  }
 0x103   : > { %797 = vmatprep.mubr.bf16.mxu0 %v4614_v17  ;;  %877 = vmatprep.mubr.bf16.mxu1 %v4617_v18  ;;  %v4039_v15 = vld [vmem:[%s4471_s28 + $0x2f0] ss:$8 sps:$4 sm:$0xff]  }
 0x105   : > { %1111 = vmatpush1.bf16.msra.mxu1 %v3966_v19  ;;  %1484 = vmatpush1.bf16.msra.mxu0 %v3969_v20 }
 0x106   : > { %1112 = vmatprep.subr.bf16.mxu1 %v3978_v21  ;;  %1485 = vmatprep.subr.bf16.mxu0 %v3981_v22 }
 0x108   : > { %798 = vmatmul.mubr.bf16.gmra.mrb[16].mxu0 %v4628_v23  ;;  %878 = vmatmul.mubr.bf16.gmra.mrb[16].mxu1 %v4631_v24 }
 0x109   : > { %1113 = vmatpush1.bf16.msra.mxu1 %v3976_v25  ;;  %1486 = vmatpush1.bf16.msra.mxu0 %v3979_v26 }
 0x10a   : > { %1114 = vmatprep.subr.bf16.mxu1 %v3986_v27  ;;  %1487 = vmatprep.subr.bf16.mxu0 %v3989_v28 }
 0x10b   : > { %807 = vmatprep.mubr.bf16.mxu0 %v4638_v29  ;;  %887 = vmatprep.mubr.bf16.mxu1 %v4641_v30 }
 0x10d   : > { %1115 = vmatpush1.bf16.msra.mxu1 %v3984_v31  ;;  %1488 = vmatpush1.bf16.msra.mxu0 %v3987_v32 }
 0x10e   : > { %1116 = vmatprep.subr.bf16.mxu1 %v3996_v33  ;;  %1489 = vmatprep.subr.bf16.mxu0 %v3999_v34 }
 0x110   : > { %808 = vmatmul.mubr.bf16.gmra.mrb[20].mxu0 %v4652_v36  ;;  %888 = vmatmul.mubr.bf16.gmra.mrb[20].mxu1 %v4655_v37 }
 0x111   : > { %1117 = vmatpush1.bf16.msra.mxu1 %v3994_v39  ;;  %1490 = vmatpush1.bf16.msra.mxu0 %v3997_v40 }
 0x112   : > { %1118 = vmatprep.subr.bf16.mxu1 %v4004_v41  ;;  %1491 = vmatprep.subr.bf16.mxu0 %v4007_v42 }
 0x113   : > { %817 = vmatprep.mubr.bf16.mxu0 %v4662_v45  ;;  %897 = vmatprep.mubr.bf16.mxu1 %v4665_v46 }
 0x115   : > { %1119 = vmatpush1.bf16.msra.mxu1 %v4002_v48  ;;  %1492 = vmatpush1.bf16.msra.mxu0 %v4005_v49 }
 0x116   : > { %1120 = vmatprep.subr.bf16.mxu1 %v4014_v50  ;;  %1493 = vmatprep.subr.bf16.mxu0 %v4017_v51 }
 0x118   : > { %818 = vmatmul.mubr.bf16.gmra.mrb[24].mxu0 %v4676_v53  ;;  %898 = vmatmul.mubr.bf16.gmra.mrb[24].mxu1 %v4679_v54 }
 0x119   : > { %1121 = vmatpush1.bf16.msra.mxu1 %v4012_v57  ;;  %1494 = vmatpush1.bf16.msra.mxu0 %v4015_v58 }
 0x11a   : > { %1122 = vmatprep.subr.bf16.mxu1 %v4022_v60  ;;  %1495 = vmatprep.subr.bf16.mxu0 %v4025_v61 }
 0x11b   : > { %827 = vmatprep.mubr.bf16.mxu0 %v4027_v62  ;;  %1128 = vmatprep.mubr.bf16.mxu1 %v4503_v14 }
 0x11d   : > { %1123 = vmatpush1.bf16.msra.mxu1 %v4020_v63  ;;  %1496 = vmatpush1.bf16.msra.mxu0 %v4023_v1 }
 0x11e   : > { %1124 = vmatprep.subr.bf16.mxu1 %v4032_v2  ;;  %1497 = vmatprep.subr.bf16.mxu0 %v4035_v5 }
 0x120   : > { %828 = vmatmul.mubr.bf16.gmra.mrb[28].mxu0 %v4029_v6 }
 0x121   : > { %1125 = vmatpush1.bf16.msra.mxu1 %v4030_v7  ;;  %1498 = vmatpush1.bf16.msra.mxu0 %v4033_v8 }
 0x122   : > { %1126 = vmatprep.subr.bf16.mxu1 %v4038_v11  ;;  %1499 = vmatprep.subr.bf16.mxu0 %v4041_v12 }
 0x123   : > { %1501 = vmatprep.mubr.bf16.mxu0 %v4503_v14 }
 0x125   : > { %1127 = vmatpush1.bf16.msra.mxu1 %v4036_v13  ;;  %1500 = vmatpush1.bf16.msra.mxu0 %v4039_v15 }
 0x128   : > { %1129 = vmatmul.mubr.bf16.vlgmr.msra.gmra.mrb[28].mxu1 %v4530_v35  ;;  %1502 = vmatmul.mubr.bf16.vlgmr.msra.gmra.mrb[32].mxu0 %v4530_v35 }
 0x129   : > { %1138 = vmatprep.mubr.bf16.mxu1 %v4542_v43  ;;  %1511 = vmatprep.mubr.bf16.mxu0 %v4542_v43 }
 0x130   : > { %1139 = vmatmul.mubr.bf16.gmra.mrb[32].mxu1 %v4552_v47  ;;  %1512 = vmatmul.mubr.bf16.gmra.mrb[36].mxu0 %v4552_v47 }
 0x131   : > { %1148 = vmatprep.mubr.bf16.mxu1 %v4566_v55  ;;  %1521 = vmatprep.mubr.bf16.mxu0 %v4566_v55 }
 0x138   : > { %1149 = vmatmul.mubr.bf16.gmra.mrb[36].mxu1 %v4576_v59  ;;  %1522 = vmatmul.mubr.bf16.gmra.mrb[40].mxu0 %v4576_v59 }
 0x139   : > { %1158 = vmatprep.mubr.bf16.mxu1 %v4590_v3  ;;  %1531 = vmatprep.mubr.bf16.mxu0 %v4590_v3 }
 0x140   : > { %1159 = vmatmul.mubr.bf16.gmra.mrb[40].mxu1 %v4604_v9  ;;  %1532 = vmatmul.mubr.bf16.gmra.mrb[44].mxu0 %v4604_v9 }
 0x141   : > { %1168 = vmatprep.mubr.bf16.mxu1 %v4614_v17  ;;  %1541 = vmatprep.mubr.bf16.mxu0 %v4614_v17 }
 0x148   : > { %1169 = vmatmul.mubr.bf16.gmra.mrb[44].mxu1 %v4628_v23  ;;  %1542 = vmatmul.mubr.bf16.gmra.mrb[48].mxu0 %v4628_v23 }
 0x149   : > { %1178 = vmatprep.mubr.bf16.mxu1 %v4638_v29  ;;  %1551 = vmatprep.mubr.bf16.mxu0 %v4638_v29 }
 0x150   : > { %1179 = vmatmul.mubr.bf16.gmra.mrb[48].mxu1 %v4652_v36  ;;  %1552 = vmatmul.mubr.bf16.gmra.mrb[52].mxu0 %v4652_v36 }
 0x151   : > { %1188 = vmatprep.mubr.bf16.mxu1 %v4662_v45  ;;  %1561 = vmatprep.mubr.bf16.mxu0 %v4662_v45 }
 0x158   : > { %1189 = vmatmul.mubr.bf16.gmra.mrb[52].mxu1 %v4676_v53  ;;  %1562 = vmatmul.mubr.bf16.gmra.mrb[56].mxu0 %v4676_v53 }
 0x159   : > { %1198 = vmatprep.mubr.bf16.mxu1 %v4027_v62  ;;  %1571 = vmatprep.mubr.bf16.mxu0 %v4027_v62 }
 0x160   : > { %1199 = vmatmul.mubr.bf16.gmra.mrb[56].mxu1 %v4029_v6  ;;  %1572 = vmatmul.mubr.bf16.gmra.mrb[60].mxu0 %v4029_v6 }
 0x161   : > { %1208 = vmatprep.mubr.bf16.mxu1 %v4507_v16  ;;  %1581 = vmatprep.mubr.bf16.mxu0 %v4507_v16 }
 0x168   : > { %1209 = vmatmul.mubr.bf16.gmra.mrb[60].mxu1 %v4535_v38  ;;  %1582 = vmatmul.mubr.bf16.gmra.mrb[64].mxu0 %v4535_v38 }
 0x169   : > { %1218 = vmatprep.mubr.bf16.mxu1 %v4545_v44  ;;  %1591 = vmatprep.mubr.bf16.mxu0 %v4545_v44 }
 0x170   : > { %1219 = vmatmul.mubr.bf16.gmra.mrb[64].mxu1 %v4561_v52  ;;  %1592 = vmatmul.mubr.bf16.gmra.mrb[68].mxu0 %v4561_v52 }
 0x171   : > { %1228 = vmatprep.mubr.bf16.mxu1 %v4569_v56  ;;  %1601 = vmatprep.mubr.bf16.mxu0 %v4569_v56 }
 0x178   : > { %1229 = vmatmul.mubr.bf16.gmra.mrb[68].mxu1 %v4585_v0  ;;  %1602 = vmatmul.mubr.bf16.gmra.mrb[72].mxu0 %v4585_v0 }
 0x179   : > { %1238 = vmatprep.mubr.bf16.mxu1 %v4593_v4  ;;  %1611 = vmatprep.mubr.bf16.mxu0 %v4593_v4 }
 0x180   : > { %1239 = vmatmul.mubr.bf16.gmra.mrb[72].mxu1 %v4607_v10  ;;  %1612 = vmatmul.mubr.bf16.gmra.mrb[76].mxu0 %v4607_v10 }
 0x181   : > { %1248 = vmatprep.mubr.bf16.mxu1 %v4617_v18  ;;  %1621 = vmatprep.mubr.bf16.mxu0 %v4617_v18 }
 0x188   : > { %1249 = vmatmul.mubr.bf16.gmra.mrb[76].mxu1 %v4631_v24  ;;  %1622 = vmatmul.mubr.bf16.gmra.mrb[80].mxu0 %v4631_v24 }
 0x189   : > { %1258 = vmatprep.mubr.bf16.mxu1 %v4641_v30  ;;  %1631 = vmatprep.mubr.bf16.mxu0 %v4641_v30 }
 0x190   : > { %1259 = vmatmul.mubr.bf16.gmra.mrb[80].mxu1 %v4655_v37  ;;  %1632 = vmatmul.mubr.bf16.gmra.mrb[84].mxu0 %v4655_v37 }
 0x191   : > { %1268 = vmatprep.mubr.bf16.mxu1 %v4665_v46  ;;  %1641 = vmatprep.mubr.bf16.mxu0 %v4665_v46 }
 0x198   : > { %1269 = vmatmul.mubr.bf16.gmra.mrb[84].mxu1 %v4679_v54  ;;  %1642 = vmatmul.mubr.bf16.gmra.mrb[88].mxu0 %v4679_v54 }
 0x1bb   : > { %v4755_v14 = vpop.f32.mrb[0].mxu0  ;;  %v4757_v16 = vpop.f32.mrb[0].mxu1 }
 0x1bc   : > { %v4759_v35 = vpop.f32.mrb[1].mxu0  ;;  %v4761_v38 = vpop.f32.mrb[1].mxu1 }
 0x1bd   : > { %v4763_v43 = vpop.f32.mrb[2].mxu0  ;;  %v4765_v44 = vpop.f32.mrb[2].mxu1 }
 0x1be   : > { %v4767_v47 = vpop.f32.mrb[3].mxu0  ;;  %v4769_v52 = vpop.f32.mrb[3].mxu1 }
 0x1c3   : > { %v4771_v55 = vpop.f32.mrb[4].mxu0  ;;  %v4773_v56 = vpop.f32.mrb[4].mxu1 }
 0x1c4   : > { %v4775_v59 = vpop.f32.mrb[5].mxu0  ;;  %v4777_v0 = vpop.f32.mrb[5].mxu1 }
 0x1c5   : > { %v4779_v3 = vpop.f32.mrb[6].mxu0  ;;  %v4781_v4 = vpop.f32.mrb[6].mxu1 }
 0x1c6   : > { %5981 = vst [vmem:[#allocation16_spill] sm:$0xff] %v4781_v4  ;;  %v4783_v9 = vpop.f32.mrb[7].mxu0  ;;  %v4785_v10 = vpop.f32.mrb[7].mxu1 }
 0x1c7   : > { %5982 = vst [vmem:[#allocation17_spill] sm:$0xff] %v4785_v10 }
 0x1cb   : > { %v4787_v17 = vpop.f32.mrb[8].mxu0  ;;  %v4789_v18 = vpop.f32.mrb[8].mxu1 }
 0x1cc   : > { %5983 = vst [vmem:[#allocation18_spill] sm:$0xff] %v4789_v18  ;;  %v4791_v19 = vpop.f32.mrb[9].mxu0  ;;  %v4793_v20 = vpop.f32.mrb[9].mxu1 }
 0x1cd   : > { %5984 = vst [vmem:[#allocation19_spill] sm:$0xff] %v4793_v20  ;;  %v4795_v21 = vpop.f32.mrb[10].mxu0  ;;  %v4797_v22 = vpop.f32.mrb[10].mxu1 }
 0x1ce   : > { %5985 = vst [vmem:[#allocation20_spill] sm:$0xff] %v4797_v22  ;;  %v4799_v23 = vpop.f32.mrb[11].mxu0  ;;  %v4801_v24 = vpop.f32.mrb[11].mxu1 }
 0x1cf   : > { %5986 = vst [vmem:[#allocation21_spill] sm:$0xff] %v4801_v24 }
 0x1d3   : > { %v4803_v25 = vpop.f32.mrb[12].mxu0  ;;  %v4805_v26 = vpop.f32.mrb[12].mxu1 }
 0x1d4   : > { %5987 = vst [vmem:[#allocation22_spill] sm:$0xff] %v4805_v26  ;;  %v4807_v27 = vpop.f32.mrb[13].mxu0  ;;  %v4809_v28 = vpop.f32.mrb[13].mxu1  ;;  %v2220_v26 = vld [vmem:[#allocation10] sm:$0xff] }
 0x1d5   : > { %5988 = vst [vmem:[#allocation23_spill] sm:$0xff] %v4809_v28  ;;  %v4811_v29 = vpop.f32.mrb[14].mxu0  ;;  %v4813_v30 = vpop.f32.mrb[14].mxu1 }
 0x1d6   : > { %5989 = vst [vmem:[#allocation24_spill] sm:$0xff] %v4813_v30  ;;  %v4815_v31 = vpop.f32.mrb[15].mxu0  ;;  %v4817_v32 = vpop.f32.mrb[15].mxu1 }
 0x1d7   : > { %5990 = vst [vmem:[#allocation25_spill] sm:$0xff] %v4817_v32 }
 0x1db   : > { %v4819_v33 = vpop.f32.mrb[16].mxu0  ;;  %v4821_v34 = vpop.f32.mrb[16].mxu1 }
 0x1dc   : > { %5991 = vst [vmem:[#allocation26_spill] sm:$0xff] %v4821_v34  ;;  %v4823_v36 = vpop.f32.mrb[17].mxu0  ;;  %v4825_v37 = vpop.f32.mrb[17].mxu1 }
 0x1dd   : > { %5992 = vst [vmem:[#allocation27_spill] sm:$0xff] %v4825_v37  ;;  %v4827_v39 = vpop.f32.mrb[18].mxu0  ;;  %v4829_v40 = vpop.f32.mrb[18].mxu1 }
 0x1de   : > { %5993 = vst [vmem:[#allocation28_spill] sm:$0xff] %v4829_v40  ;;  %v4831_v41 = vpop.f32.mrb[19].mxu0  ;;  %v4833_v42 = vpop.f32.mrb[19].mxu1 }
 0x1df   : > { %5994 = vst [vmem:[#allocation29_spill] sm:$0xff] %v4833_v42 }
 0x1e3   : > { %v4835_v45 = vpop.f32.mrb[20].mxu0  ;;  %v4837_v46 = vpop.f32.mrb[20].mxu1 }
 0x1e4   : > { %5995 = vst [vmem:[#allocation30_spill] sm:$0xff] %v4837_v46  ;;  %v4839_v48 = vpop.f32.mrb[21].mxu0  ;;  %v4841_v49 = vpop.f32.mrb[21].mxu1 }
 0x1e5   : > { %5996 = vst [vmem:[#allocation31_spill] sm:$0xff] %v4841_v49  ;;  %v4843_v50 = vpop.f32.mrb[22].mxu0  ;;  %v4845_v51 = vpop.f32.mrb[22].mxu1 }
 0x1e6   : > { %5997 = vst [vmem:[#allocation32_spill] sm:$0xff] %v4845_v51  ;;  %v4847_v53 = vpop.f32.mrb[23].mxu0  ;;  %v4849_v54 = vpop.f32.mrb[23].mxu1 }
 0x1e7   : > { %5998 = vst [vmem:[#allocation33_spill] sm:$0xff] %v4849_v54 }
 0x1eb   : > { %v4851_v57 = vpop.f32.mrb[24].mxu0  ;;  %v899_v58 = vpop.f32.mrb[24].mxu1 }
 0x1ec   : > { %v4853_v60 = vpop.f32.mrb[25].mxu0  ;;  %v900_v61 = vpop.f32.mrb[25].mxu1 }
 0x1ed   : > { %v4855_v62 = vpop.f32.mrb[26].mxu0  ;;  %v901_v63 = vpop.f32.mrb[26].mxu1 }
 0x1ee   : > { %v4857_v1 = vpop.f32.mrb[27].mxu0  ;;  %v902_v2 = vpop.f32.mrb[27].mxu1 }
 0x1f3   : > { %v4859_v5 = vpop.f32.mrb[28].mxu0 }
 0x1f4   : > { %v4861_v6 = vpop.f32.mrb[29].mxu0 }
 0x1f5   : > { %v4863_v7 = vpop.f32.mrb[30].mxu0 }
 0x1f6   : > { %v4865_v8 = vpop.f32.mrb[31].mxu0 }
 0x1fb   : > { %v1130_v11 = vpop.f32.mrb[28].mxu1  ;;  %v1503_v12 = vpop.f32.mrb[32].mxu0 }
 0x1fc   : > { %v1994_v13 = vrot.slane %v1503_v12, 2  ;;  %v1132_v15 = vpop.f32.mrb[29].mxu1  ;;  %v1505_v58 = vpop.f32.mrb[33].mxu0  ;;  %v1709_v51 = vrot.slane %v1130_v11, 1 }
 0x1fd   : > { %v1997_v61 = vrot.slane %v1505_v58, 2  ;;  %v1134_v54 = vpop.f32.mrb[30].mxu1  ;;  %v1507_v63 = vpop.f32.mrb[34].mxu0  ;;  %v1712_v40 = vrot.slane %v1132_v15, 1 }
 0x1fe   : > { %v1710_v2 = vrot.slane %v1134_v54, 1  ;;  %v1995_v49 = vrot.slane %v1507_v63, 2  ;;  %v1136_v46 = vpop.f32.mrb[31].mxu1  ;;  %v1509_v42 = vpop.f32.mrb[35].mxu0  ;;  %v2221_v63 = vld [vmem:[#allocation10 + $0x8] sm:$0xff] }
 0x1ff   : > { %v1713_v37 = vrot.slane %v1136_v46, 1  ;;  %v1998_v34 = vrot.slane %v1509_v42, 2 }
 0x200   : > { %v1711_v32 = vsel %vm1708_vm0, %v1709_v51, %v1710_v2  ;;  %v1996_v30 = vsel %vm1993_vm1, %v1994_v13, %v1995_v49 }
 0x201   : > { %v1879_v12 = vadd.f32 %v1711_v32, %v4755_v14  ;;  %v1714_v58 = vsel %vm1708_vm0, %v1712_v40, %v1713_v37  ;;  %v1999_v28 = vsel %vm1993_vm1, %v1997_v61, %v1998_v34 }
 0x202   : > { %v1880_v11 = vadd.f32 %v1714_v58, %v4759_v35 }
 0x203   : > { %v2164_v54 = vadd.f32 %v1996_v30, %v1879_v12  ;;  %v1140_v24 = vpop.f32.mrb[32].mxu1  ;;  %v1513_v22 = vpop.f32.mrb[36].mxu0 }
 0x204   : > { %v2165_v15 = vadd.f32 %v1999_v28, %v1880_v11  ;;  %v1715_v46 = vrot.slane %v1140_v24, 1  ;;  %v2000_v42 = vrot.slane %v1513_v22, 2  ;;  %v1142_v20 = vpop.f32.mrb[33].mxu1  ;;  %v1515_v51 = vpop.f32.mrb[37].mxu0 }
 0x205   : > { %v2276_v18 = vadd.f32 %v2220_v26, %v2164_v54  ;;  %v1717_v13 = vrot.slane %v1142_v20, 1  ;;  %v2002_v10 = vrot.slane %v1515_v51, 2  ;;  %v1144_v14 = vpop.f32.mrb[34].mxu1  ;;  %v1517_v32 = vpop.f32.mrb[38].mxu0  ;;  %v2222_v20 = vld [vmem:[#allocation10 + $0x10] sm:$0xff]  ;;  %v2224_v51 = vld [vmem:[#allocation10 + $0x20] sm:$0xff] }
 0x206   : > { %v2277_v40 = vadd.f32 %v2221_v63, %v2165_v15  ;;  %v1716_v61 = vsel %vm1708_vm0, %v1710_v2, %v1715_v46  ;;  %v2001_v4 = vsel %vm1993_vm1, %v1995_v49, %v2000_v42  ;;  %v1719_v35 = vrot.slane %v1144_v14, 1  ;;  %v1146_v30 = vpop.f32.mrb[35].mxu1  ;;  %v1519_v12 = vpop.f32.mrb[39].mxu0  ;;  %v2223_v63 = vld [vmem:[#allocation10 + $0x18] sm:$0xff] }
 0x207   : > { %2332 = vst [vmem:[#allocation10] sm:$0xff] %v2276_v18  ;;  %v1881_v28 = vadd.f32 %v1716_v61, %v4763_v43  ;;  %v1718_v22 = vsel %vm1708_vm0, %v1713_v37, %v1717_v13  ;;  %v2003_v24 = vsel %vm1993_vm1, %v1998_v34, %v2002_v10  ;;  %v2004_v26 = vrot.slane %v1517_v32, 2 }
 0x208   : > { %2333 = vst [vmem:[#allocation10 + $0x8] sm:$0xff] %v2277_v40  ;;  %v1882_v58 = vadd.f32 %v1718_v22, %v4767_v47  ;;  %v1720_v11 = vsel %vm1708_vm0, %v1715_v46, %v1719_v35  ;;  %v1721_v2 = vrot.slane %v1146_v30, 1  ;;  %v2006_v54 = vrot.slane %v1519_v12, 2  ;;  %v2225_v30 = vld [vmem:[#allocation10 + $0x28] sm:$0xff] }
 0x209   : > { %v2166_v49 = vadd.f32 %v2001_v4, %v1881_v28  ;;  %v1883_v15 = vadd.f32 %v1720_v11, %v4771_v55  ;;  %v2005_v18 = vsel %vm1993_vm1, %v2000_v42, %v2004_v26 }
 0x20a   : > { %v2167_v43 = vadd.f32 %v2003_v24, %v1882_v58  ;;  %v1722_v37 = vsel %vm1708_vm0, %v1717_v13, %v1721_v2  ;;  %v2007_v34 = vsel %vm1993_vm1, %v2002_v10, %v2006_v54 }
 0x20b   : > { %v2278_v14 = vadd.f32 %v2222_v20, %v2166_v49  ;;  %v2168_v32 = vadd.f32 %v2005_v18, %v1883_v15  ;;  %v1884_v47 = vadd.f32 %v1722_v37, %v4775_v59  ;;  %v1150_v40 = vpop.f32.mrb[36].mxu1  ;;  %v1523_v46 = vpop.f32.mrb[40].mxu0 }
 0x20c   : > { %v2279_v61 = vadd.f32 %v2223_v63, %v2167_v43  ;;  %v1723_v4 = vrot.slane %v1150_v40, 1  ;;  %v2008_v12 = vrot.slane %v1523_v46, 2  ;;  %v1152_v28 = vpop.f32.mrb[37].mxu1  ;;  %v1525_v55 = vpop.f32.mrb[41].mxu0  ;;  %v2227_v40 = vld [vmem:[#allocation10 + $0x38] sm:$0xff] }
 0x20d   : > { %2334 = vst [vmem:[#allocation10 + $0x10] sm:$0xff] %v2278_v14  ;;  %v2280_v42 = vadd.f32 %v2224_v51, %v2168_v32  ;;  %v2169_v22 = vadd.f32 %v2007_v34, %v1884_v47  ;;  %v1725_v24 = vrot.slane %v1152_v28, 1  ;;  %v2010_v58 = vrot.slane %v1525_v55, 2  ;;  %v1154_v13 = vpop.f32.mrb[38].mxu1  ;;  %v1527_v11 = vpop.f32.mrb[42].mxu0  ;;  %v2226_v34 = vld [vmem:[#allocation10 + $0x30] sm:$0xff] }
 0x20e   : > { %2335 = vst [vmem:[#allocation10 + $0x18] sm:$0xff] %v2279_v61  ;;  %v1724_v10 = vsel %vm1708_vm0, %v1719_v35, %v1723_v4  ;;  %v2009_v59 = vsel %vm1993_vm1, %v2004_v26, %v2008_v12  ;;  %v1727_v20 = vrot.slane %v1154_v13, 1  ;;  %v2012_v49 = vrot.slane %v1527_v11, 2  ;;  %v1156_v63 = vpop.f32.mrb[39].mxu1  ;;  %v1529_v15 = vpop.f32.mrb[43].mxu0 }
 0x20f   : > { %2336 = vst [vmem:[#allocation10 + $0x20] sm:$0xff] %v2280_v42  ;;  %v2281_v18 = vadd.f32 %v2225_v30, %v2169_v22  ;;  %v1885_v43 = vadd.f32 %v1724_v10, %v4779_v3  ;;  %v1726_v51 = vsel %vm1708_vm0, %v1721_v2, %v1725_v24  ;;  %v2011_v37 = vsel %vm1993_vm1, %v2006_v54, %v2010_v58  ;;  %v2228_v3 = vld [vmem:[#allocation10 + $0x40] sm:$0xff]  ;;  %v2229_v22 = vld [vmem:[#allocation10 + $0x48] sm:$0xff] }
 0x210   : > { %v1886_v14 = vadd.f32 %v1726_v51, %v4783_v9  ;;  %v1728_v32 = vsel %vm1708_vm0, %v1723_v4, %v1727_v20  ;;  %v2013_v35 = vsel %vm1993_vm1, %v2008_v12, %v2012_v49  ;;  %v1729_v26 = vrot.slane %v1156_v63, 1 }
 0x211   : > { %2337 = vst [vmem:[#allocation10 + $0x28] sm:$0xff] %v2281_v18  ;;  %v2170_v47 = vadd.f32 %v2009_v59, %v1885_v43  ;;  %v1887_v46 = vadd.f32 %v1728_v32, %v4787_v17  ;;  %v2014_v61 = vrot.slane %v1529_v15, 2 }
 0x212   : > { %v2171_v30 = vadd.f32 %v2011_v37, %v1886_v14  ;;  %v1730_v2 = vsel %vm1708_vm0, %v1725_v24, %v1729_v26 }
 0x213   : > { %v2282_v28 = vadd.f32 %v2226_v34, %v2170_v47  ;;  %v2172_v54 = vadd.f32 %v2013_v35, %v1887_v46  ;;  %v1888_v55 = vadd.f32 %v1730_v2, %v4791_v19  ;;  %v2015_v9 = vsel %vm1993_vm1, %v2010_v58, %v2014_v61  ;;  %v1160_v4 = vpop.f32.mrb[40].mxu1  ;;  %v1533_v42 = vpop.f32.mrb[44].mxu0  ;;  %v2230_v46 = vld [vmem:[#allocation10 + $0x50] sm:$0xff] }
 0x214   : > { %v2283_v12 = vadd.f32 %v2227_v40, %v2171_v30  ;;  %v1731_v13 = vrot.slane %v1160_v4, 1  ;;  %v2016_v11 = vrot.slane %v1533_v42, 2  ;;  %v1162_v10 = vpop.f32.mrb[41].mxu1  ;;  %v1535_v59 = vpop.f32.mrb[45].mxu0 }
 0x215   : > { %2338 = vst [vmem:[#allocation10 + $0x30] sm:$0xff] %v2282_v28  ;;  %v2284_v17 = vadd.f32 %v2228_v3, %v2172_v54  ;;  %v2173_v63 = vadd.f32 %v2015_v9, %v1888_v55  ;;  %v1733_v15 = vrot.slane %v1162_v10, 1  ;;  %v2018_v18 = vrot.slane %v1535_v59, 2  ;;  %v1164_v24 = vpop.f32.mrb[42].mxu1  ;;  %v1537_v43 = vpop.f32.mrb[46].mxu0  ;;  %v2231_v28 = vld [vmem:[#allocation10 + $0x58] sm:$0xff] }
 0x216   : > { %2339 = vst [vmem:[#allocation10 + $0x38] sm:$0xff] %v2283_v12  ;;  %v1732_v19 = vsel %vm1708_vm0, %v1727_v20, %v1731_v13  ;;  %v2017_v58 = vsel %vm1993_vm1, %v2012_v49, %v2016_v11  ;;  %v1735_v51 = vrot.slane %v1164_v24, 1  ;;  %v2020_v37 = vrot.slane %v1537_v43, 2  ;;  %v1166_v34 = vpop.f32.mrb[43].mxu1  ;;  %v1539_v14 = vpop.f32.mrb[47].mxu0 }
 0x217   : > { %2340 = vst [vmem:[#allocation10 + $0x40] sm:$0xff] %v2284_v17  ;;  %v2285_v32 = vadd.f32 %v2229_v22, %v2173_v63  ;;  %v1889_v35 = vadd.f32 %v1732_v19, %v4795_v21  ;;  %v1734_v47 = vsel %vm1708_vm0, %v1729_v26, %v1733_v15  ;;  %v2019_v40 = vsel %vm1993_vm1, %v2014_v61, %v2018_v18  ;;  %v2232_v21 = vld [vmem:[#allocation10 + $0x60] sm:$0xff] }
 0x218   : > { %v1890_v30 = vadd.f32 %v1734_v47, %v4799_v23  ;;  %v1736_v3 = vsel %vm1708_vm0, %v1731_v13, %v1735_v51  ;;  %v2021_v20 = vsel %vm1993_vm1, %v2016_v11, %v2020_v37  ;;  %v1737_v49 = vrot.slane %v1166_v34, 1  ;;  %v2233_v11 = vld [vmem:[#allocation10 + $0x68] sm:$0xff] }
 0x219   : > { %2341 = vst [vmem:[#allocation10 + $0x48] sm:$0xff] %v2285_v32  ;;  %v2174_v2 = vadd.f32 %v2017_v58, %v1889_v35  ;;  %v1891_v54 = vadd.f32 %v1736_v3, %v4803_v25  ;;  %v2022_v55 = vrot.slane %v1539_v14, 2  ;;  %v2234_v3 = vld [vmem:[#allocation10 + $0x70] sm:$0xff] }
 0x21a   : > { %v2175_v9 = vadd.f32 %v2019_v40, %v1890_v30  ;;  %v1738_v26 = vsel %vm1708_vm0, %v1733_v15, %v1737_v49 }
 0x21b   : > { %v2286_v4 = vadd.f32 %v2230_v46, %v2174_v2  ;;  %v2176_v61 = vadd.f32 %v2021_v20, %v1891_v54  ;;  %v1892_v42 = vadd.f32 %v1738_v26, %v4807_v27  ;;  %v2023_v23 = vsel %vm1993_vm1, %v2018_v18, %v2022_v55  ;;  %v1170_v12 = vpop.f32.mrb[44].mxu1  ;;  %v1543_v22 = vpop.f32.mrb[48].mxu0  ;;  %v2235_v54 = vld [vmem:[#allocation10 + $0x78] sm:$0xff] }
 0x21c   : > { %v2287_v13 = vadd.f32 %v2231_v28, %v2175_v9  ;;  %v1739_v10 = vrot.slane %v1170_v12, 1  ;;  %v2024_v59 = vrot.slane %v1543_v22, 2  ;;  %v1172_v17 = vpop.f32.mrb[45].mxu1  ;;  %v1545_v63 = vpop.f32.mrb[49].mxu0  ;;  %v2237_v22 = vld [vmem:[#allocation10 + $0x88] sm:$0xff] }
 0x21d   : > { %2342 = vst [vmem:[#allocation10 + $0x50] sm:$0xff] %v2286_v4  ;;  %v2288_v25 = vadd.f32 %v2232_v21, %v2176_v61  ;;  %v2177_v24 = vadd.f32 %v2023_v23, %v1892_v42  ;;  %v1741_v43 = vrot.slane %v1172_v17, 1  ;;  %v2026_v19 = vrot.slane %v1545_v63, 2  ;;  %v1174_v15 = vpop.f32.mrb[46].mxu1  ;;  %v1547_v58 = vpop.f32.mrb[50].mxu0 }
 0x21e   : > { %2343 = vst [vmem:[#allocation10 + $0x58] sm:$0xff] %v2287_v13  ;;  %v1740_v27 = vsel %vm1708_vm0, %v1735_v51, %v1739_v10  ;;  %v2025_v18 = vsel %vm1993_vm1, %v2020_v37, %v2024_v59  ;;  %v1743_v34 = vrot.slane %v1174_v15, 1  ;;  %v2028_v14 = vrot.slane %v1547_v58, 2  ;;  %v1176_v32 = vpop.f32.mrb[47].mxu1  ;;  %v1549_v35 = vpop.f32.mrb[51].mxu0 }
 0x21f   : > { %2344 = vst [vmem:[#allocation10 + $0x60] sm:$0xff] %v2288_v25  ;;  %v2289_v47 = vadd.f32 %v2233_v11, %v2177_v24  ;;  %v1893_v40 = vadd.f32 %v1740_v27, %v4811_v29  ;;  %v1742_v46 = vsel %vm1708_vm0, %v1737_v49, %v1741_v43  ;;  %v2027_v30 = vsel %vm1993_vm1, %v2022_v55, %v2026_v19  ;;  %v2236_v29 = vld [vmem:[#allocation10 + $0x80] sm:$0xff] }
 0x220   : > { %v1894_v20 = vadd.f32 %v1742_v46, %v4815_v31  ;;  %v1744_v2 = vsel %vm1708_vm0, %v1739_v10, %v1743_v34  ;;  %v2029_v51 = vsel %vm1993_vm1, %v2024_v59, %v2028_v14  ;;  %v1745_v37 = vrot.slane %v1176_v32, 1  ;;  %v2238_v46 = vld [vmem:[#allocation10 + $0x90] sm:$0xff] }
 0x221   : > { %2345 = vst [vmem:[#allocation10 + $0x68] sm:$0xff] %v2289_v47  ;;  %v2178_v28 = vadd.f32 %v2025_v18, %v1893_v40  ;;  %v1895_v9 = vadd.f32 %v1744_v2, %v4819_v33  ;;  %v2030_v21 = vrot.slane %v1549_v35, 2  ;;  %v2239_v2 = vld [vmem:[#allocation10 + $0x98] sm:$0xff] }
 0x222   : > { %v2179_v26 = vadd.f32 %v2027_v30, %v1894_v20  ;;  %v1746_v49 = vsel %vm1708_vm0, %v1741_v43, %v1745_v37 }
 0x223   : > { %v2290_v4 = vadd.f32 %v2234_v3, %v2178_v28  ;;  %v2180_v55 = vadd.f32 %v2029_v51, %v1895_v9  ;;  %v1896_v61 = vadd.f32 %v1746_v49, %v4823_v36  ;;  %v2031_v31 = vsel %vm1993_vm1, %v2026_v19, %v2030_v21  ;;  %v1180_v42 = vpop.f32.mrb[48].mxu1  ;;  %v1553_v23 = vpop.f32.mrb[52].mxu0 }
 0x224   : > { %v2291_v12 = vadd.f32 %v2235_v54, %v2179_v26  ;;  %v1747_v13 = vrot.slane %v1180_v42, 1  ;;  %v2032_v11 = vrot.slane %v1553_v23, 2  ;;  %v1182_v10 = vpop.f32.mrb[49].mxu1  ;;  %v1555_v59 = vpop.f32.mrb[53].mxu0 }
 0x225   : > { %2346 = vst [vmem:[#allocation10 + $0x70] sm:$0xff] %v2290_v4  ;;  %v2292_v33 = vadd.f32 %v2236_v29, %v2180_v55  ;;  %v2181_v17 = vadd.f32 %v2031_v31, %v1896_v61  ;;  %v1749_v63 = vrot.slane %v1182_v10, 1  ;;  %v2034_v25 = vrot.slane %v1555_v59, 2  ;;  %v1184_v24 = vpop.f32.mrb[50].mxu1  ;;  %v1557_v43 = vpop.f32.mrb[54].mxu0  ;;  %v2241_v55 = vld [vmem:[#allocation10 + $0xa8] sm:$0xff] }
 0x226   : > { %2347 = vst [vmem:[#allocation10 + $0x78] sm:$0xff] %v2291_v12  ;;  %v1748_v36 = vsel %vm1708_vm0, %v1743_v34, %v1747_v13  ;;  %v2033_v19 = vsel %vm1993_vm1, %v2028_v14, %v2032_v11  ;;  %v1751_v15 = vrot.slane %v1184_v24, 1  ;;  %v2036_v58 = vrot.slane %v1557_v43, 2  ;;  %v1186_v27 = vpop.f32.mrb[51].mxu1  ;;  %v1559_v18 = vpop.f32.mrb[55].mxu0 }
 0x227   : > { %2348 = vst [vmem:[#allocation10 + $0x80] sm:$0xff] %v2292_v33  ;;  %v2293_v32 = vadd.f32 %v2237_v22, %v2181_v17  ;;  %v1897_v35 = vadd.f32 %v1748_v36, %v4827_v39  ;;  %v1750_v47 = vsel %vm1708_vm0, %v1745_v37, %v1749_v63  ;;  %v2035_v40 = vsel %vm1993_vm1, %v2030_v21, %v2034_v25  ;;  %v2240_v39 = vld [vmem:[#allocation10 + $0xa0] sm:$0xff] }
 0x228   : > { %v1898_v30 = vadd.f32 %v1750_v47, %v4831_v41  ;;  %v1752_v3 = vsel %vm1708_vm0, %v1747_v13, %v1751_v15  ;;  %v2037_v34 = vsel %vm1993_vm1, %v2032_v11, %v2036_v58  ;;  %v1753_v14 = vrot.slane %v1186_v27, 1  ;;  %v2242_v27 = vld [vmem:[#allocation10 + $0xb0] sm:$0xff]  ;;  %v2243_v47 = vld [vmem:[#allocation10 + $0xb8] sm:$0xff] }
 0x229   : > { %2349 = vst [vmem:[#allocation10 + $0x88] sm:$0xff] %v2293_v32  ;;  %v2182_v20 = vadd.f32 %v2033_v19, %v1897_v35  ;;  %v1899_v51 = vadd.f32 %v1752_v3, %v4835_v45  ;;  %v2038_v28 = vrot.slane %v1559_v18, 2 }
 0x22a   : > { %v2183_v54 = vadd.f32 %v2035_v40, %v1898_v30  ;;  %v1754_v37 = vsel %vm1708_vm0, %v1749_v63, %v1753_v14 }
 0x22b   : > { %v2294_v9 = vadd.f32 %v2238_v46, %v2182_v20  ;;  %v2184_v21 = vadd.f32 %v2037_v34, %v1899_v51  ;;  %v1900_v26 = vadd.f32 %v1754_v37, %v4839_v48  ;;  %v2039_v41 = vsel %vm1993_vm1, %v2034_v25, %v2038_v28  ;;  %v1190_v29 = vpop.f32.mrb[52].mxu1  ;;  %v1563_v49 = vpop.f32.mrb[56].mxu0 }
 0x22c   : > { %v2295_v4 = vadd.f32 %v2239_v2, %v2183_v54  ;;  %v1755_v61 = vrot.slane %v1190_v29, 1  ;;  %v2040_v31 = vrot.slane %v1563_v49, 2  ;;  %v1192_v42 = vpop.f32.mrb[53].mxu1  ;;  %v1565_v23 = vpop.f32.mrb[57].mxu0  ;;  %v2245_v54 = vld [vmem:[#allocation10 + $0xc8] sm:$0xff] }
 0x22d   : > { %2350 = vst [vmem:[#allocation10 + $0x90] sm:$0xff] %v2294_v9  ;;  %v2296_v45 = vadd.f32 %v2240_v39, %v2184_v21  ;;  %v2185_v12 = vadd.f32 %v2039_v41, %v1900_v26  ;;  %v1757_v22 = vrot.slane %v1192_v42, 1  ;;  %v2042_v13 = vrot.slane %v1565_v23, 2  ;;  %v1194_v11 = vpop.f32.mrb[54].mxu1  ;;  %v1567_v10 = vpop.f32.mrb[58].mxu0 }
 0x22e   : > { %2351 = vst [vmem:[#allocation10 + $0x98] sm:$0xff] %v2295_v4  ;;  %v1756_v48 = vsel %vm1708_vm0, %v1751_v15, %v1755_v61  ;;  %v2041_v59 = vsel %vm1993_vm1, %v2036_v58, %v2040_v31  ;;  %v1759_v33 = vrot.slane %v1194_v11, 1  ;;  %v2044_v17 = vrot.slane %v1567_v10, 2  ;;  %v1196_v63 = vpop.f32.mrb[55].mxu1  ;;  %v1569_v25 = vpop.f32.mrb[59].mxu0  ;;  %v2246_v11 = vld [vmem:[#allocation10 + $0xd0] sm:$0xff] }
 0x22f   : > { %2352 = vst [vmem:[#allocation10 + $0xa0] sm:$0xff] %v2296_v45  ;;  %v2297_v24 = vadd.f32 %v2241_v55, %v2185_v12  ;;  %v1901_v43 = vadd.f32 %v1756_v48, %v4843_v50  ;;  %v1758_v36 = vsel %vm1708_vm0, %v1753_v14, %v1757_v22  ;;  %v2043_v19 = vsel %vm1993_vm1, %v2038_v28, %v2042_v13  ;;  %v2244_v50 = vld [vmem:[#allocation10 + $0xc0] sm:$0xff] }
 0x230   : > { %v1902_v18 = vadd.f32 %v1758_v36, %v4847_v53  ;;  %v1760_v32 = vsel %vm1708_vm0, %v1755_v61, %v1759_v33  ;;  %v2045_v15 = vsel %vm1993_vm1, %v2040_v31, %v2044_v17  ;;  %v1761_v58 = vrot.slane %v1196_v63, 1  ;;  %v2247_v63 = vld [vmem:[#allocation10 + $0xd8] sm:$0xff] }
 0x231   : > { %2353 = vst [vmem:[#allocation10 + $0xa8] sm:$0xff] %v2297_v24  ;;  %v2186_v35 = vadd.f32 %v2041_v59, %v1901_v43  ;;  %v1903_v40 = vadd.f32 %v1760_v32, %v4851_v57  ;;  %v2046_v46 = vrot.slane %v1569_v25, 2 }
 0x232   : > { %v2187_v30 = vadd.f32 %v2043_v19, %v1902_v18  ;;  %v1762_v3 = vsel %vm1708_vm0, %v1757_v22, %v1761_v58 }
 0x233   : > { %v2298_v34 = vadd.f32 %v2242_v27, %v2186_v35  ;;  %v2188_v14 = vadd.f32 %v2045_v15, %v1903_v40  ;;  %v1904_v20 = vadd.f32 %v1762_v3, %v4853_v60  ;;  %v2047_v53 = vsel %vm1993_vm1, %v2042_v13, %v2046_v46  ;;  %v1200_v2 = vpop.f32.mrb[56].mxu1  ;;  %v1573_v51 = vpop.f32.mrb[60].mxu0  ;;  %v2249_v35 = vld [vmem:[#allocation10 + $0xe8] sm:$0xff] }
 0x234   : > { %v2299_v28 = vadd.f32 %v2243_v47, %v2187_v30  ;;  %v1763_v39 = vrot.slane %v1200_v2, 1  ;;  %v2048_v37 = vrot.slane %v1573_v51, 2  ;;  %v1202_v9 = vpop.f32.mrb[57].mxu1  ;;  %v1575_v21 = vpop.f32.mrb[61].mxu0 }
 0x235   : > { %2354 = vst [vmem:[#allocation10 + $0xb0] sm:$0xff] %v2298_v34  ;;  %v2300_v57 = vadd.f32 %v2244_v50, %v2188_v14  ;;  %v2189_v26 = vadd.f32 %v2047_v53, %v1904_v20  ;;  %v1765_v41 = vrot.slane %v1202_v9, 1  ;;  %v2050_v29 = vrot.slane %v1575_v21, 2  ;;  %v1204_v49 = vpop.f32.mrb[58].mxu1  ;;  %v1577_v4 = vpop.f32.mrb[62].mxu0 }
 0x236   : > { %2355 = vst [vmem:[#allocation10 + $0xb8] sm:$0xff] %v2299_v28  ;;  %v1764_v60 = vsel %vm1708_vm0, %v1759_v33, %v1763_v39  ;;  %v2049_v55 = vsel %vm1993_vm1, %v2044_v17, %v2048_v37  ;;  %v1767_v61 = vrot.slane %v1204_v49, 1  ;;  %v2052_v31 = vrot.slane %v1577_v4, 2  ;;  %v1206_v42 = vpop.f32.mrb[59].mxu1  ;;  %v1579_v23 = vpop.f32.mrb[63].mxu0 }
 0x237   : > { %2356 = vst [vmem:[#allocation10 + $0xc0] sm:$0xff] %v2300_v57  ;;  %v2301_v45 = vadd.f32 %v2245_v54, %v2189_v26  ;;  %v1905_v12 = vadd.f32 %v1764_v60, %v4855_v62  ;;  %v1766_v22 = vsel %vm1708_vm0, %v1761_v58, %v1765_v41  ;;  %v2051_v13 = vsel %vm1993_vm1, %v2046_v46, %v2050_v29  ;;  %v2248_v62 = vld [vmem:[#allocation10 + $0xe0] sm:$0xff]  ;;  %v2250_v57 = vld [vmem:[#allocation10 + $0xf0] sm:$0xff]  ;;  %v2251_v60 = vld [vmem:[#allocation10 + $0xf8] sm:$0xff] }
 0x238   : > { %v1906_v10 = vadd.f32 %v1766_v22, %v4857_v1  ;;  %v1768_v48 = vsel %vm1708_vm0, %v1763_v39, %v1767_v61  ;;  %v2053_v59 = vsel %vm1993_vm1, %v2048_v37, %v2052_v31  ;;  %v1769_v33 = vrot.slane %v1206_v42, 1 }
 0x239   : > { %2357 = vst [vmem:[#allocation10 + $0xc8] sm:$0xff] %v2301_v45  ;;  %v2190_v17 = vadd.f32 %v2049_v55, %v1905_v12  ;;  %v1907_v25 = vadd.f32 %v1768_v48, %v4859_v5  ;;  %v2054_v24 = vrot.slane %v1579_v23, 2 }
 0x23a   : > { %v2191_v43 = vadd.f32 %v2051_v13, %v1906_v10  ;;  %v1770_v36 = vsel %vm1708_vm0, %v1765_v41, %v1769_v33  ;;  %v2253_v10 = vld [vmem:[#allocation10 + $0x108] sm:$0xff] }
 0x23b   : > { %v2302_v19 = vadd.f32 %v2246_v11, %v2190_v17  ;;  %v2192_v27 = vadd.f32 %v2053_v59, %v1907_v25  ;;  %v1908_v18 = vadd.f32 %v1770_v36, %v4861_v6  ;;  %v2055_v1 = vsel %vm1993_vm1, %v2050_v29, %v2054_v24  ;;  %v1210_v32 = vpop.f32.mrb[60].mxu1  ;;  %v1583_v15 = vpop.f32.mrb[64].mxu0 }
 0x23c   : > { %v2303_v58 = vadd.f32 %v2247_v63, %v2191_v43  ;;  %v1771_v47 = vrot.slane %v1210_v32, 1  ;;  %v2056_v40 = vrot.slane %v1583_v15, 2  ;;  %v1212_v46 = vpop.f32.mrb[61].mxu1  ;;  %v1585_v30 = vpop.f32.mrb[65].mxu0 }
 0x23d   : > { %2358 = vst [vmem:[#allocation10 + $0xd0] sm:$0xff] %v2302_v19  ;;  %v2304_v5 = vadd.f32 %v2248_v62, %v2192_v27  ;;  %v2193_v50 = vadd.f32 %v2055_v1, %v1908_v18  ;;  %v1773_v3 = vrot.slane %v1212_v46, 1  ;;  %v2058_v34 = vrot.slane %v1585_v30, 2  ;;  %v1214_v14 = vpop.f32.mrb[62].mxu1  ;;  %v1587_v20 = vpop.f32.mrb[66].mxu0 }
 0x23e   : > { %2359 = vst [vmem:[#allocation10 + $0xd8] sm:$0xff] %v2303_v58  ;;  %v1772_v6 = vsel %vm1708_vm0, %v1767_v61, %v1771_v47  ;;  %v2057_v53 = vsel %vm1993_vm1, %v2052_v31, %v2056_v40  ;;  %v1775_v2 = vrot.slane %v1214_v14, 1  ;;  %v2060_v51 = vrot.slane %v1587_v20, 2  ;;  %v1216_v28 = vpop.f32.mrb[63].mxu1  ;;  %v1589_v54 = vpop.f32.mrb[67].mxu0 }
 0x23f   : > { %2360 = vst [vmem:[#allocation10 + $0xe0] sm:$0xff] %v2304_v5  ;;  %v2305_v39 = vadd.f32 %v2249_v35, %v2193_v50  ;;  %v1909_v37 = vadd.f32 %v1772_v6, %v4863_v7  ;;  %v1774_v9 = vsel %vm1708_vm0, %v1769_v33, %v1773_v3  ;;  %v2059_v21 = vsel %vm1993_vm1, %v2054_v24, %v2058_v34  ;;  %v2252_v7 = vld [vmem:[#allocation10 + $0x100] sm:$0xff] }
 0x240   : > { %v1910_v26 = vadd.f32 %v1774_v9, %v4865_v8  ;;  %v1776_v41 = vsel %vm1708_vm0, %v1771_v47, %v1775_v2  ;;  %v2061_v29 = vsel %vm1993_vm1, %v2056_v40, %v2060_v51  ;;  %v1777_v49 = vrot.slane %v1216_v28, 1  ;;  %v2254_v47 = vld [vmem:[#allocation10 + $0x110] sm:$0xff] }
 0x241   : > { %2361 = vst [vmem:[#allocation10 + $0xe8] sm:$0xff] %v2305_v39  ;;  %v2194_v4 = vadd.f32 %v2057_v53, %v1909_v37  ;;  %v1911_v55 = vadd.f32 %v1776_v41, %v4757_v16  ;;  %v2062_v61 = vrot.slane %v1589_v54, 2  ;;  %v2257_v37 = vld [vmem:[#allocation10 + $0x128] sm:$0xff] }
 0x242   : > { %v2195_v31 = vadd.f32 %v2059_v21, %v1910_v26  ;;  %v1778_v42 = vsel %vm1708_vm0, %v1773_v3, %v1777_v49  ;;  %v2255_v3 = vld [vmem:[#allocation10 + $0x118] sm:$0xff] }
 0x243   : > { %v2306_v23 = vadd.f32 %v2250_v57, %v2194_v4  ;;  %v2196_v45 = vadd.f32 %v2061_v29, %v1911_v55  ;;  %v1912_v12 = vadd.f32 %v1778_v42, %v4761_v38  ;;  %v2063_v8 = vsel %vm1993_vm1, %v2058_v34, %v2062_v61  ;;  %v1220_v22 = vpop.f32.mrb[64].mxu1  ;;  %v1593_v13 = vpop.f32.mrb[68].mxu0 }
 0x244   : > { %v2307_v11 = vadd.f32 %v2251_v60, %v2195_v31  ;;  %v1779_v48 = vrot.slane %v1220_v22, 1  ;;  %v2064_v59 = vrot.slane %v1593_v13, 2  ;;  %v1222_v33 = vpop.f32.mrb[65].mxu1  ;;  %v1595_v17 = vpop.f32.mrb[69].mxu0  ;;  %v2258_v13 = vld [vmem:[#allocation10 + $0x130] sm:$0xff] }
 0x245   : > { %2362 = vst [vmem:[#allocation10 + $0xf0] sm:$0xff] %v2306_v23  ;;  %v2308_v16 = vadd.f32 %v2252_v7, %v2196_v45  ;;  %v2197_v63 = vadd.f32 %v2063_v8, %v1912_v12  ;;  %v1781_v25 = vrot.slane %v1222_v33, 1  ;;  %v2066_v24 = vrot.slane %v1595_v17, 2  ;;  %v1224_v43 = vpop.f32.mrb[66].mxu1  ;;  %v1597_v62 = vpop.f32.mrb[70].mxu0  ;;  %v5999_v45 = vld [vmem:[#allocation16_spill] sm:$0xff] }
 0x246   : > { %2363 = vst [vmem:[#allocation10 + $0xf8] sm:$0xff] %v2307_v11  ;;  %v1780_v38 = vsel %vm1708_vm0, %v1775_v2, %v1779_v48  ;;  %v2065_v36 = vsel %vm1993_vm1, %v2060_v51, %v2064_v59  ;;  %v1783_v19 = vrot.slane %v1224_v43, 1  ;;  %v2068_v27 = vrot.slane %v1597_v62, 2  ;;  %v1226_v18 = vpop.f32.mrb[67].mxu1  ;;  %v1599_v1 = vpop.f32.mrb[71].mxu0  ;;  %v6000_v11 = vld [vmem:[#allocation17_spill] sm:$0xff] }
 0x247   : > { %2364 = vst [vmem:[#allocation10 + $0x100] sm:$0xff] %v2308_v16  ;;  %v2309_v32 = vadd.f32 %v2253_v10, %v2197_v63  ;;  %v1913_v15 = vadd.f32 %v1780_v38, %v4765_v44  ;;  %v1782_v58 = vsel %vm1708_vm0, %v1777_v49, %v1781_v25  ;;  %v2067_v35 = vsel %vm1993_vm1, %v2062_v61, %v2066_v24  ;;  %v2256_v44 = vld [vmem:[#allocation10 + $0x120] sm:$0xff]  ;;  %v2259_v16 = vld [vmem:[#allocation10 + $0x138] sm:$0xff]  ;;  %v6001_v63 = vld [vmem:[#allocation18_spill] sm:$0xff] }
 0x248   : > { %v1914_v40 = vadd.f32 %v1782_v58, %v4769_v52  ;;  %v1784_v46 = vsel %vm1708_vm0, %v1779_v48, %v1783_v19  ;;  %v2069_v30 = vsel %vm1993_vm1, %v2064_v59, %v2068_v27  ;;  %v1785_v5 = vrot.slane %v1226_v18, 1  ;;  %v2260_v62 = vld [vmem:[#allocation10 + $0x140] sm:$0xff] }
 0x249   : > { %2365 = vst [vmem:[#allocation10 + $0x108] sm:$0xff] %v2309_v32  ;;  %v2198_v50 = vadd.f32 %v2065_v36, %v1913_v15  ;;  %v1915_v34 = vadd.f32 %v1784_v46, %v4773_v56  ;;  %v2070_v14 = vrot.slane %v1599_v1, 2 }
 0x24a   : > { %v2199_v20 = vadd.f32 %v2067_v35, %v1914_v40  ;;  %v1786_v6 = vsel %vm1708_vm0, %v1781_v25, %v1785_v5  ;;  %v2261_v35 = vld [vmem:[#allocation10 + $0x148] sm:$0xff] }
 0x24b   : > { %v2310_v53 = vadd.f32 %v2254_v47, %v2198_v50  ;;  %v2200_v2 = vadd.f32 %v2069_v30, %v1915_v34  ;;  %v1916_v51 = vadd.f32 %v1786_v6, %v4777_v0  ;;  %v2071_v52 = vsel %vm1993_vm1, %v2066_v24, %v2070_v14  ;;  %v1230_v28 = vpop.f32.mrb[68].mxu1  ;;  %v1603_v54 = vpop.f32.mrb[72].mxu0 }
 0x24c   : > { %v2311_v39 = vadd.f32 %v2255_v3, %v2199_v20  ;;  %v1787_v9 = vrot.slane %v1230_v28, 1  ;;  %v2072_v21 = vrot.slane %v1603_v54, 2  ;;  %v1232_v57 = vpop.f32.mrb[69].mxu1  ;;  %v1605_v26 = vpop.f32.mrb[73].mxu0  ;;  %v6003_v54 = vld [vmem:[#allocation20_spill] sm:$0xff] }
 0x24d   : > { %2366 = vst [vmem:[#allocation10 + $0x110] sm:$0xff] %v2310_v53  ;;  %v2312_v56 = vadd.f32 %v2256_v44, %v2200_v2  ;;  %v2201_v41 = vadd.f32 %v2071_v52, %v1916_v51  ;;  %v1789_v29 = vrot.slane %v1232_v57, 1  ;;  %v2074_v49 = vrot.slane %v1605_v26, 2  ;;  %v1234_v4 = vpop.f32.mrb[70].mxu1  ;;  %v1607_v60 = vpop.f32.mrb[74].mxu0  ;;  %v6004_v57 = vld [vmem:[#allocation21_spill] sm:$0xff] }
 0x24e   : > { %2367 = vst [vmem:[#allocation10 + $0x118] sm:$0xff] %v2311_v39  ;;  %v1788_v0 = vsel %vm1708_vm0, %v1783_v19, %v1787_v9  ;;  %v2073_v55 = vsel %vm1993_vm1, %v2068_v27, %v2072_v21  ;;  %v1791_v61 = vrot.slane %v1234_v4, 1  ;;  %v2076_v31 = vrot.slane %v1607_v60, 2  ;;  %v1236_v7 = vpop.f32.mrb[71].mxu1  ;;  %v1609_v42 = vpop.f32.mrb[75].mxu0  ;;  %v6002_v27 = vld [vmem:[#allocation19_spill] sm:$0xff] }
 0x24f   : > { %2368 = vst [vmem:[#allocation10 + $0x120] sm:$0xff] %v2312_v56  ;;  %v2313_v23 = vadd.f32 %v2257_v37, %v2201_v41  ;;  %v1917_v12 = vadd.f32 %v1788_v0, %v5999_v45  ;;  %v1790_v8 = vsel %vm1708_vm0, %v1785_v5, %v1789_v29  ;;  %v2075_v22 = vsel %vm1993_vm1, %v2070_v14, %v2074_v49  ;;  %v2263_v4 = vld [vmem:[#allocation10 + $0x158] sm:$0xff]  ;;  %v6005_v60 = vld [vmem:[#allocation22_spill] sm:$0xff] }
 0x250   : > { %v1918_v10 = vadd.f32 %v1790_v8, %v6000_v11  ;;  %v1792_v48 = vsel %vm1708_vm0, %v1787_v9, %v1791_v61  ;;  %v2077_v59 = vsel %vm1993_vm1, %v2072_v21, %v2076_v31  ;;  %v1793_v33 = vrot.slane %v1236_v7, 1  ;;  %v2262_v21 = vld [vmem:[#allocation10 + $0x150] sm:$0xff]  ;;  %v6006_v45 = vld [vmem:[#allocation23_spill] sm:$0xff] }
 0x251   : > { %2369 = vst [vmem:[#allocation10 + $0x128] sm:$0xff] %v2313_v23  ;;  %v2202_v17 = vadd.f32 %v2073_v55, %v1917_v12  ;;  %v1919_v25 = vadd.f32 %v1792_v48, %v6001_v63  ;;  %v2078_v24 = vrot.slane %v1609_v42, 2 }
 0x252   : > { %v2203_v43 = vadd.f32 %v2075_v22, %v1918_v10  ;;  %v1794_v38 = vsel %vm1708_vm0, %v1789_v29, %v1793_v33  ;;  %v2265_v10 = vld [vmem:[#allocation10 + $0x168] sm:$0xff] }
 0x253   : > { %v2314_v36 = vadd.f32 %v2258_v13, %v2202_v17  ;;  %v2204_v19 = vadd.f32 %v2077_v59, %v1919_v25  ;;  %v1920_v18 = vadd.f32 %v1794_v38, %v6002_v27  ;;  %v2079_v1 = vsel %vm1993_vm1, %v2074_v49, %v2078_v24  ;;  %v1240_v32 = vpop.f32.mrb[72].mxu1  ;;  %v1613_v15 = vpop.f32.mrb[76].mxu0 }
 0x254   : > { %v2315_v58 = vadd.f32 %v2259_v16, %v2203_v43  ;;  %v1795_v47 = vrot.slane %v1240_v32, 1  ;;  %v2080_v40 = vrot.slane %v1613_v15, 2  ;;  %v1242_v46 = vpop.f32.mrb[73].mxu1  ;;  %v1615_v30 = vpop.f32.mrb[77].mxu0  ;;  %v6007_v15 = vld [vmem:[#allocation24_spill] sm:$0xff] }
 0x255   : > { %2370 = vst [vmem:[#allocation10 + $0x130] sm:$0xff] %v2314_v36  ;;  %v2316_v5 = vadd.f32 %v2260_v62, %v2204_v19  ;;  %v2205_v50 = vadd.f32 %v2079_v1, %v1920_v18  ;;  %v1797_v3 = vrot.slane %v1242_v46, 1  ;;  %v2082_v34 = vrot.slane %v1615_v30, 2  ;;  %v1244_v14 = vpop.f32.mrb[74].mxu1  ;;  %v1617_v20 = vpop.f32.mrb[78].mxu0  ;;  %v6008_v46 = vld [vmem:[#allocation25_spill] sm:$0xff] }
 0x256   : > { %2371 = vst [vmem:[#allocation10 + $0x138] sm:$0xff] %v2315_v58  ;;  %v1796_v44 = vsel %vm1708_vm0, %v1791_v61, %v1795_v47  ;;  %v2081_v6 = vsel %vm1993_vm1, %v2076_v31, %v2080_v40  ;;  %v1799_v53 = vrot.slane %v1244_v14, 1  ;;  %v2084_v2 = vrot.slane %v1617_v20, 2  ;;  %v1246_v51 = vpop.f32.mrb[75].mxu1  ;;  %v1619_v52 = vpop.f32.mrb[79].mxu0  ;;  %v2264_v31 = vld [vmem:[#allocation10 + $0x160] sm:$0xff] }
 0x257   : > { %2372 = vst [vmem:[#allocation10 + $0x140] sm:$0xff] %v2316_v5  ;;  %v2317_v28 = vadd.f32 %v2261_v35, %v2205_v50  ;;  %v1921_v39 = vadd.f32 %v1796_v44, %v6003_v54  ;;  %v1798_v37 = vsel %vm1708_vm0, %v1793_v33, %v1797_v3  ;;  %v2083_v9 = vsel %vm1993_vm1, %v2078_v24, %v2082_v34  ;;  %v2267_v14 = vld [vmem:[#allocation10 + $0x178] sm:$0xff]  ;;  %v6009_v20 = vld [vmem:[#allocation26_spill] sm:$0xff] }
 0x258   : > { %v1922_v26 = vadd.f32 %v1798_v37, %v6004_v57  ;;  %v1800_v56 = vsel %vm1708_vm0, %v1795_v47, %v1799_v53  ;;  %v2085_v41 = vsel %vm1993_vm1, %v2080_v40, %v2084_v2  ;;  %v1801_v29 = vrot.slane %v1246_v51, 1  ;;  %v2266_v40 = vld [vmem:[#allocation10 + $0x170] sm:$0xff]  ;;  %v6010_v54 = vld [vmem:[#allocation27_spill] sm:$0xff] }
 0x259   : > { %2373 = vst [vmem:[#allocation10 + $0x148] sm:$0xff] %v2317_v28  ;;  %v2206_v49 = vadd.f32 %v2081_v6, %v1921_v39  ;;  %v1923_v0 = vadd.f32 %v1800_v56, %v6005_v60  ;;  %v2086_v55 = vrot.slane %v1619_v52, 2 }
 0x25a   : > { %v2207_v61 = vadd.f32 %v2083_v9, %v1922_v26  ;;  %v1802_v7 = vsel %vm1708_vm0, %v1797_v3, %v1801_v29  ;;  %v2269_v26 = vld [vmem:[#allocation10 + $0x188] sm:$0xff] }
 0x25b   : > { %v2318_v42 = vadd.f32 %v2262_v21, %v2206_v49  ;;  %v2208_v23 = vadd.f32 %v2085_v41, %v1923_v0  ;;  %v1924_v12 = vadd.f32 %v1802_v7, %v6006_v45  ;;  %v2087_v8 = vsel %vm1993_vm1, %v2082_v34, %v2086_v55  ;;  %v1250_v22 = vpop.f32.mrb[76].mxu1  ;;  %v1623_v13 = vpop.f32.mrb[80].mxu0 }
 0x25c   : > { %v2319_v11 = vadd.f32 %v2263_v4, %v2207_v61  ;;  %v1803_v48 = vrot.slane %v1250_v22, 1  ;;  %v2088_v59 = vrot.slane %v1623_v13, 2  ;;  %v1252_v33 = vpop.f32.mrb[77].mxu1  ;;  %v1625_v17 = vpop.f32.mrb[81].mxu0  ;;  %v6011_v13 = vld [vmem:[#allocation28_spill] sm:$0xff] }
 0x25d   : > { %2374 = vst [vmem:[#allocation10 + $0x150] sm:$0xff] %v2318_v42  ;;  %v2320_v16 = vadd.f32 %v2264_v31, %v2208_v23  ;;  %v2209_v63 = vadd.f32 %v2087_v8, %v1924_v12  ;;  %v1805_v25 = vrot.slane %v1252_v33, 1  ;;  %v2090_v24 = vrot.slane %v1625_v17, 2  ;;  %v1254_v43 = vpop.f32.mrb[78].mxu1  ;;  %v1627_v62 = vpop.f32.mrb[82].mxu0  ;;  %v6012_v33 = vld [vmem:[#allocation29_spill] sm:$0xff] }
 0x25e   : > { %2375 = vst [vmem:[#allocation10 + $0x158] sm:$0xff] %v2319_v11  ;;  %v1804_v38 = vsel %vm1708_vm0, %v1799_v53, %v1803_v48  ;;  %v2089_v36 = vsel %vm1993_vm1, %v2084_v2, %v2088_v59  ;;  %v1807_v19 = vrot.slane %v1254_v43, 1  ;;  %v2092_v27 = vrot.slane %v1627_v62, 2  ;;  %v1256_v18 = vpop.f32.mrb[79].mxu1  ;;  %v1629_v1 = vpop.f32.mrb[83].mxu0  ;;  %v2268_v2 = vld [vmem:[#allocation10 + $0x180] sm:$0xff] }
 0x25f   : > { %2376 = vst [vmem:[#allocation10 + $0x160] sm:$0xff] %v2320_v16  ;;  %v2321_v32 = vadd.f32 %v2265_v10, %v2209_v63  ;;  %v1925_v58 = vadd.f32 %v1804_v38, %v6007_v15  ;;  %v1806_v35 = vsel %vm1708_vm0, %v1801_v29, %v1805_v25  ;;  %v2091_v47 = vsel %vm1993_vm1, %v2086_v55, %v2090_v24  ;;  %v2271_v43 = vld [vmem:[#allocation10 + $0x198] sm:$0xff]  ;;  %v6013_v62 = vld [vmem:[#allocation30_spill] sm:$0xff] }
 0x260   : > { %v1926_v30 = vadd.f32 %v1806_v35, %v6008_v46  ;;  %v1808_v5 = vsel %vm1708_vm0, %v1803_v48, %v1807_v19  ;;  %v2093_v50 = vsel %vm1993_vm1, %v2088_v59, %v2092_v27  ;;  %v1809_v3 = vrot.slane %v1256_v18, 1  ;;  %v2270_v59 = vld [vmem:[#allocation10 + $0x190] sm:$0xff]  ;;  %v6014_v15 = vld [vmem:[#allocation31_spill] sm:$0xff] }
 0x261   : > { %2377 = vst [vmem:[#allocation10 + $0x168] sm:$0xff] %v2321_v32  ;;  %v2210_v34 = vadd.f32 %v2089_v36, %v1925_v58  ;;  %v1927_v44 = vadd.f32 %v1808_v5, %v6009_v20  ;;  %v2094_v6 = vrot.slane %v1629_v1, 2 }
 0x262   : > { %v2211_v53 = vadd.f32 %v2091_v47, %v1926_v30  ;;  %v1810_v51 = vsel %vm1708_vm0, %v1805_v25, %v1809_v3  ;;  %v2273_v30 = vld [vmem:[#allocation10 + $0x1a8] sm:$0xff] }
 0x263   : > { %v2322_v52 = vadd.f32 %v2266_v40, %v2210_v34  ;;  %v2212_v28 = vadd.f32 %v2093_v50, %v1927_v44  ;;  %v1928_v39 = vadd.f32 %v1810_v51, %v6010_v54  ;;  %v2095_v37 = vsel %vm1993_vm1, %v2090_v24, %v2094_v6  ;;  %v1260_v9 = vpop.f32.mrb[80].mxu1  ;;  %v1633_v21 = vpop.f32.mrb[84].mxu0 }
 0x264   : > { %v2323_v57 = vadd.f32 %v2267_v14, %v2211_v53  ;;  %v1811_v56 = vrot.slane %v1260_v9, 1  ;;  %v2096_v41 = vrot.slane %v1633_v21, 2  ;;  %v1262_v29 = vpop.f32.mrb[81].mxu1  ;;  %v1635_v49 = vpop.f32.mrb[85].mxu0 }
 0x265   : > { %2378 = vst [vmem:[#allocation10 + $0x170] sm:$0xff] %v2322_v52  ;;  %v2324_v4 = vadd.f32 %v2268_v2, %v2212_v28  ;;  %v2213_v60 = vadd.f32 %v2095_v37, %v1928_v39  ;;  %v1813_v0 = vrot.slane %v1262_v29, 1  ;;  %v2098_v55 = vrot.slane %v1635_v49, 2  ;;  %v1264_v61 = vpop.f32.mrb[82].mxu1  ;;  %v1637_v31 = vpop.f32.mrb[86].mxu0  ;;  %v6015_v37 = vld [vmem:[#allocation32_spill] sm:$0xff] }
 0x266   : > { %2379 = vst [vmem:[#allocation10 + $0x178] sm:$0xff] %v2323_v57  ;;  %v1812_v7 = vsel %vm1708_vm0, %v1807_v19, %v1811_v56  ;;  %v2097_v42 = vsel %vm1993_vm1, %v2092_v27, %v2096_v41  ;;  %v1815_v23 = vrot.slane %v1264_v61, 1  ;;  %v2100_v45 = vrot.slane %v1637_v31, 2  ;;  %v1266_v12 = vpop.f32.mrb[83].mxu1  ;;  %v1639_v8 = vpop.f32.mrb[87].mxu0  ;;  %v2272_v27 = vld [vmem:[#allocation10 + $0x1a0] sm:$0xff] }
 0x267   : > { %2380 = vst [vmem:[#allocation10 + $0x180] sm:$0xff] %v2324_v4  ;;  %v2325_v22 = vadd.f32 %v2269_v26, %v2213_v60  ;;  %v1929_v11 = vadd.f32 %v1812_v7, %v6011_v13  ;;  %v1814_v10 = vsel %vm1708_vm0, %v1809_v3, %v1813_v0  ;;  %v2099_v48 = vsel %vm1993_vm1, %v2094_v6, %v2098_v55  ;;  %v2274_v26 = vld [vmem:[#allocation10 + $0x1b0] sm:$0xff]  ;;  %v2275_v49 = vld [vmem:[#allocation10 + $0x1b8] sm:$0xff] }
 0x268   : > { %v1930_v17 = vadd.f32 %v1814_v10, %v6012_v33  ;;  %v1816_v16 = vsel %vm1708_vm0, %v1811_v56, %v1815_v23  ;;  %v2101_v63 = vsel %vm1993_vm1, %v2096_v41, %v2100_v45  ;;  %v1817_v25 = vrot.slane %v1266_v12, 1  ;;  %v6016_v56 = vld [vmem:[#allocation33_spill] sm:$0xff] }
 0x269   : > { %2381 = vst [vmem:[#allocation10 + $0x188] sm:$0xff] %v2325_v22  ;;  %v2214_v24 = vadd.f32 %v2097_v42, %v1929_v11  ;;  %v1931_v38 = vadd.f32 %v1816_v16, %v6013_v62  ;;  %v2102_v36 = vrot.slane %v1639_v8, 2 }
 0x26a   : > { %v2215_v19 = vadd.f32 %v2099_v48, %v1930_v17  ;;  %v1818_v18 = vsel %vm1708_vm0, %v1813_v0, %v1817_v25 }
 0x26b   : > { %v2326_v1 = vadd.f32 %v2270_v59, %v2214_v24  ;;  %v2216_v32 = vadd.f32 %v2101_v63, %v1931_v38  ;;  %v1932_v58 = vadd.f32 %v1818_v18, %v6014_v15  ;;  %v2103_v35 = vsel %vm1993_vm1, %v2098_v55, %v2102_v36  ;;  %v1270_v47 = vpop.f32.mrb[84].mxu1  ;;  %v1643_v40 = vpop.f32.mrb[88].mxu0 }
 0x26c   : > { %v2327_v46 = vadd.f32 %v2271_v43, %v2215_v19  ;;  %v1819_v5 = vrot.slane %v1270_v47, 1  ;;  %v2104_v50 = vrot.slane %v1643_v40, 2  ;;  %v1272_v3 = vpop.f32.mrb[85].mxu1  ;;  %v1645_v34 = vpop.f32.mrb[89].mxu0 }
 0x26d   : > { %2382 = vst [vmem:[#allocation10 + $0x190] sm:$0xff] %v2326_v1  ;;  %v2328_v14 = vadd.f32 %v2272_v27, %v2216_v32  ;;  %v2217_v20 = vadd.f32 %v2103_v35, %v1932_v58  ;;  %v1821_v44 = vrot.slane %v1272_v3, 1  ;;  %v2106_v6 = vrot.slane %v1645_v34, 2  ;;  %v1274_v53 = vpop.f32.mrb[86].mxu1  ;;  %v1647_v2 = vpop.f32.mrb[90].mxu0 }
 0x26e   : > { %2383 = vst [vmem:[#allocation10 + $0x198] sm:$0xff] %v2327_v46  ;;  %v1820_v51 = vsel %vm1708_vm0, %v1815_v23, %v1819_v5  ;;  %v2105_v52 = vsel %vm1993_vm1, %v2100_v45, %v2104_v50  ;;  %v1275_v28 = vpop.f32.mrb[87].mxu1  ;;  %v1648_v54 = vpop.f32.mrb[91].mxu0 }
 0x26f   : > { %2384 = vst [vmem:[#allocation10 + $0x1a0] sm:$0xff] %v2328_v14  ;;  %v2329_v39 = vadd.f32 %v2273_v30, %v2217_v20  ;;  %v1933_v9 = vadd.f32 %v1820_v51, %v6015_v37  ;;  %v1822_v21 = vsel %vm1708_vm0, %v1817_v25, %v1821_v44  ;;  %v2107_v57 = vsel %vm1993_vm1, %v2102_v36, %v2106_v6 }
 0x270   : > { %v1934_v41 = vadd.f32 %v1822_v21, %v6016_v56  ;;  %2391 = sbr.rel (%p3712_p13) target bundleno = 792 (0x318), region = 60 }
 0x271   : > { %2385 = vst [vmem:[#allocation10 + $0x1a8] sm:$0xff] %v2329_v39  ;;  %v2218_v29 = vadd.f32 %v2105_v52, %v1933_v9 }
 0x272   : > { %v2219_v4 = vadd.f32 %v2107_v57, %v1934_v41 }
 0x273   : > { %v2330_v60 = vadd.f32 %v2274_v26, %v2218_v29 }
 0x274   : > { %v2331_v0 = vadd.f32 %v2275_v49, %v2219_v4 }
 0x275   : > { %2386 = vst [vmem:[#allocation10 + $0x1b0] sm:$0xff] %v2330_v60 }
 0x276   : > { %2387 = vst [vmem:[#allocation10 + $0x1b8] sm:$0xff] %v2331_v0 }
 0x277   : > { %v2448_v55 = vlaneseq  ;;  %v5040_v23 = vld [vmem:[#allocation10 + $0x10] sm:$0xff]  ;;  %v5047_v22 = vld [vmem:[#allocation10] sm:$0xff]  ;;  %v5090_v30 = vld [vmem:[#allocation10 + $0x18] sm:$0xff] }
 0x278   : > { %v5052_v11 = vld [vmem:[#allocation10 + $0x30] sm:$0xff]  ;;  %v5059_v33 = vld [vmem:[#allocation10 + $0x20] sm:$0xff]  ;;  %v3021_v63 = vmul.f32 %v5047_v22, %v5047_v22  ;;  %v5104_v51 = vld [vmem:[#allocation10 + $0x8] sm:$0xff] }
 0x279   : > { %v5036_v61 = vshrl.u32 %v2448_v55, 7  ;;  %v5067_v24 = vld [vmem:[#allocation10 + $0x50] sm:$0xff]  ;;  %v5075_v19 = vld [vmem:[#allocation10 + $0x40] sm:$0xff]  ;;  %v3025_v27 = vmul.f32 %v5059_v33, %v5059_v33  ;;  %v5116_v9 = vld [vmem:[#allocation10 + $0x38] sm:$0xff]  ;;  %v3022_v38 = vmul.f32 %v5104_v51, %v5104_v51 }
 0x27a   : > { %v5082_v58 = vld [vmem:[#allocation10 + $0x70] sm:$0xff]  ;;  %v5092_v5 = vld [vmem:[#allocation10 + $0x60] sm:$0xff]  ;;  %v3029_v50 = vmul.f32 %v5075_v19, %v5075_v19  ;;  %6027 = vst [vmem:[#allocation34_spill] sm:$0xff] %v5116_v9  ;;  %v5126_v29 = vld [vmem:[#allocation10 + $0x28] sm:$0xff] }
 0x27b   : > { %v2450_v31 = vadd.s32 8, %v5036_v61  ;;  %v2452_v7 = vadd.s32 24, %v5036_v61  ;;  %v2454_v45 = vadd.s32 40, %v5036_v61  ;;  %v2456_v10 = vadd.s32 56, %v5036_v61  ;;  %v5096_v34 = vld [vmem:[#allocation10 + $0x80] sm:$0xff]  ;;  %v5109_v28 = vld [vmem:[#allocation10 + $0x90] sm:$0xff] }
 0x27c   : > { %v2458_v43 = vadd.s32 72, %v5036_v61  ;;  %v2460_v35 = vadd.s32 88, %v5036_v61  ;;  %v5098_v14 = vld [vmem:[#allocation10 + $0xa0] sm:$0xff]  ;;  %v2462_v20 = vadd.s32 104, %v5036_v61  ;;  %v3033_v57 = vmul.f32 %v5092_v5, %v5092_v5 }
 0x27d   : > { %v2488_v42 = vand.u32 15, %v2450_v31  ;;  %v2502_v12 = vand.u32 15, %v2452_v7  ;;  %v2516_v48 = vand.u32 15, %v2454_v45  ;;  %v2530_v62 = vand.u32 15, %v2456_v10  ;;  %v5118_v21 = vld [vmem:[#allocation10 + $0xc0] sm:$0xff] }
 0x27e   : > { %v2544_v47 = vand.u32 15, %v2458_v43  ;;  %v2558_v54 = vand.u32 15, %v2460_v35  ;;  %v3037_v26 = vmul.f32 %v5096_v34, %v5096_v34  ;;  %v3041_v56 = vmul.f32 %v5098_v14, %v5098_v14  ;;  %v5128_v49 = vld [vmem:[#allocation10 + $0xe0] sm:$0xff]  ;;  %v5156_v43 = vld [vmem:[#allocation10 + $0x48] sm:$0xff] }
 0x27f   : > { %vm5043_vm2 = vcmp.lt.s32.totalorder %v2488_v42, 14  ;;  %vm5055_vm3 = vcmp.lt.s32.totalorder %v2502_v12, 14  ;;  %vm5070_vm4 = vcmp.lt.s32.totalorder %v2516_v48, 14  ;;  %vm5085_vm5 = vcmp.lt.s32.totalorder %v2530_v62, 14  ;;  %v5138_v12 = vld [vmem:[#allocation10 + $0xb0] sm:$0xff]  ;;  %v5147_v48 = vld [vmem:[#allocation10 + $0x58] sm:$0xff] }
 0x280   : > { %v2899_v13 = vsel %vm5043_vm2, %v5040_v23, 0.0  ;;  %v2903_v16 = vsel %vm5055_vm3, %v5052_v11, 0.0  ;;  %v2907_v1 = vsel %vm5070_vm4, %v5067_v24, 0.0  ;;  %v2911_v6 = vsel %vm5085_vm5, %v5082_v58, 0.0  ;;  %6030 = vst [vmem:[#allocation35_spill] sm:$0xff] %v5147_v48  ;;  %6031 = vst [vmem:[#allocation36_spill] sm:$0xff] %v5156_v43 }
 0x281   : > { %v2953_v17 = vadd.f32 %v2899_v13, %v5047_v22  ;;  %v3023_v25 = vmul.f32 %v2899_v13, %v2899_v13  ;;  %v3027_v32 = vmul.f32 %v2903_v16, %v2903_v16  ;;  %v3031_v53 = vmul.f32 %v2907_v1, %v2907_v1 }
 0x282   : > { %v2900_v52 = vsel %vm5043_vm2, %v5090_v30, 0.0  ;;  %vm5111_vm6 = vcmp.lt.s32.totalorder %v2544_v47, 14  ;;  %v2464_v4 = vadd.s32 120, %v5036_v61  ;;  %v2572_v60 = vand.u32 15, %v2462_v20  ;;  %v5177_v20 = vld [vmem:[#allocation10 + $0x78] sm:$0xff] }
 0x283   : > { %v2954_v36 = vadd.f32 %v2953_v17, %v5059_v33  ;;  %v3077_v15 = vadd.f32 %v3023_v25, %v3021_v63  ;;  %v2986_v55 = vadd.f32 %v2900_v52, %v5104_v51  ;;  %v2915_v31 = vsel %vm5111_vm6, %v5109_v28, 0.0  ;;  %6034 = vst [vmem:[#allocation37_spill] sm:$0xff] %v5177_v20 }
 0x284   : > { %v3035_v7 = vmul.f32 %v2911_v6, %v2911_v6  ;;  %v2904_v45 = vsel %vm5055_vm3, %v5116_v9, 0.0  ;;  %vm5140_vm7 = vcmp.lt.s32.totalorder %v2558_v54, 14  ;;  %v3045_v10 = vmul.f32 %v5118_v21, %v5118_v21  ;;  %v5182_v54 = vld [vmem:[#allocation10 + $0x68] sm:$0xff] }
 0x285   : > { %v2955_v18 = vadd.f32 %v2954_v36, %v2903_v16  ;;  %v3078_v3 = vadd.f32 %v3077_v15, %v3025_v27  ;;  %v2987_v17 = vadd.f32 %v2986_v55, %v5126_v29  ;;  %v2466_v16 = vadd.s32 136, %v5036_v61  ;;  %6035 = vst [vmem:[#allocation38_spill] sm:$0xff] %v5182_v54 }
 0x286   : > { %v2468_v59 = vadd.s32 152, %v5036_v61  ;;  %v5154_v63 = vmul.f32 %v5128_v49, %v5128_v49  ;;  %v2586_v62 = vand.u32 15, %v2464_v4  ;;  %vm5158_vm8 = vcmp.lt.s32.totalorder %v2572_v60, 14 }
 0x287   : > { %v2956_v46 = vadd.f32 %v2955_v18, %v5075_v19  ;;  %v3079_v2 = vadd.f32 %v3078_v3, %v3027_v32  ;;  %v2988_v18 = vadd.f32 %v2987_v17, %v2904_v45  ;;  %v2919_v32 = vsel %vm5140_vm7, %v5138_v12, 0.0  ;;  %v5205_v17 = vld [vmem:[#allocation10 + $0x98] sm:$0xff] }
 0x288   : > { %v3039_v15 = vmul.f32 %v2915_v31, %v2915_v31  ;;  %v2908_v47 = vsel %vm5070_vm4, %v5147_v48, 0.0  ;;  %vm5186_vm9 = vcmp.lt.s32.totalorder %v2586_v62, 14  ;;  %v3043_v55 = vmul.f32 %v2919_v32, %v2919_v32  ;;  %6038 = vst [vmem:[#allocation39_spill] sm:$0xff] %v5205_v17  ;;  %v5212_v62 = vld [vmem:[#allocation10 + $0x88] sm:$0xff] }
 0x289   : > { %v2957_v44 = vadd.f32 %v2956_v46, %v2907_v1  ;;  %v3080_v41 = vadd.f32 %v3079_v2, %v3029_v50  ;;  %v5162_v1 = vld [vmem:[#allocation10 + $0xd0] sm:$0xff]  ;;  %v5171_v46 = vadd.s32 168, %v5036_v61  ;;  %v5174_v50 = vadd.s32 184, %v5036_v61  ;;  %6041 = vst [vmem:[#allocation40_spill] sm:$0xff] %v5212_v62 }
 0x28b   : > { %v2958_v37 = vadd.f32 %v2957_v44, %v5092_v5  ;;  %v3081_v42 = vadd.f32 %v3080_v41, %v3031_v53  ;;  %v2989_v44 = vadd.f32 %v2988_v18, %v5156_v43  ;;  %v2600_v53 = vand.u32 15, %v2466_v16 }
 0x28c   : > { %v2923_v41 = vsel %vm5158_vm8, %v5162_v1, 0.0 }
 0x28d   : > { %v2959_v0 = vadd.f32 %v2958_v37, %v2911_v6  ;;  %v3082_v25 = vadd.f32 %v3081_v42, %v3033_v57  ;;  %v5180_v6 = vld [vmem:[#allocation10 + $0x100] sm:$0xff]  ;;  %v3024_v37 = vmul.f32 %v2900_v52, %v2900_v52  ;;  %v2990_v60 = vadd.f32 %v2989_v44, %v2908_v47 }
 0x28e   : > { %v3026_v52 = vmul.f32 %v5126_v29, %v5126_v29  ;;  %vm5208_vm10 = vcmp.lt.s32.totalorder %v2600_v53, 14  ;;  %v2916_v53 = vsel %vm5111_vm6, %v5205_v17, 0.0 }
 0x28f   : > { %v2960_v13 = vadd.f32 %v2959_v0, %v5096_v34  ;;  %v3083_v35 = vadd.f32 %v3082_v25, %v3035_v7  ;;  %v5193_v0 = vld [vmem:[#allocation10 + $0xf0] sm:$0xff]  ;;  %v2614_v7 = vand.u32 15, %v2468_v59  ;;  %v2991_v16 = vadd.f32 %v2990_v60, %v5182_v54 }
 0x290   : > { %v3110_v18 = vadd.f32 %v3024_v37, %v3022_v38  ;;  %v2927_v59 = vsel %vm5186_vm9, %v5193_v0, 0.0  ;;  %v2628_v38 = vand.u32 15, %v5171_v46 }
 0x291   : > { %v2961_v27 = vadd.f32 %v2960_v13, %v2915_v31  ;;  %v3084_v2 = vadd.f32 %v3083_v35, %v3037_v26  ;;  %v2912_v31 = vsel %vm5085_vm5, %v5177_v20, 0.0  ;;  %v5203_v13 = vmul.f32 %v5180_v6, %v5180_v6 }
 0x292   : > { %v2992_v35 = vadd.f32 %v2991_v16, %v2912_v31  ;;  %vm5230_vm11 = vcmp.lt.s32.totalorder %v2614_v7, 14  ;;  %v3051_v16 = vmul.f32 %v2927_v59, %v2927_v59  ;;  %vm5254_vm12 = vcmp.lt.s32.totalorder %v2628_v38, 14 }
 0x293   : > { %v2962_v3 = vadd.f32 %v2961_v27, %v5098_v14  ;;  %v3085_v26 = vadd.f32 %v3084_v2, %v3039_v15  ;;  %v3028_v27 = vmul.f32 %v2904_v45, %v2904_v45  ;;  %v3047_v15 = vmul.f32 %v2923_v41, %v2923_v41 }
 0x294   : > { %v3111_v2 = vadd.f32 %v3110_v18, %v3026_v52  ;;  %v2474_v45 = vadd.s32 200, %v5036_v61  ;;  %v5239_v18 = vld [vmem:[#allocation10 + $0x130] sm:$0xff] }
 0x295   : > { %v2963_v4 = vadd.f32 %v2962_v3, %v2919_v32  ;;  %v3086_v40 = vadd.f32 %v3085_v26, %v3041_v56  ;;  %v5217_v3 = vld [vmem:[#allocation10 + $0x110] sm:$0xff]  ;;  %v3030_v56 = vmul.f32 %v5156_v43, %v5156_v43  ;;  %v3032_v26 = vmul.f32 %v2908_v47, %v2908_v47 }
 0x296   : > { %v2931_v52 = vsel %vm5208_vm10, %v5217_v3, 0.0  ;;  %v2476_v47 = vadd.s32 216, %v5036_v61 }
 0x297   : > { %v2964_v42 = vadd.f32 %v2963_v4, %v5118_v21  ;;  %v3087_v44 = vadd.f32 %v3086_v40, %v3043_v55  ;;  %v5227_v4 = vld [vmem:[#allocation10 + $0xb8] sm:$0xff]  ;;  %v5234_v55 = vld [vmem:[#allocation10 + $0xa8] sm:$0xff] }
 0x298   : > { %6042 = vst [vmem:[#allocation41_spill] sm:$0xff] %v5227_v4  ;;  %6045 = vst [vmem:[#allocation42_spill] sm:$0xff] %v5234_v55  ;;  %v2920_v7 = vsel %vm5140_vm7, %v5227_v4, 0.0 }
 0x299   : > { %v2965_v32 = vadd.f32 %v2964_v42, %v2923_v41  ;;  %v2993_v41 = vadd.f32 %v2992_v35, %v5212_v62  ;;  %v3088_v39 = vadd.f32 %v3087_v44, %v3045_v10  ;;  %v3112_v42 = vadd.f32 %v3111_v2, %v3028_v27  ;;  %v5249_v2 = vld [vmem:[#allocation10 + $0xd8] sm:$0xff] }
 0x29a   : > { %v3034_v10 = vmul.f32 %v5182_v54, %v5182_v54  ;;  %v2642_v27 = vand.u32 15, %v5174_v50  ;;  %6046 = vst [vmem:[#allocation43_spill] sm:$0xff] %v5249_v2  ;;  %v2935_v50 = vsel %vm5230_vm11, %v5239_v18, 0.0  ;;  %v2924_v38 = vsel %vm5158_vm8, %v5249_v2, 0.0 }
 0x29b   : > { %v2966_v37 = vadd.f32 %v2965_v32, %v5128_v49  ;;  %v2994_v40 = vadd.f32 %v2993_v41, %v2916_v53  ;;  %v3089_v32 = vadd.f32 %v3088_v39, %v3047_v15  ;;  %v3113_v35 = vadd.f32 %v3112_v42, %v3030_v56  ;;  %v5259_v41 = vld [vmem:[#allocation10 + $0xc8] sm:$0xff] }
 0x29c   : > { %6049 = vst [vmem:[#allocation44_spill] sm:$0xff] %v5259_v41  ;;  %v3036_v56 = vmul.f32 %v2912_v31, %v2912_v31  ;;  %v2656_v31 = vand.u32 15, %v2474_v45  ;;  %vm5279_vm13 = vcmp.lt.s32.totalorder %v2642_v27, 14  ;;  %v3040_v45 = vmul.f32 %v2916_v53, %v2916_v53 }
 0x29d   : > { %v2967_v46 = vadd.f32 %v2966_v37, %v2927_v59  ;;  %v2995_v59 = vadd.f32 %v2994_v40, %v5234_v55  ;;  %v5252_v37 = vld [vmem:[#allocation10 + $0x120] sm:$0xff]  ;;  %v3090_v8 = vadd.f32 %v3089_v32, %v5154_v63  ;;  %v3114_v39 = vadd.f32 %v3113_v35, %v3032_v26  ;;  %v5264_v40 = vld [vmem:[#allocation10 + $0x150] sm:$0xff] }
 0x29e   : > { %v3038_v63 = vmul.f32 %v5212_v62, %v5212_v62  ;;  %v3057_v35 = vmul.f32 %v5252_v37, %v5252_v37  ;;  %v3059_v2 = vmul.f32 %v2935_v50, %v2935_v50  ;;  %v2670_v53 = vand.u32 15, %v2476_v47 }
 0x29f   : > { %v2968_v44 = vadd.f32 %v2967_v46, %v5180_v6  ;;  %v3055_v46 = vmul.f32 %v2931_v52, %v2931_v52  ;;  %v2996_v4 = vadd.f32 %v2995_v59, %v2920_v7  ;;  %v3091_v17 = vadd.f32 %v3090_v8, %v3051_v16  ;;  %v5277_v59 = vld [vmem:[#allocation10 + $0x140] sm:$0xff]  ;;  %v5284_v8 = vld [vmem:[#allocation10 + $0xe8] sm:$0xff] }
 0x2a0   : > { %v3115_v32 = vadd.f32 %v3114_v39, %v3034_v10  ;;  %6053 = vst [vmem:[#allocation46_spill] sm:$0xff] %v5284_v8  ;;  %v2939_v39 = vsel %vm5254_vm12, %v5264_v40, 0.0  ;;  %vm5296_vm14 = vcmp.lt.s32.totalorder %v2656_v31, 14  ;;  %v3061_v57 = vmul.f32 %v5277_v59, %v5277_v59 }
 0x2a1   : > { %v2969_v42 = vadd.f32 %v2968_v44, %v2931_v52  ;;  %v5274_v44 = vld [vmem:[#allocation10 + $0xf8] sm:$0xff]  ;;  %v2997_v52 = vadd.f32 %v2996_v4, %v5259_v41  ;;  %v3092_v36 = vadd.f32 %v3091_v17, %v5203_v13  ;;  %v5289_v4 = vld [vmem:[#allocation10 + $0x170] sm:$0xff]  ;;  %v3042_v13 = vmul.f32 %v5234_v55, %v5234_v55 }
 0x2a2   : > { %6050 = vst [vmem:[#allocation45_spill] sm:$0xff] %v5274_v44  ;;  %v3116_v10 = vadd.f32 %v3115_v32, %v3036_v56  ;;  %6054 = vst [vmem:[#allocation47_spill] sm:$0xff] %v5289_v4  ;;  %v2928_v27 = vsel %vm5186_vm9, %v5274_v44, 0.0  ;;  %v2943_v31 = vsel %vm5279_vm13, %v5289_v4, 0.0  ;;  %v5313_v55 = vld [vmem:[#allocation10 + $0x190] sm:$0xff]  ;;  %vm5320_vm15 = vcmp.lt.s32.totalorder %v2670_v53, 14 }
 0x2a3   : > { %v2970_v26 = vadd.f32 %v2969_v42, %v5252_v37  ;;  %v2998_v62 = vadd.f32 %v2997_v52, %v2924_v38  ;;  %v3093_v20 = vadd.f32 %v3092_v36, %v3055_v46  ;;  %v5304_v46 = vld [vmem:[#allocation10 + $0x160] sm:$0xff]  ;;  %v5308_v36 = vld [vmem:[#allocation10 + $0x108] sm:$0xff]  ;;  %6059 = vst [vmem:[#allocation50_spill] sm:$0xff] %v5313_v55  ;;  %v2947_v53 = vsel %vm5296_vm14, %v5313_v55, 0.0 }
 0x2a4   : > { %v3117_v17 = vadd.f32 %v3116_v10, %v3038_v63  ;;  %6058 = vst [vmem:[#allocation49_spill] sm:$0xff] %v5308_v36  ;;  %v3044_v63 = vmul.f32 %v2920_v7, %v2920_v7  ;;  %v3065_v25 = vmul.f32 %v5304_v46, %v5304_v46  ;;  %v3052_v60 = vmul.f32 %v2928_v27, %v2928_v27 }
 0x2a5   : > { %v2971_v42 = vadd.f32 %v2970_v26, %v2935_v50  ;;  %v5301_v50 = vld [vmem:[#allocation10 + $0x118] sm:$0xff]  ;;  %v2999_v26 = vadd.f32 %v2998_v62, %v5284_v8  ;;  %v3094_v52 = vadd.f32 %v3093_v20, %v3057_v35  ;;  %v3046_v20 = vmul.f32 %v5259_v41, %v5259_v41  ;;  %v5337_v41 = vld [vmem:[#allocation10 + $0x1b0] sm:$0xff] }
 0x2a6   : > { %6057 = vst [vmem:[#allocation48_spill] sm:$0xff] %v5301_v50  ;;  %v3118_v47 = vadd.f32 %v3117_v17, %v3040_v45  ;;  %v2932_v54 = vsel %vm5208_vm10, %v5301_v50, 0.0  ;;  %v5325_v17 = vld [vmem:[#allocation10 + $0x138] sm:$0xff]  ;;  %6064 = vst [vmem:[#allocation53_spill] sm:$0xff] %v5337_v41  ;;  %v3054_v43 = vmul.f32 %v5308_v36, %v5308_v36 }
 0x2a7   : > { %v2972_v32 = vadd.f32 %v2971_v42, %v5277_v59  ;;  %v3063_v42 = vmul.f32 %v2939_v39, %v2939_v39  ;;  %v3000_v44 = vadd.f32 %v2999_v26, %v2928_v27  ;;  %v3095_v62 = vadd.f32 %v3094_v52, %v3059_v2  ;;  %6062 = vst [vmem:[#allocation51_spill] sm:$0xff] %v5325_v17  ;;  %v5332_v26 = vld [vmem:[#allocation10 + $0x128] sm:$0xff]  ;;  %v5363_v27 = vld [vmem:[#allocation10 + $0x178] sm:$0xff] }
 0x2a8   : > { %v3119_v35 = vadd.f32 %v3118_v47, %v3042_v13  ;;  %v3048_v52 = vmul.f32 %v2924_v38, %v2924_v38  ;;  %v2936_v48 = vsel %vm5230_vm11, %v5325_v17, 0.0  ;;  %6067 = vst [vmem:[#allocation56_spill] sm:$0xff] %v5363_v27 }
 0x2a9   : > { %v2973_v10 = vadd.f32 %v2972_v32, %v2939_v39  ;;  %v3001_v39 = vadd.f32 %v3000_v44, %v5308_v36  ;;  %v5328_v32 = vld [vmem:[#allocation10 + $0x180] sm:$0xff]  ;;  %v3096_v2 = vadd.f32 %v3095_v62, %v3061_v57  ;;  %v3050_v57 = vmul.f32 %v5284_v8, %v5284_v8  ;;  %v5375_v36 = vld [vmem:[#allocation10 + $0x198] sm:$0xff] }
 0x2aa   : > { %6063 = vst [vmem:[#allocation52_spill] sm:$0xff] %v5328_v32  ;;  %v3120_v13 = vadd.f32 %v3119_v35, %v3044_v63  ;;  %v5345_v63 = vld [vmem:[#allocation10 + $0x158] sm:$0xff]  ;;  %6069 = vst [vmem:[#allocation58_spill] sm:$0xff] %v5375_v36  ;;  %v2948_v16 = vsel %vm5296_vm14, %v5375_v36, 0.0 }
 0x2ab   : > { %v2974_v45 = vadd.f32 %v2973_v10, %v5304_v46  ;;  %v3067_v10 = vmul.f32 %v2943_v31, %v2943_v31  ;;  %v3002_v50 = vadd.f32 %v3001_v39, %v2932_v54  ;;  %v3097_v44 = vadd.f32 %v3096_v2, %v3063_v42  ;;  %6065 = vst [vmem:[#allocation54_spill] sm:$0xff] %v5345_v63  ;;  %v5352_v39 = vld [vmem:[#allocation10 + $0x148] sm:$0xff] }
 0x2ac   : > { %v3121_v62 = vadd.f32 %v3120_v13, %v3046_v20  ;;  %v2951_v20 = vsel %vm5320_vm15, %v5337_v41, 0.0 }
 0x2ad   : > { %v2975_v47 = vadd.f32 %v2974_v45, %v2943_v31  ;;  %v3003_v35 = vadd.f32 %v3002_v50, %v5332_v26  ;;  %v5348_v45 = vld [vmem:[#allocation10 + $0x1a0] sm:$0xff]  ;;  %v3069_v31 = vmul.f32 %v5328_v32, %v5328_v32  ;;  %v3098_v42 = vadd.f32 %v3097_v44, %v3065_v25 }
 0x2ae   : > { %6066 = vst [vmem:[#allocation55_spill] sm:$0xff] %v5348_v45  ;;  %v3122_v2 = vadd.f32 %v3121_v62, %v3048_v52  ;;  %v2940_v50 = vsel %vm5254_vm12, %v5345_v63, 0.0  ;;  %v3073_v62 = vmul.f32 %v5348_v45, %v5348_v45 }
 0x2af   : > { %v2976_v38 = vadd.f32 %v2975_v47, %v5328_v32  ;;  %v3071_v47 = vmul.f32 %v2947_v53, %v2947_v53  ;;  %v3004_v17 = vadd.f32 %v3003_v35, %v2936_v48  ;;  %v3099_v8 = vadd.f32 %v3098_v42, %v3067_v10 }
 0x2b0   : > { %v3123_v25 = vadd.f32 %v3122_v2, %v3050_v57  ;;  %v3056_v10 = vmul.f32 %v2932_v54, %v2932_v54  ;;  %v3075_v42 = vmul.f32 %v2951_v20, %v2951_v20  ;;  %v2944_v57 = vsel %vm5279_vm13, %v5363_v27, 0.0  ;;  %v5378_v54 = vld [vmem:[#allocation10 + $0x188] sm:$0xff] }
 0x2b1   : > { %v2977_v13 = vadd.f32 %v2976_v38, %v2947_v53  ;;  %v3005_v52 = vadd.f32 %v3004_v17, %v5352_v39  ;;  %v3100_v53 = vadd.f32 %v3099_v8, %v3069_v31  ;;  %v5368_v38 = vld [vmem:[#allocation10 + $0x168] sm:$0xff]  ;;  %v3058_v2 = vmul.f32 %v5332_v26, %v5332_v26 }
 0x2b2   : > { %6068 = vst [vmem:[#allocation57_spill] sm:$0xff] %v5368_v38  ;;  %v3124_v35 = vadd.f32 %v3123_v25, %v3052_v60  ;;  %v3060_v60 = vmul.f32 %v2936_v48, %v2936_v48  ;;  %v3064_v48 = vmul.f32 %v2940_v50, %v2940_v50  ;;  %v3070_v7 = vmul.f32 %v5378_v54, %v5378_v54 }
 0x2b3   : > { %v2978_v44 = vadd.f32 %v2977_v13, %v5348_v45  ;;  %v3006_v63 = vadd.f32 %v3005_v52, %v2940_v50  ;;  %v3101_v9 = vadd.f32 %v3100_v53, %v3071_v47 }
 0x2b4   : > { %v3125_v17 = vadd.f32 %v3124_v35, %v3054_v43  ;;  %v3062_v43 = vmul.f32 %v5352_v39, %v5352_v39  ;;  %v5385_v35 = vld [vmem:[#allocation10 + $0x1b8] sm:$0xff] }
 0x2b5   : > { %v2979_v15 = vadd.f32 %v2978_v44, %v2951_v20  ;;  %v3007_v8 = vadd.f32 %v3006_v63, %v5368_v38  ;;  %v3102_v31 = vadd.f32 %v3101_v9, %v3073_v62  ;;  %6070 = vst [vmem:[#allocation59_spill] sm:$0xff] %v5385_v35  ;;  %v5388_v62 = vld [vmem:[#allocation10 + $0x1a8] sm:$0xff] }
 0x2b6   : > { %v3126_v20 = vadd.f32 %v3125_v17, %v3056_v10  ;;  %6071 = vst [vmem:[#allocation60_spill] sm:$0xff] %v5388_v62 }
 0x2b7   : > { %v2980_v13 = vrot.slane %v2979_v15, 4  ;;  %v3008_v47 = vadd.f32 %v3007_v8, %v2944_v57  ;;  %v3103_v44 = vadd.f32 %v3102_v31, %v3075_v42  ;;  %v3269_v42 = vsub.s32 0, %v5036_v61 }
 0x2b8   : > { %v3127_v52 = vadd.f32 %v3126_v20, %v3058_v2  ;;  %v3066_v2 = vmul.f32 %v5368_v38, %v5368_v38  ;;  %v3265_v20 = vld [vmem:[#allocation7] sm:$0x3] }
 0x2b9   : > { %v2981_v25 = vadd.f32 %v2980_v13, %v2979_v15  ;;  %v3009_v9 = vadd.f32 %v3008_v47, %v5378_v54  ;;  %v3104_v63 = vrot.slane %v3103_v44, 4  ;;  %v2952_v13 = vsel %vm5320_vm15, %v5385_v35, 0.0  ;;  %v6089_v41 = vld [vmem:[#allocation57_spill] sm:$0xff] }
 0x2ba   : > { %v3128_v10 = vadd.f32 %v3127_v52, %v3060_v60  ;;  %v3273_v47 = vsub.s32 1, %v5036_v61  ;;  %v3068_v52 = vmul.f32 %v2944_v57, %v2944_v57  ;;  %v5398_v36 = vrot.slane %v3265_v20, %v3269_v42 }
 0x2bb   : > { %v2982_v53 = vrot.slane %v2981_v25, 2  ;;  %v3010_v17 = vadd.f32 %v3009_v9, %v2948_v16  ;;  %v3105_v56 = vadd.f32 %v3104_v63, %v3103_v44  ;;  %v3072_v57 = vmul.f32 %v2948_v16, %v2948_v16 }
 0x2bc   : > { %v3129_v8 = vadd.f32 %v3128_v10, %v3062_v43  ;;  %v5404_v10 = vrot.slane %v3265_v20, %v3273_v47  ;;  %v6088_v20 = vld [vmem:[#allocation54_spill] sm:$0xff] }
 0x2bd   : > { %v2983_v15 = vadd.f32 %v2982_v53, %v2981_v25  ;;  %v3011_v50 = vadd.f32 %v3010_v17, %v5388_v62  ;;  %v3106_v60 = vrot.slane %v3105_v56, 2  ;;  %v3333_v25 = vld [vmem:[#allocation8] sm:$0x3] }
 0x2be   : > { %v3130_v53 = vadd.f32 %v3129_v8, %v3064_v48  ;;  %v5406_v61 = vrot.slane %v3333_v25, %v3269_v42  ;;  %v5408_v38 = vrot.slane %v3333_v25, %v3273_v47  ;;  %v3074_v8 = vmul.f32 %v5388_v62, %v5388_v62 }
 0x2bf   : > { %v2984_v31 = vrot.slane %v2983_v15, 1  ;;  %v3012_v44 = vadd.f32 %v3011_v50, %v2952_v13  ;;  %v3107_v63 = vadd.f32 %v3106_v60, %v3105_v56  ;;  %v6086_v60 = vld [vmem:[#allocation48_spill] sm:$0xff] }
 0x2c0   : > { %v3131_v35 = vadd.f32 %v3130_v53, %v3066_v2  ;;  %v3076_v2 = vmul.f32 %v2952_v13, %v2952_v13 }
 0x2c1   : > { %v2985_v9 = vadd.f32 %v2984_v31, %v2983_v15  ;;  %v3013_v17 = vrot.slane %v3012_v44, 4  ;;  %v3108_v27 = vrot.slane %v3107_v63, 1 }
 0x2c2   : > { %v3132_v48 = vadd.f32 %v3131_v35, %v3068_v52 }
 0x2c3   : > { %v5402_v43 = vmul.f32 0.0051020407, %v2985_v9  ;;  %v3014_v56 = vadd.f32 %v3013_v17, %v3012_v44  ;;  %v3109_v31 = vadd.f32 %v3108_v27, %v3107_v63 }
 0x2c4   : > { %v3133_v42 = vadd.f32 %v3132_v48, %v3070_v7  ;;  %v6082_v48 = vld [vmem:[#allocation43_spill] sm:$0xff] }
 0x2c5   : > { %v3145_v15 = vmul.f32 %v5402_v43, %v5402_v43  ;;  %v3015_v47 = vrot.slane %v3014_v56, 2  ;;  %v3143_v25 = vmul.f32 0.0051020407, %v3109_v31  ;;  %v6092_v32 = vsub.f32 %v5047_v22, %v5402_v43 }
 0x2c6   : > { %v3134_v13 = vadd.f32 %v3133_v42, %v3072_v57  ;;  %v6083_v57 = vld [vmem:[#allocation46_spill] sm:$0xff]  ;;  %v6095_v16 = vsub.f32 %v5052_v11, %v5402_v43  ;;  %v6096_v22 = vsub.f32 %v5075_v19, %v5402_v43 }
 0x2c7   : > { %v3016_v53 = vadd.f32 %v3015_v47, %v3014_v56  ;;  %v3147_v7 = vsub.f32 %v3143_v25, %v3145_v15  ;;  %v6075_v15 = vld [vmem:[#allocation38_spill] sm:$0xff] }
 0x2c8   : > { %v3135_v17 = vadd.f32 %v3134_v13, %v3074_v8  ;;  %v6079_v56 = vld [vmem:[#allocation42_spill] sm:$0xff]  ;;  %v6080_v13 = vld [vmem:[#allocation41_spill] sm:$0xff]  ;;  %v6081_v8 = vld [vmem:[#allocation44_spill] sm:$0xff] }
 0x2c9   : > { %v3017_v31 = vrot.slane %v3016_v53, 1  ;;  %v3149_v44 = vadd.f32 1e-05, %v3147_v7 }
 0x2ca   : > { %v3136_v63 = vadd.f32 %v3135_v17, %v3076_v2  ;;  %v6073_v2 = vld [vmem:[#allocation36_spill] sm:$0xff] }
 0x2cb   : > { %v3018_v25 = vadd.f32 %v3017_v31, %v3016_v53  ;;  %4042 = vrsqrt.f32 %v3149_v44  ;;  %v6072_v44 = vld [vmem:[#allocation34_spill] sm:$0xff]  ;;  %v6076_v53 = vld [vmem:[#allocation37_spill] sm:$0xff]  ;;  %v6077_v31 = vld [vmem:[#allocation40_spill] sm:$0xff] }
 0x2cc   : > { %v3137_v47 = vrot.slane %v3136_v63, 4 }
 0x2cd   : > { %v5458_v17 = vmul.f32 0.0051020407, %v3018_v25  ;;  %v6074_v25 = vld [vmem:[#allocation35_spill] sm:$0xff] }
 0x2ce   : > { %v3138_v42 = vadd.f32 %v3137_v47, %v3136_v63  ;;  %v6078_v63 = vld [vmem:[#allocation39_spill] sm:$0xff] }
 0x2cf   : > { %v3146_v7 = vmul.f32 %v5458_v17, %v5458_v17 }
 0x2d0   : > { %v3139_v47 = vrot.slane %v3138_v42, 2 }
 0x2d2   : > { %v3140_v27 = vadd.f32 %v3139_v47, %v3138_v42  ;;  %v6093_v42 = vsub.f32 %v5040_v23, %v5402_v43  ;;  %v6097_v23 = vsub.f32 %v5067_v24, %v5402_v43 }
 0x2d4   : > { %v3141_v52 = vrot.slane %v3140_v27, 1 }
 0x2d5   : > { %v5522_v9 = vpop.eup %4042 }
 0x2d6   : > { %v3142_v45 = vadd.f32 %v3141_v52, %v3140_v27  ;;  %v3209_v4 = vmul.f32 %v5522_v9, %v6092_v32  ;;  %v3211_v47 = vmul.f32 %v5522_v9, %v6093_v42  ;;  %v6094_v27 = vsub.f32 %v5059_v33, %v5402_v43 }
 0x2d7   : > { %v3215_v50 = vmul.f32 %v5522_v9, %v6095_v16  ;;  %v3217_v32 = vmul.f32 %v5522_v9, %v6096_v22  ;;  %v3219_v42 = vmul.f32 %v5522_v9, %v6097_v23  ;;  %v6098_v33 = vsub.f32 %v5092_v5, %v5402_v43 }
 0x2d8   : > { %v3213_v52 = vmul.f32 %v5522_v9, %v6094_v27  ;;  %v3144_v35 = vmul.f32 0.0051020407, %v3142_v45  ;;  %v3277_v11 = vmul.f32 %v5398_v36, %v3209_v4  ;;  %v3279_v16 = vmul.f32 %v5398_v36, %v3211_v47 }
 0x2d9   : > { %v3221_v27 = vmul.f32 %v5522_v9, %v6098_v33  ;;  %v3283_v19 = vmul.f32 %v5398_v36, %v3215_v50  ;;  %v3285_v22 = vmul.f32 %v5398_v36, %v3217_v32  ;;  %v3287_v24 = vmul.f32 %v5398_v36, %v3219_v42 }
 0x2da   : > { %v3281_v45 = vmul.f32 %v5398_v36, %v3213_v52  ;;  %v3148_v62 = vsub.f32 %v3144_v35, %v3146_v7  ;;  %v3345_v55 = vadd.f32 %v5406_v61, %v3277_v11  ;;  %v3347_v5 = vadd.f32 %v5406_v61, %v3279_v16 }
 0x2db   : > { %v3289_v23 = vmul.f32 %v5398_v36, %v3221_v27  ;;  %v3351_v4 = vadd.f32 %v5406_v61, %v3283_v19  ;;  %v3353_v52 = vadd.f32 %v5406_v61, %v3285_v22  ;;  %v3355_v50 = vadd.f32 %v5406_v61, %v3287_v24 }
 0x2dc   : > { %v3349_v33 = vadd.f32 %v5406_v61, %v3281_v45  ;;  %v3150_v47 = vadd.f32 1e-05, %v3148_v62  ;;  %3401 = vst [vmem:[#allocation10] sm:$0xff] %v3345_v55  ;;  %3403 = vst [vmem:[#allocation10 + $0x10] sm:$0xff] %v3347_v5  ;;  %v6099_v7 = vsub.f32 %v5082_v58, %v5402_v43  ;;  %v6100_v42 = vsub.f32 %v5096_v34, %v5402_v43 }
 0x2dd   : > { %v3357_v35 = vadd.f32 %v5406_v61, %v3289_v23  ;;  %3407 = vst [vmem:[#allocation10 + $0x30] sm:$0xff] %v3351_v4  ;;  %v6101_v27 = vsub.f32 %v5109_v28, %v5402_v43  ;;  %v6102_v55 = vsub.f32 %v5098_v14, %v5402_v43  ;;  %3409 = vst [vmem:[#allocation10 + $0x40] sm:$0xff] %v3353_v52 }
 0x2de   : > { %3405 = vst [vmem:[#allocation10 + $0x20] sm:$0xff] %v3349_v33  ;;  %v3223_v32 = vmul.f32 %v5522_v9, %v6099_v7  ;;  %v3225_v62 = vmul.f32 %v5522_v9, %v6100_v42  ;;  %4044 = vrsqrt.f32 %v3150_v47  ;;  %3411 = vst [vmem:[#allocation10 + $0x50] sm:$0xff] %v3355_v50  ;;  %v6103_v58 = vsub.f32 %v5138_v12, %v5402_v43 }
 0x2df   : > { %v3227_v11 = vmul.f32 %v5522_v9, %v6101_v27  ;;  %v3229_v16 = vmul.f32 %v5522_v9, %v6102_v55  ;;  %3413 = vst [vmem:[#allocation10 + $0x60] sm:$0xff] %v3357_v35  ;;  %v6104_v45 = vsub.f32 %v5118_v21, %v5402_v43  ;;  %v6105_v19 = vsub.f32 %v5162_v1, %v5402_v43 }
 0x2e0   : > { %v3231_v34 = vmul.f32 %v5522_v9, %v6103_v58  ;;  %v3291_v22 = vmul.f32 %v5398_v36, %v3223_v32  ;;  %v3293_v24 = vmul.f32 %v5398_v36, %v3225_v62  ;;  %v6106_v4 = vsub.f32 %v5128_v49, %v5402_v43 }
 0x2e1   : > { %v3233_v28 = vmul.f32 %v5522_v9, %v6104_v45  ;;  %v3235_v14 = vmul.f32 %v5522_v9, %v6105_v19  ;;  %v3295_v23 = vmul.f32 %v5398_v36, %v3227_v11  ;;  %v3297_v12 = vmul.f32 %v5398_v36, %v3229_v16 }
 0x2e2   : > { %v3299_v5 = vmul.f32 %v5398_v36, %v3231_v34  ;;  %v3237_v1 = vmul.f32 %v5522_v9, %v6106_v4  ;;  %v3359_v47 = vadd.f32 %v5406_v61, %v3291_v22  ;;  %v3361_v52 = vadd.f32 %v5406_v61, %v3293_v24 }
 0x2e3   : > { %v3301_v33 = vmul.f32 %v5398_v36, %v3233_v28  ;;  %v3303_v21 = vmul.f32 %v5398_v36, %v3235_v14  ;;  %v3363_v50 = vadd.f32 %v5406_v61, %v3295_v23  ;;  %v3365_v35 = vadd.f32 %v5406_v61, %v3297_v12 }
 0x2e4   : > { %v3367_v7 = vadd.f32 %v5406_v61, %v3299_v5  ;;  %v3305_v62 = vmul.f32 %v5398_v36, %v3237_v1  ;;  %3415 = vst [vmem:[#allocation10 + $0x70] sm:$0xff] %v3359_v47  ;;  %3417 = vst [vmem:[#allocation10 + $0x80] sm:$0xff] %v3361_v52  ;;  %v6107_v49 = vsub.f32 %v5193_v0, %v5402_v43 }
 0x2e5   : > { %v3369_v32 = vadd.f32 %v5406_v61, %v3301_v33  ;;  %v3371_v42 = vadd.f32 %v5406_v61, %v3303_v21  ;;  %3419 = vst [vmem:[#allocation10 + $0x90] sm:$0xff] %v3363_v50  ;;  %3421 = vst [vmem:[#allocation10 + $0xa0] sm:$0xff] %v3365_v35  ;;  %v6108_v11 = vsub.f32 %v5180_v6, %v5402_v43 }
 0x2e6   : > { %v3239_v27 = vmul.f32 %v5522_v9, %v6107_v49  ;;  %v6109_v16 = vsub.f32 %v5217_v3, %v5402_v43  ;;  %v6110_v34 = vsub.f32 %v5252_v37, %v5402_v43  ;;  %3423 = vst [vmem:[#allocation10 + $0xb0] sm:$0xff] %v3367_v7  ;;  %v3373_v0 = vadd.f32 %v5406_v61, %v3305_v62 }
 0x2e7   : > { %v3241_v55 = vmul.f32 %v5522_v9, %v6108_v11  ;;  %3425 = vst [vmem:[#allocation10 + $0xc0] sm:$0xff] %v3369_v32  ;;  %3427 = vst [vmem:[#allocation10 + $0xd0] sm:$0xff] %v3371_v42  ;;  %v6111_v6 = vsub.f32 %v5239_v18, %v5402_v43  ;;  %v6112_v3 = vsub.f32 %v5277_v59, %v5402_v43 }
 0x2e8   : > { %v3243_v58 = vmul.f32 %v5522_v9, %v6109_v16  ;;  %v3245_v45 = vmul.f32 %v5522_v9, %v6110_v34  ;;  %v6113_v37 = vsub.f32 %v5264_v40, %v5402_v43  ;;  %v3307_v22 = vmul.f32 %v5398_v36, %v3239_v27  ;;  %3429 = vst [vmem:[#allocation10 + $0xe0] sm:$0xff] %v3373_v0  ;;  %v5663_v52 = vpop.eup %4044 }
 0x2e9   : > { %v3247_v28 = vmul.f32 %v5522_v9, %v6111_v6  ;;  %v3249_v19 = vmul.f32 %v5522_v9, %v6112_v3  ;;  %v3309_v24 = vmul.f32 %v5398_v36, %v3241_v55  ;;  %v6114_v40 = vsub.f32 %v5304_v46, %v5402_v43 }
 0x2ea   : > { %v3251_v14 = vmul.f32 %v5522_v9, %v6113_v37  ;;  %v3311_v23 = vmul.f32 %v5398_v36, %v3243_v58  ;;  %v3313_v18 = vmul.f32 %v5398_v36, %v3245_v45  ;;  %v3375_v21 = vadd.f32 %v5406_v61, %v3307_v22 }
 0x2eb   : > { %v3315_v12 = vmul.f32 %v5398_v36, %v3247_v28  ;;  %v3317_v59 = vmul.f32 %v5398_v36, %v3249_v19  ;;  %v3253_v33 = vmul.f32 %v5522_v9, %v6114_v40  ;;  %v3377_v4 = vadd.f32 %v5406_v61, %v3309_v24 }
 0x2ec   : > { %v3319_v5 = vmul.f32 %v5398_v36, %v3251_v14  ;;  %v3379_v1 = vadd.f32 %v5406_v61, %v3311_v23  ;;  %v3381_v47 = vadd.f32 %v5406_v61, %v3313_v18  ;;  %v6115_v32 = vsub.f32 %v5104_v51, %v5458_v17  ;;  %3431 = vst [vmem:[#allocation10 + $0xf0] sm:$0xff] %v3375_v21 }
 0x2ed   : > { %v3383_v50 = vadd.f32 %v5406_v61, %v3315_v12  ;;  %v3385_v35 = vadd.f32 %v5406_v61, %v3317_v59  ;;  %v5669_v46 = vmul.f32 %v5398_v36, %v3253_v33  ;;  %v6116_v62 = vsub.f32 %v5090_v30, %v5458_v17  ;;  %3433 = vst [vmem:[#allocation10 + $0x100] sm:$0xff] %v3377_v4 }
 0x2ee   : > { %v3387_v7 = vadd.f32 %v5406_v61, %v3319_v5  ;;  %v3210_v42 = vmul.f32 %v5663_v52, %v6115_v32  ;;  %v6117_v27 = vsub.f32 %v5126_v29, %v5458_v17  ;;  %v6118_v55 = vsub.f32 %v6072_v44, %v5458_v17  ;;  %3435 = vst [vmem:[#allocation10 + $0x110] sm:$0xff] %v3379_v1  ;;  %v6130_v32 = vld [vmem:[#allocation45_spill] sm:$0xff] }
 0x2ef   : > { %v3212_v49 = vmul.f32 %v5663_v52, %v6116_v62  ;;  %3437 = vst [vmem:[#allocation10 + $0x120] sm:$0xff] %v3381_v47  ;;  %v6119_v51 = vsub.f32 %v6073_v2, %v5458_v17  ;;  %v6120_v58 = vsub.f32 %v6074_v25, %v5458_v17  ;;  %v6121_v34 = vsub.f32 %v6075_v15, %v5458_v17 }
 0x2f0   : > { %v3214_v11 = vmul.f32 %v5663_v52, %v6117_v27  ;;  %v3216_v16 = vmul.f32 %v5663_v52, %v6118_v55  ;;  %v6122_v45 = vsub.f32 %v6076_v53, %v5458_v17  ;;  %3439 = vst [vmem:[#allocation10 + $0x130] sm:$0xff] %v3383_v50  ;;  %3441 = vst [vmem:[#allocation10 + $0x140] sm:$0xff] %v3385_v35 }
 0x2f1   : > { %v3218_v30 = vmul.f32 %v5663_v52, %v6119_v51  ;;  %v3220_v29 = vmul.f32 %v5663_v52, %v6120_v58  ;;  %v3222_v44 = vmul.f32 %v5663_v52, %v6121_v34  ;;  %3443 = vst [vmem:[#allocation10 + $0x150] sm:$0xff] %v3387_v7  ;;  %v3278_v2 = vmul.f32 %v5404_v10, %v3210_v42 }
 0x2f2   : > { %v3224_v0 = vmul.f32 %v5663_v52, %v6122_v45  ;;  %v3280_v6 = vmul.f32 %v5404_v10, %v3212_v49  ;;  %v3282_v25 = vmul.f32 %v5404_v10, %v3214_v11  ;;  %v3284_v28 = vmul.f32 %v5404_v10, %v3216_v16 }
 0x2f3   : > { %v3286_v15 = vmul.f32 %v5404_v10, %v3218_v30  ;;  %v3288_v3 = vmul.f32 %v5404_v10, %v3220_v29  ;;  %v3290_v19 = vmul.f32 %v5404_v10, %v3222_v44  ;;  %v3346_v37 = vadd.f32 %v5408_v38, %v3278_v2  ;;  %v6132_v2 = vld [vmem:[#allocation49_spill] sm:$0xff] }
 0x2f4   : > { %v3292_v53 = vmul.f32 %v5404_v10, %v3224_v0  ;;  %v3348_v14 = vadd.f32 %v5408_v38, %v3280_v6  ;;  %v3350_v22 = vadd.f32 %v5408_v38, %v3282_v25  ;;  %v3352_v24 = vadd.f32 %v5408_v38, %v3284_v28 }
 0x2f5   : > { %v3354_v23 = vadd.f32 %v5408_v38, %v3286_v15  ;;  %v3356_v18 = vadd.f32 %v5408_v38, %v3288_v3  ;;  %v3358_v12 = vadd.f32 %v5408_v38, %v3290_v19  ;;  %3402 = vst [vmem:[#allocation10 + $0x8] sm:$0xff] %v3346_v37  ;;  %v6123_v5 = vsub.f32 %v6077_v31, %v5458_v17 }
 0x2f6   : > { %v3360_v59 = vadd.f32 %v5408_v38, %v3292_v53  ;;  %3404 = vst [vmem:[#allocation10 + $0x18] sm:$0xff] %v3348_v14  ;;  %3406 = vst [vmem:[#allocation10 + $0x28] sm:$0xff] %v3350_v22  ;;  %v6124_v33 = vsub.f32 %v6078_v63, %v5458_v17  ;;  %v6125_v4 = vsub.f32 %v6079_v56, %v5458_v17  ;;  %v6136_v53 = vld [vmem:[#allocation51_spill] sm:$0xff] }
 0x2f7   : > { %3408 = vst [vmem:[#allocation10 + $0x38] sm:$0xff] %v3352_v24  ;;  %v3226_v40 = vmul.f32 %v5663_v52, %v6123_v5  ;;  %v6126_v47 = vsub.f32 %v6080_v13, %v5458_v17  ;;  %3410 = vst [vmem:[#allocation10 + $0x48] sm:$0xff] %v3354_v23  ;;  %v6127_v31 = vsub.f32 %v6081_v8, %v5458_v17 }
 0x2f8   : > { %v3228_v21 = vmul.f32 %v5663_v52, %v6124_v33  ;;  %v3230_v1 = vmul.f32 %v5663_v52, %v6125_v4  ;;  %3412 = vst [vmem:[#allocation10 + $0x58] sm:$0xff] %v3356_v18  ;;  %3414 = vst [vmem:[#allocation10 + $0x68] sm:$0xff] %v3358_v12  ;;  %v6128_v35 = vsub.f32 %v6082_v48, %v5458_v17 }
 0x2f9   : > { %v3232_v50 = vmul.f32 %v5663_v52, %v6126_v47  ;;  %3416 = vst [vmem:[#allocation10 + $0x78] sm:$0xff] %v3360_v59  ;;  %v3234_v63 = vmul.f32 %v5663_v52, %v6127_v31  ;;  %v6129_v7 = vsub.f32 %v6083_v57, %v5458_v17  ;;  %v6131_v42 = vsub.f32 %v6130_v32, %v5458_v17 }
 0x2fa   : > { %v3236_v56 = vmul.f32 %v5663_v52, %v6128_v35  ;;  %v3294_v49 = vmul.f32 %v5404_v10, %v3226_v40  ;;  %v3296_v8 = vmul.f32 %v5404_v10, %v3228_v21  ;;  %v3298_v27 = vmul.f32 %v5404_v10, %v3230_v1  ;;  %v6141_v21 = vld [vmem:[#allocation47_spill] sm:$0xff] }
 0x2fb   : > { %v3238_v13 = vmul.f32 %v5663_v52, %v6129_v7  ;;  %v3240_v62 = vmul.f32 %v5663_v52, %v6131_v42  ;;  %v3300_v48 = vmul.f32 %v5404_v10, %v3232_v50  ;;  %v3302_v11 = vmul.f32 %v5404_v10, %v3234_v63 }
 0x2fc   : > { %v3304_v55 = vmul.f32 %v5404_v10, %v3236_v56  ;;  %v3362_v51 = vadd.f32 %v5408_v38, %v3294_v49  ;;  %v3364_v30 = vadd.f32 %v5408_v38, %v3296_v8  ;;  %v3366_v58 = vadd.f32 %v5408_v38, %v3298_v27 }
 0x2fd   : > { %v3306_v57 = vmul.f32 %v5404_v10, %v3238_v13  ;;  %v3308_v16 = vmul.f32 %v5404_v10, %v3240_v62  ;;  %v3368_v29 = vadd.f32 %v5408_v38, %v3300_v48  ;;  %v3370_v34 = vadd.f32 %v5408_v38, %v3302_v11  ;;  %v6143_v13 = vld [vmem:[#allocation56_spill] sm:$0xff]  ;;  %v6148_v11 = vld [vmem:[#allocation50_spill] sm:$0xff] }
 0x2fe   : > { %v3372_v44 = vadd.f32 %v5408_v38, %v3304_v55  ;;  %3418 = vst [vmem:[#allocation10 + $0x88] sm:$0xff] %v3362_v51  ;;  %3420 = vst [vmem:[#allocation10 + $0x98] sm:$0xff] %v3364_v30  ;;  %v6133_v6 = vsub.f32 %v6132_v2, %v5458_v17  ;;  %v6134_v28 = vsub.f32 %v6086_v60, %v5458_v17  ;;  %v6145_v62 = vld [vmem:[#allocation52_spill] sm:$0xff]  ;;  %v6150_v51 = vld [vmem:[#allocation58_spill] sm:$0xff] }
 0x2ff   : > { %v3374_v45 = vadd.f32 %v5408_v38, %v3306_v57  ;;  %v3376_v0 = vadd.f32 %v5408_v38, %v3308_v16  ;;  %3422 = vst [vmem:[#allocation10 + $0xa8] sm:$0xff] %v3366_v58  ;;  %3424 = vst [vmem:[#allocation10 + $0xb8] sm:$0xff] %v3368_v29  ;;  %v6135_v3 = vsub.f32 %v5332_v26, %v5458_v17  ;;  %v6152_v29 = vld [vmem:[#allocation55_spill] sm:$0xff] }
 0x300   : > { %v3242_v25 = vmul.f32 %v5663_v52, %v6133_v6  ;;  %v3244_v15 = vmul.f32 %v5663_v52, %v6134_v28  ;;  %v6137_v37 = vsub.f32 %v6136_v53, %v5458_v17  ;;  %3426 = vst [vmem:[#allocation10 + $0xc8] sm:$0xff] %v3370_v34  ;;  %3428 = vst [vmem:[#allocation10 + $0xd8] sm:$0xff] %v3372_v44  ;;  %v6154_v44 = vld [vmem:[#allocation60_spill] sm:$0xff]  ;;  %v6156_v53 = vld [vmem:[#allocation53_spill] sm:$0xff] }
 0x301   : > { %v3246_v19 = vmul.f32 %v5663_v52, %v6135_v3  ;;  %3430 = vst [vmem:[#allocation10 + $0xe8] sm:$0xff] %v3374_v45  ;;  %3432 = vst [vmem:[#allocation10 + $0xf8] sm:$0xff] %v3376_v0  ;;  %v6138_v22 = vsub.f32 %v5352_v39, %v5458_v17  ;;  %v6139_v24 = vsub.f32 %v6088_v20, %v5458_v17 }
 0x302   : > { %v3248_v14 = vmul.f32 %v5663_v52, %v6137_v37  ;;  %v3389_v23 = vadd.f32 %v5406_v61, %v5669_v46  ;;  %v6140_v18 = vsub.f32 %v6089_v41, %v5458_v17  ;;  %v3310_v59 = vmul.f32 %v5404_v10, %v3242_v25 }
 0x303   : > { %v3250_v60 = vmul.f32 %v5663_v52, %v6138_v22  ;;  %v3252_v26 = vmul.f32 %v5663_v52, %v6139_v24  ;;  %v3312_v5 = vmul.f32 %v5404_v10, %v3244_v15  ;;  %v3314_v39 = vmul.f32 %v5404_v10, %v3246_v19 }
 0x304   : > { %v3254_v12 = vmul.f32 %v5663_v52, %v6140_v18  ;;  %v3316_v40 = vmul.f32 %v5404_v10, %v3248_v14  ;;  %3445 = vst [vmem:[#allocation10 + $0x160] sm:$0xff] %v3389_v23  ;;  %v6142_v41 = vsub.f32 %v6141_v21, %v5402_v43  ;;  %v3378_v1 = vadd.f32 %v5408_v38, %v3310_v59 }
 0x305   : > { %v3318_v20 = vmul.f32 %v5404_v10, %v3250_v60  ;;  %v3320_v33 = vmul.f32 %v5404_v10, %v3252_v26  ;;  %v3380_v47 = vadd.f32 %v5408_v38, %v3312_v5  ;;  %v3382_v50 = vadd.f32 %v5408_v38, %v3314_v39 }
 0x306   : > { %v3322_v46 = vmul.f32 %v5404_v10, %v3254_v12  ;;  %v3255_v4 = vmul.f32 %v5522_v9, %v6142_v41  ;;  %v3384_v31 = vadd.f32 %v5408_v38, %v3316_v40  ;;  %3434 = vst [vmem:[#allocation10 + $0x108] sm:$0xff] %v3378_v1  ;;  %v6144_v32 = vsub.f32 %v6143_v13, %v5458_v17 }
 0x307   : > { %v3386_v63 = vadd.f32 %v5408_v38, %v3318_v20  ;;  %v3388_v35 = vadd.f32 %v5408_v38, %v3320_v33  ;;  %3436 = vst [vmem:[#allocation10 + $0x118] sm:$0xff] %v3380_v47  ;;  %3438 = vst [vmem:[#allocation10 + $0x128] sm:$0xff] %v3382_v50  ;;  %v6146_v49 = vsub.f32 %v6145_v62, %v5402_v43 }
 0x308   : > { %v3390_v56 = vadd.f32 %v5408_v38, %v3322_v46  ;;  %v3323_v7 = vmul.f32 %v5398_v36, %v3255_v4  ;;  %3440 = vst [vmem:[#allocation10 + $0x138] sm:$0xff] %v3384_v31  ;;  %v3256_v42 = vmul.f32 %v5663_v52, %v6144_v32  ;;  %v6147_v27 = vsub.f32 %v5378_v54, %v5458_v17 }
 0x309   : > { %v3257_v8 = vmul.f32 %v5522_v9, %v6146_v49  ;;  %v6149_v55 = vsub.f32 %v6148_v11, %v5402_v43  ;;  %3442 = vst [vmem:[#allocation10 + $0x148] sm:$0xff] %v3386_v63  ;;  %3444 = vst [vmem:[#allocation10 + $0x158] sm:$0xff] %v3388_v35  ;;  %v6151_v30 = vsub.f32 %v6150_v51, %v5458_v17 }
 0x30a   : > { %v3258_v48 = vmul.f32 %v5663_v52, %v6147_v27  ;;  %3446 = vst [vmem:[#allocation10 + $0x168] sm:$0xff] %v3390_v56  ;;  %v3391_v16 = vadd.f32 %v5406_v61, %v3323_v7  ;;  %v6153_v54 = vsub.f32 %v6152_v29, %v5402_v43  ;;  %v6155_v45 = vsub.f32 %v6154_v44, %v5458_v17 }
 0x30b   : > { %v3259_v57 = vmul.f32 %v5522_v9, %v6149_v55  ;;  %v3260_v58 = vmul.f32 %v5663_v52, %v6151_v30  ;;  %v3324_v2 = vmul.f32 %v5404_v10, %v3256_v42  ;;  %v3325_v6 = vmul.f32 %v5398_v36, %v3257_v8 }
 0x30c   : > { %v3261_v34 = vmul.f32 %v5522_v9, %v6153_v54  ;;  %v3262_v0 = vmul.f32 %v5663_v52, %v6155_v45  ;;  %v3326_v25 = vmul.f32 %v5404_v10, %v3258_v48  ;;  %3447 = vst [vmem:[#allocation10 + $0x170] sm:$0xff] %v3391_v16  ;;  %v6157_v37 = vsub.f32 %v6156_v53, %v5402_v43  ;;  %v6158_v43 = vld [vmem:[#allocation59_spill] sm:$0xff] }
 0x30d   : > { %v3327_v28 = vmul.f32 %v5398_v36, %v3259_v57  ;;  %v3328_v15 = vmul.f32 %v5404_v10, %v3260_v58  ;;  %v3392_v22 = vadd.f32 %v5408_v38, %v3324_v2  ;;  %v3393_v60 = vadd.f32 %v5406_v61, %v3325_v6 }
 0x30e   : > { %v3329_v3 = vmul.f32 %v5398_v36, %v3261_v34  ;;  %v3330_v19 = vmul.f32 %v5404_v10, %v3262_v0  ;;  %v3263_v14 = vmul.f32 %v5522_v9, %v6157_v37  ;;  %v3394_v24 = vadd.f32 %v5408_v38, %v3326_v25 }
 0x30f   : > { %v3395_v26 = vadd.f32 %v5406_v61, %v3327_v28  ;;  %v3396_v23 = vadd.f32 %v5408_v38, %v3328_v15  ;;  %3448 = vst [vmem:[#allocation10 + $0x178] sm:$0xff] %v3392_v22  ;;  %3449 = vst [vmem:[#allocation10 + $0x180] sm:$0xff] %v3393_v60  ;;  %v3208_v9 = vsub.f32 %v6158_v43, %v5458_v17 }
 0x310   : > { %v3397_v18 = vadd.f32 %v5406_v61, %v3329_v3  ;;  %v3398_v12 = vadd.f32 %v5408_v38, %v3330_v19  ;;  %v3331_v59 = vmul.f32 %v5398_v36, %v3263_v14  ;;  %3450 = vst [vmem:[#allocation10 + $0x188] sm:$0xff] %v3394_v24 }
 0x311   : > { %3451 = vst [vmem:[#allocation10 + $0x190] sm:$0xff] %v3395_v26  ;;  %3452 = vst [vmem:[#allocation10 + $0x198] sm:$0xff] %v3396_v23  ;;  %v3264_v39 = vmul.f32 %v5663_v52, %v3208_v9 }
 0x312   : > { %3453 = vst [vmem:[#allocation10 + $0x1a0] sm:$0xff] %v3397_v18  ;;  %3454 = vst [vmem:[#allocation10 + $0x1a8] sm:$0xff] %v3398_v12  ;;  %v3399_v5 = vadd.f32 %v5406_v61, %v3331_v59 }
 0x313   : > { %v3332_v40 = vmul.f32 %v5404_v10, %v3264_v39 }
 0x314   : > { %3455 = vst [vmem:[#allocation10 + $0x1b0] sm:$0xff] %v3399_v5 }
 0x315   : > { %v3400_v20 = vadd.f32 %v5408_v38, %v3332_v40 }
 0x317   : > { %3456 = vst [vmem:[#allocation10 + $0x1b8] sm:$0xff] %v3400_v20 }
 0x318 PF: > { %p3794_p11 = scmp.eq.s32.totalorder %s4318_s21, 2  ;;  %s4261_s18 = smov [#allocation10]  }
 0x319   : > { %s3466_s25 = sshll.u32 %s4261_s18, 4  ;;  %s3467_s25 = int_to_ptr.vmem [resolvable:$true] %s3466_s25 }
 0x31a   : > { %s4160_s10 = scalar_lea.vmem %s3467_s25, 7168  ;;  %p4167_p6 = scmp.lt.s32.totalorder %s3467_s25, %s3467_s25 }
 0x31b   : > { %p4161_p8 = scmp.ne.s32.totalorder %s3467_s25, %s4160_s10  ;;  %p4168_p12 = scmp.lt.s32.totalorder %s4160_s10, %s4160_s10 }
 0x31d   : > { %p4162_p1 = pnand %p4161_p8, %p3794_p11  ;;  %p4169_p4 = por %p4168_p12, %p4167_p6 }
 0x31f   : > { %p4163_p2 = pneg %p4162_p1 }
 0x321   : > { %p4170_p5 = pnand %p4169_p4, %p4163_p2 }
 0x323   : > { %4173 = shalt.err (!%p4170_p5)
}
 0x324   : > { %s4174_s8 = scalar_lea.hbm %s5915_s4, 7168 }
 0x325   : > { %p4175_p3 = scmp.ne.s32.totalorder %s5915_s4, %s4174_s8  ;;  %p4180_p10 = scmp.lt.u32.totalorder %s4174_s8, %s5915_s4 }
 0x327   : > { %p4176_p7 = pnand %p4175_p3, %p3794_p11 }
 0x329   : > { %p4177_p9 = pneg %p4176_p7 }
 0x32b   : > { %p4182_p0 = pnand %p4180_p10, %p4177_p9 }
 0x32d   : > { %4185 = shalt.err (!%p4182_p0)
}
 0x32e   : > { %s4262_s5 = smov 256   ;;  %s4263_s14 = smov 16  }
 0x32f   : > { %3770 = dma.vmem_to_hbm [thread:$0]  (%p3794_p11), %s3467_s25, 7168, %s5915_s4, [#allocation4], %s4262_s5, %s4262_s5, %s4263_s14  }
 0x330   : > { %4227 = dma.done.wait (%p3794_p11), [#allocation4], 7168  }
 0x331   : > { %4229 = vsyncadd (%p3794_p11), [#allocation4], 4294960128 }
 0x332 PF: > { %s20_s20 = sadd.s32 1, %s4252_s20   ;;  %s6159_s15 = smov %s4236_s16 }
 0x333   : > { %p17_p13 = scmp.ge.s32.totalorder %s20_s20, 5   ;;  %s6160_s16 = smov %s4240_s17 }
 0x334   : > { %s6161_s17 = smov %s4428_s29  ;;  %s6162_s18 = smov %s4248_s19 }
 0x335   : > { %s6163_s19 = smov %s6165_s9  ;;  %19 = sbr.rel (!%p17_p13) target bundleno = 7 (0x7), region = 98 }
 0x33c   :  { %3482 = vsyncpa [#allocation3], 1 }
 0x33d   :  { %3484 = vsyncpa [#allocation3 + $0x1], 1 }
 0x33e   :  { %3485 = vsyncpa [#allocation6], 1 }
 0x33f   :  { %3487 = vsyncpa [#allocation6 + $0x1], 1 }
 0x340   :  { %3488 = vsyncpa [#allocation9], 1 }
 0x341   :  { %3489 = vsyncpa [#allocation4], 1 }
 0x342   :  { %3491 = vsyncpa [#allocation4 + $0x1], 1 }

</bundles_post_ra>
